<compile_context>
chip_gen: v6e
topology: v6e:2x2x1
jax: 0.10.0
libtpu: 0.0.40
codegen_flags: <defaults>
</compile_context>

<pallas_src>
import functools

import jax
import jax.numpy as jnp
from jax.experimental import pallas as pl
from jax.experimental.pallas import tpu as pltpu

# --- static model dims (mirror Inter_Critic / Inter_Critic_Core __init__) ---
SELF_INFO_LEN = 2
CNN_OUT_DIM   = 192
SELF_ENC_HID  = 16
SELF_ENC_OUT  = 8
ATT_Q_DIM     = 3                   # entity feature dim / projected query dim
D_ATT         = 64
MLP_IN        = CNN_OUT_DIM + SELF_ENC_OUT + 2 * D_ATT + 2 * D_ATT   # 456
MLP_HID       = 64
BIG_DIM       = 192
ACT_HID       = 32
N_ACTIONS     = 36
NEG_SLOPE     = 0.01

GRID_C, GRID_H, GRID_W = 4, 16, 16
GRID_FLAT = GRID_C * GRID_H * GRID_W                                  # 1024
_ATT_SCALE = 1.0 / (D_ATT ** 0.5)

OUT_LANES  = 128                    # lane-dense packed output width
PACK_WIDTH = N_ACTIONS + 3          # 36 logits + value + logp + action = 39


def _round_up(x, m):
    return ((x + m - 1) // m) * m


def _leaky(x):
    # LeakyReLU as max(x, slope*x): one mul + one max on the VPU.
    return jnp.maximum(x, NEG_SLOPE * x)


def _proj2(x, w, b):
    # x: (B, 2), w: (2, D), b: (1, D) -> (B, D). Expanded to avoid a K=2 matmul.
    return x[:, 0:1] * w[0:1, :] + x[:, 1:2] * w[1:2, :] + b


def _projq3(x, w, b):
    # x: (B, 3), w: (3, D), b: (1, D) -> (B, D)
    return (x[:, 0:1] * w[0:1, :] + x[:, 1:2] * w[1:2, :]
            + x[:, 2:3] * w[2:3, :] + b)


def _attention_lin(si, e0, e1, e2, mask,
                   w_pq, b_pq, wq, bq, wkT, bk, wv, bv, wo, bo):
    """Single-head scaled-dot-product attention (query length 1) using the
    linearity of the K/V projections.

    si: (TB, 2) self info; e0/e1/e2: (TB, N) entity feature columns; mask: (TB, N).
    Returns (context (TB,64), projected query feats (TB,64))."""
    q  = _proj2(si, w_pq, b_pq)                                   # (TB, 3)
    qp = _projq3(q, wq, bq)                                       # (TB, 64)

    # score_n = qp . (Wk^T ents_n + bk) = (qp Wk^T) . ents_n + qp . bk
    qk = jnp.dot(qp, wkT, preferred_element_type=jnp.float32)     # (TB, 3)
    qb = jnp.sum(qp * bk, axis=-1, keepdims=True)                 # (TB, 1)
    scores = (qk[:, 0:1] * e0 + qk[:, 1:2] * e1 + qk[:, 2:3] * e2 + qb) * _ATT_SCALE
    scores = jnp.where(mask > 0, scores, -1e9)                    # (TB, N)

    m   = jnp.max(scores, axis=-1, keepdims=True)
    e   = jnp.exp(scores - m)
    se  = jnp.sum(e, axis=-1, keepdims=True)
    inv = pl.reciprocal(se, approx=True)

    # context = sum_n attn_n * (Wv^T ents_n + bv)
    #         = inv * ( Wv^T (sum_n e_n ents_n) + se * bv )
    w0 = jnp.sum(e * e0, axis=-1, keepdims=True)
    w1 = jnp.sum(e * e1, axis=-1, keepdims=True)
    w2 = jnp.sum(e * e2, axis=-1, keepdims=True)
    ctx = (w0 * wv[0:1, :] + w1 * wv[1:2, :] + w2 * wv[2:3, :] + se * bv) * inv  # (TB, 64)

    out = jnp.dot(ctx, wo, preferred_element_type=jnp.float32) + bo              # (TB, 64)
    return out, qp


def _inter_critic_kernel(
        nn_cnt, nr_cnt, offs,
        # data (one batch tile)
        slab_ref, grid_ref,
        # self_encoder
        w_se1, b_se1, w_se2, b_se2,
        # fov encoder (synthesized, bf16 weight)
        w_fov, b_fov,
        # project_ii_q / project_ir_q
        w_piq, b_piq, w_prq, b_prq,
        # neighbor attention (wk passed pre-transposed (64,3))
        nwq, nbq, nwkT, nbk, nwv, nbv, nwo, nbo,
        # robot attention
        rwq, rbq, rwkT, rbk, rwv, rbv, rwo, rbo,
        # core mlp
        w_m1, b_m1, w_m2, b_m2,
        # fused heads: [act_fc | critic_fc L1] as (192, 64), logits layer, critic L2 row
        w_head, b_head, w_log, b_log, w_c2, b_c2,
        # packed output (TB, 128)
        out_ref):

    off_nf, off_nm, off_rf, off_rm = offs
    slab = slab_ref[...]                                        # (TB, SLAB_W)
    si = slab[:, 0:SELF_INFO_LEN]
    ne0 = slab[:, off_nf:off_nf + nn_cnt]
    ne1 = slab[:, off_nf + nn_cnt:off_nf + 2 * nn_cnt]
    ne2 = slab[:, off_nf + 2 * nn_cnt:off_nf + 3 * nn_cnt]
    nmask = slab[:, off_nm:off_nm + nn_cnt]
    re0 = slab[:, off_rf:off_rf + nr_cnt]
    re1 = slab[:, off_rf + nr_cnt:off_rf + 2 * nr_cnt]
    re2 = slab[:, off_rf + 2 * nr_cnt:off_rf + 3 * nr_cnt]
    rmask = slab[:, off_rm:off_rm + nr_cnt]

    # self_encoder: Linear(2,16) -> LeakyReLU -> Linear(16,8) -> LeakyReLU
    h = _leaky(_proj2(si, w_se1[...], b_se1[...]))
    self_v = _leaky(jnp.dot(h, w_se2[...],
                            preferred_element_type=jnp.float32) + b_se2[...])   # (TB, 8)

    # fov encoder on flattened NCHW grid map: read f32 tile, cast on the VPU,
    # bf16 operands on the MXU with f32 accumulation (dominant matmul).
    grid_bf = grid_ref[...].astype(jnp.bfloat16)
    grid_v = _leaky(jnp.dot(grid_bf, w_fov[...],
                            preferred_element_type=jnp.float32) + b_fov[...])   # (TB, 192)

    # neighbor (ally) and robot (inter) attention
    ally, self_a = _attention_lin(si, ne0, ne1, ne2, nmask,
                                  w_piq[...], b_piq[...], nwq[...], nbq[...], nwkT[...],
                                  nbk[...], nwv[...], nbv[...], nwo[...], nbo[...])
    enemy, self_e = _attention_lin(si, re0, re1, re2, rmask,
                                   w_prq[...], b_prq[...], rwq[...], rbq[...], rwkT[...],
                                   rbk[...], rwv[...], rbv[...], rwo[...], rbo[...])

    # core mlp on concat([self_v, grid_v, ally, self_a, enemy, self_e]).
    # The four K=64 attention slices fuse into one K=256 matmul; self_v (K=8)
    # and grid_v (K=192) stay as separate row-slice matmuls of W1.
    w1 = w_m1[...]                                               # (456, 64)
    o = SELF_ENC_OUT
    s0 = o + CNN_OUT_DIM                                         # 200
    att_slab = jnp.concatenate([ally, self_a, enemy, self_e], axis=-1)   # (TB, 256)
    h1 = jnp.dot(self_v, w1[0:o, :], preferred_element_type=jnp.float32)
    h1 = h1 + jnp.dot(grid_v, w1[o:s0, :], preferred_element_type=jnp.float32)
    h1 = h1 + jnp.dot(att_slab, w1[s0:s0 + 4 * D_ATT, :],
                      preferred_element_type=jnp.float32)
    h1 = _leaky(h1 + b_m1[...])
    big = _leaky(jnp.dot(h1, w_m2[...],
                         preferred_element_type=jnp.float32) + b_m2[...])       # (TB, 192)

    # fused heads: one (TB,192)x(192,64) matmul = [act_fc | critic_fc L1]
    hh = jnp.dot(big, w_head[...], preferred_element_type=jnp.float32) + b_head[...]
    ah = _leaky(hh[:, 0:ACT_HID])                                # actor hidden (TB, 32)
    ch = _leaky(hh[:, ACT_HID:2 * ACT_HID])                      # critic hidden (TB, 32)

    logits = jnp.dot(ah, w_log[...],
                     preferred_element_type=jnp.float32) + b_log[...]           # (TB, 36)

    # deterministic action: mode() == first argmax index
    mx = jnp.max(logits, axis=-1, keepdims=True)
    col = jax.lax.broadcasted_iota(jnp.int32, logits.shape, 1).astype(jnp.float32)
    cand = jnp.where(logits >= mx, col, float(N_ACTIONS))
    action_f = jnp.min(cand, axis=-1, keepdims=True)                             # (TB, 1)

    # log_prob(argmax) = max_logit - logsumexp(logits)
    lse = mx + jnp.log(jnp.sum(jnp.exp(logits - mx), axis=-1, keepdims=True))
    logp = mx - lse                                                               # (TB, 1)

    # critic output layer (N=1) on the VPU: broadcast-mul + lane reduce
    values = jnp.sum(ch * w_c2[...], axis=-1, keepdims=True) + b_c2[...]          # (TB, 1)

    # single lane-dense (TB, 128) store (no masked partial stores / tiny DMAs)
    pad = jnp.zeros((logits.shape[0], OUT_LANES - PACK_WIDTH), jnp.float32)
    out_ref[...] = jnp.concatenate([logits, values, logp, action_f, pad], axis=-1)


def init_params(key):
    keys = jax.random.split(key, 32)
    ki = iter(keys)

    def linear(fan_in, fan_out):
        k = next(ki)
        w = jax.random.normal(k, (fan_in, fan_out), jnp.float32) / jnp.sqrt(float(fan_in))
        b = jnp.zeros((1, fan_out), jnp.float32)
        return [w, b]

    params = []
    params += linear(SELF_INFO_LEN, SELF_ENC_HID)              # self_encoder L1
    params += linear(SELF_ENC_HID, SELF_ENC_OUT)               # self_encoder L2
    params += linear(GRID_FLAT, CNN_OUT_DIM)                   # fov encoder (synthesized)
    params += linear(SELF_INFO_LEN, ATT_Q_DIM)                 # project_ii_q
    params += linear(SELF_INFO_LEN, ATT_Q_DIM)                 # project_ir_q
    for _ in range(2):                                         # neighbor_att, robot_att
        params += linear(ATT_Q_DIM, D_ATT)                     # w_q
        params += linear(ATT_Q_DIM, D_ATT)                     # w_k
        params += linear(ATT_Q_DIM, D_ATT)                     # w_v
        params += linear(D_ATT, D_ATT)                         # w_out
    params += linear(MLP_IN, MLP_HID)                          # core mlp L1
    params += linear(MLP_HID, BIG_DIM)                         # core mlp L2
    params += linear(BIG_DIM, ACT_HID)                         # act_fc
    params += linear(ACT_HID, N_ACTIONS)                       # Categorical linear
    params += linear(BIG_DIM, ACT_HID)                         # critic_fc L1
    params += linear(ACT_HID, 1)                               # critic_fc L2
    return tuple(params)


def _pad_batch(x, target_b):
    b = x.shape[0]
    if b == target_b:
        return x
    pad = [(0, target_b - b)] + [(0, 0)] * (x.ndim - 1)
    return jnp.pad(x, pad)


def inter_critic_forward(params, self_info, grid_map, neighbor_info, neighbor_mask,
                         robot_info, robot_mask, inter_critic_hidden):
    B = self_info.shape[0]
    Nn = neighbor_info.shape[1]
    Nr = robot_info.shape[1]
    f32 = jnp.float32

    # ---- lane-dense packed small-input slab (feature-major entity layout) ----
    off_nf = SELF_INFO_LEN
    off_nm = off_nf + 3 * Nn
    off_rf = off_nm + Nn
    off_rm = off_rf + 3 * Nr
    slab_used = off_rm + Nr
    slab_w = max(OUT_LANES, _round_up(slab_used, 128))

    nbr_fm = jnp.transpose(neighbor_info.astype(f32), (0, 2, 1)).reshape(B, 3 * Nn)
    rob_fm = jnp.transpose(robot_info.astype(f32), (0, 2, 1)).reshape(B, 3 * Nr)
    parts = [self_info.astype(f32), nbr_fm, neighbor_mask.astype(f32),
             rob_fm, robot_mask.astype(f32)]
    if slab_w > slab_used:
        parts.append(jnp.zeros((B, slab_w - slab_used), f32))
    slab = jnp.concatenate(parts, axis=-1)                       # (B, slab_w)

    # grid map stays f32 in HBM; bf16 cast happens inside the kernel.
    grid_flat = grid_map.reshape(B, -1).astype(f32)              # (B, 1024), NCHW flatten

    # batch tile: up to 512 rows (amortizes per-grid-step overhead; a few MiB of VMEM).
    # TODO(synk): for very large B pick TB dividing B to avoid padding grid_flat in HBM.
    TB = min(512, _round_up(B, 16))
    Bp = _round_up(B, TB)
    n_tiles = Bp // TB

    slab_p = _pad_batch(slab, Bp)
    grid_p = _pad_batch(grid_flat, Bp)

    (w_se1, b_se1, w_se2, b_se2, w_fov, b_fov, w_piq, b_piq, w_prq, b_prq,
     nwq, nbq, nwk, nbk, nwv, nbv, nwo, nbo,
     rwq, rbq, rwk, rbk, rwv, rbv, rwo, rbo,
     w_m1, b_m1, w_m2, b_m2, w_act, b_act, w_log, b_log,
     w_c1, b_c1, w_c2, b_c2) = params

    weights = (
        w_se1, b_se1, w_se2, b_se2,
        w_fov.astype(jnp.bfloat16), b_fov,                       # bf16 MXU weight
        w_piq, b_piq, w_prq, b_prq,
        nwq, nbq, jnp.transpose(nwk), nbk, nwv, nbv, nwo, nbo,   # wk pre-transposed (64,3)
        rwq, rbq, jnp.transpose(rwk), rbk, rwv, rbv, rwo, rbo,
        w_m1, b_m1, w_m2, b_m2,
        jnp.concatenate([w_act, w_c1], axis=1),                  # fused heads (192, 64)
        jnp.concatenate([b_act, b_c1], axis=1),
        w_log, b_log,
        jnp.transpose(w_c2), b_c2,                               # (1, 32) row for VPU reduce
    )

    data_specs = [
        pl.BlockSpec((TB, slab_w), lambda i: (i, 0)),
        pl.BlockSpec((TB, GRID_FLAT), lambda i: (i, 0)),
    ]
    # weights are resident across the whole grid: constant block index.
    weight_specs = [
        pl.BlockSpec(w.shape, lambda i, _z=(0,) * w.ndim: _z) for w in weights
    ]

    kernel = functools.partial(_inter_critic_kernel, Nn, Nr,
                               (off_nf, off_nm, off_rf, off_rm))

    packed = pl.pallas_call(
        kernel,
        out_shape=jax.ShapeDtypeStruct((Bp, OUT_LANES), jnp.float32),
        grid=(n_tiles,),
        in_specs=data_specs + weight_specs,
        out_specs=pl.BlockSpec((TB, OUT_LANES), lambda i: (i, 0)),
        compiler_params=pltpu.CompilerParams(
            dimension_semantics=("parallel",)),
    )(slab_p, grid_p, *weights)

    packed = packed[:B]                                          # drop padded rows
    logits  = packed[:, :N_ACTIONS]
    values  = packed[:, N_ACTIONS:N_ACTIONS + 1]
    logp    = packed[:, N_ACTIONS + 1:N_ACTIONS + 2]
    actions = packed[:, N_ACTIONS + 2:N_ACTIONS + 3].astype(jnp.int32)

    # hidden is passed through unchanged (.detach() == stop_gradient)
    return values, actions, logp, jax.lax.stop_gradient(inter_critic_hidden), logits


if __name__ == "__main__":
    B, N_NEIGHBORS, N_ROBOTS, HIDDEN = 2, 5, 4, 128

    key = jax.random.PRNGKey(0)
    k_in, k_par = jax.random.split(key)
    ks = jax.random.split(k_in, 7)

    self_info     = jax.random.normal(ks[0], (B, SELF_INFO_LEN), jnp.float32)
    grid_map      = jax.random.normal(ks[1], (B, GRID_C, GRID_H, GRID_W), jnp.float32)
    neighbor_info = jax.random.normal(ks[2], (B, N_NEIGHBORS, ATT_Q_DIM), jnp.float32)
    neighbor_mask = (jax.random.uniform(ks[3], (B, N_NEIGHBORS)) > 0.3).astype(jnp.float32)
    robot_info    = jax.random.normal(ks[4], (B, N_ROBOTS, ATT_Q_DIM), jnp.float32)
    robot_mask    = (jax.random.uniform(ks[5], (B, N_ROBOTS)) > 0.3).astype(jnp.float32)
    hidden        = jax.random.normal(ks[6], (B, HIDDEN), jnp.float32)

    params = init_params(k_par)

    outs = inter_critic_forward(params, self_info, grid_map, neighbor_info,
                                neighbor_mask, robot_info, robot_mask, hidden)
    jax.block_until_ready(outs)
    print("KERNEL_OK")
</pallas_src>

<mosaic_0001>
module attributes {stable_mosaic.version = 11 : i64} {
  func.func @_inter_critic_kernel(%arg0: i32, %arg1: memref<16x128xf32, #tpu.memory_space<vmem>>, %arg2: memref<16x1024xf32, #tpu.memory_space<vmem>>, %arg3: memref<2x16xf32, #tpu.memory_space<vmem>>, %arg4: memref<1x16xf32, #tpu.memory_space<vmem>>, %arg5: memref<16x8xf32, #tpu.memory_space<vmem>>, %arg6: memref<1x8xf32, #tpu.memory_space<vmem>>, %arg7: memref<1024x192xbf16, #tpu.memory_space<vmem>>, %arg8: memref<1x192xf32, #tpu.memory_space<vmem>>, %arg9: memref<2x3xf32, #tpu.memory_space<vmem>>, %arg10: memref<1x3xf32, #tpu.memory_space<vmem>>, %arg11: memref<2x3xf32, #tpu.memory_space<vmem>>, %arg12: memref<1x3xf32, #tpu.memory_space<vmem>>, %arg13: memref<3x64xf32, #tpu.memory_space<vmem>>, %arg14: memref<1x64xf32, #tpu.memory_space<vmem>>, %arg15: memref<64x3xf32, #tpu.memory_space<vmem>>, %arg16: memref<1x64xf32, #tpu.memory_space<vmem>>, %arg17: memref<3x64xf32, #tpu.memory_space<vmem>>, %arg18: memref<1x64xf32, #tpu.memory_space<vmem>>, %arg19: memref<64x64xf32, #tpu.memory_space<vmem>>, %arg20: memref<1x64xf32, #tpu.memory_space<vmem>>, %arg21: memref<3x64xf32, #tpu.memory_space<vmem>>, %arg22: memref<1x64xf32, #tpu.memory_space<vmem>>, %arg23: memref<64x3xf32, #tpu.memory_space<vmem>>, %arg24: memref<1x64xf32, #tpu.memory_space<vmem>>, %arg25: memref<3x64xf32, #tpu.memory_space<vmem>>, %arg26: memref<1x64xf32, #tpu.memory_space<vmem>>, %arg27: memref<64x64xf32, #tpu.memory_space<vmem>>, %arg28: memref<1x64xf32, #tpu.memory_space<vmem>>, %arg29: memref<456x64xf32, #tpu.memory_space<vmem>>, %arg30: memref<1x64xf32, #tpu.memory_space<vmem>>, %arg31: memref<64x192xf32, #tpu.memory_space<vmem>>, %arg32: memref<1x192xf32, #tpu.memory_space<vmem>>, %arg33: memref<192x64xf32, #tpu.memory_space<vmem>>, %arg34: memref<1x64xf32, #tpu.memory_space<vmem>>, %arg35: memref<32x36xf32, #tpu.memory_space<vmem>>, %arg36: memref<1x36xf32, #tpu.memory_space<vmem>>, %arg37: memref<1x32xf32, #tpu.memory_space<vmem>>, %arg38: memref<1x1xf32, #tpu.memory_space<vmem>>, %arg39: memref<16x128xf32, #tpu.memory_space<vmem>>) attributes {dimension_semantics = [#tpu.dimension_semantics<parallel>], iteration_bounds = array<i64: 1>, scalar_prefetch = 0 : i64, scratch_operands = 0 : i64, tpu.core_type = #tpu.core_type<tc>, window_params = [{transform_indices = @transform_0, window_bounds = array<i64: 16, 128>}, {transform_indices = @transform_1, window_bounds = array<i64: 16, 1024>}, {pipeline_mode = #tpu.pipeline_mode<synchronous>, transform_indices = @transform_2, window_bounds = array<i64: 2, 16>}, {pipeline_mode = #tpu.pipeline_mode<synchronous>, transform_indices = @transform_3, window_bounds = array<i64: 1, 16>}, {pipeline_mode = #tpu.pipeline_mode<synchronous>, transform_indices = @transform_4, window_bounds = array<i64: 16, 8>}, {pipeline_mode = #tpu.pipeline_mode<synchronous>, transform_indices = @transform_5, window_bounds = array<i64: 1, 8>}, {pipeline_mode = #tpu.pipeline_mode<synchronous>, transform_indices = @transform_6, window_bounds = array<i64: 1024, 192>}, {pipeline_mode = #tpu.pipeline_mode<synchronous>, transform_indices = @transform_7, window_bounds = array<i64: 1, 192>}, {pipeline_mode = #tpu.pipeline_mode<synchronous>, transform_indices = @transform_8, window_bounds = array<i64: 2, 3>}, {pipeline_mode = #tpu.pipeline_mode<synchronous>, transform_indices = @transform_9, window_bounds = array<i64: 1, 3>}, {pipeline_mode = #tpu.pipeline_mode<synchronous>, transform_indices = @transform_10, window_bounds = array<i64: 2, 3>}, {pipeline_mode = #tpu.pipeline_mode<synchronous>, transform_indices = @transform_11, window_bounds = array<i64: 1, 3>}, {pipeline_mode = #tpu.pipeline_mode<synchronous>, transform_indices = @transform_12, window_bounds = array<i64: 3, 64>}, {pipeline_mode = #tpu.pipeline_mode<synchronous>, transform_indices = @transform_13, window_bounds = array<i64: 1, 64>}, {pipeline_mode = #tpu.pipeline_mode<synchronous>, transform_indices = @transform_14, window_bounds = array<i64: 64, 3>}, {pipeline_mode = #tpu.pipeline_mode<synchronous>, transform_indices = @transform_15, window_bounds = array<i64: 1, 64>}, {pipeline_mode = #tpu.pipeline_mode<synchronous>, transform_indices = @transform_16, window_bounds = array<i64: 3, 64>}, {pipeline_mode = #tpu.pipeline_mode<synchronous>, transform_indices = @transform_17, window_bounds = array<i64: 1, 64>}, {pipeline_mode = #tpu.pipeline_mode<synchronous>, transform_indices = @transform_18, window_bounds = array<i64: 64, 64>}, {pipeline_mode = #tpu.pipeline_mode<synchronous>, transform_indices = @transform_19, window_bounds = array<i64: 1, 64>}, {pipeline_mode = #tpu.pipeline_mode<synchronous>, transform_indices = @transform_20, window_bounds = array<i64: 3, 64>}, {pipeline_mode = #tpu.pipeline_mode<synchronous>, transform_indices = @transform_21, window_bounds = array<i64: 1, 64>}, {pipeline_mode = #tpu.pipeline_mode<synchronous>, transform_indices = @transform_22, window_bounds = array<i64: 64, 3>}, {pipeline_mode = #tpu.pipeline_mode<synchronous>, transform_indices = @transform_23, window_bounds = array<i64: 1, 64>}, {pipeline_mode = #tpu.pipeline_mode<synchronous>, transform_indices = @transform_24, window_bounds = array<i64: 3, 64>}, {pipeline_mode = #tpu.pipeline_mode<synchronous>, transform_indices = @transform_25, window_bounds = array<i64: 1, 64>}, {pipeline_mode = #tpu.pipeline_mode<synchronous>, transform_indices = @transform_26, window_bounds = array<i64: 64, 64>}, {pipeline_mode = #tpu.pipeline_mode<synchronous>, transform_indices = @transform_27, window_bounds = array<i64: 1, 64>}, {pipeline_mode = #tpu.pipeline_mode<synchronous>, transform_indices = @transform_28, window_bounds = array<i64: 456, 64>}, {pipeline_mode = #tpu.pipeline_mode<synchronous>, transform_indices = @transform_29, window_bounds = array<i64: 1, 64>}, {pipeline_mode = #tpu.pipeline_mode<synchronous>, transform_indices = @transform_30, window_bounds = array<i64: 64, 192>}, {pipeline_mode = #tpu.pipeline_mode<synchronous>, transform_indices = @transform_31, window_bounds = array<i64: 1, 192>}, {pipeline_mode = #tpu.pipeline_mode<synchronous>, transform_indices = @transform_32, window_bounds = array<i64: 192, 64>}, {pipeline_mode = #tpu.pipeline_mode<synchronous>, transform_indices = @transform_33, window_bounds = array<i64: 1, 64>}, {pipeline_mode = #tpu.pipeline_mode<synchronous>, transform_indices = @transform_34, window_bounds = array<i64: 32, 36>}, {pipeline_mode = #tpu.pipeline_mode<synchronous>, transform_indices = @transform_35, window_bounds = array<i64: 1, 36>}, {pipeline_mode = #tpu.pipeline_mode<synchronous>, transform_indices = @transform_36, window_bounds = array<i64: 1, 32>}, {pipeline_mode = #tpu.pipeline_mode<synchronous>, transform_indices = @transform_37, window_bounds = array<i64: 1, 1>}, {transform_indices = @transform_38, window_bounds = array<i64: 16, 128>}]} {
    %c0 = arith.constant 0 : index
    %c0_0 = arith.constant 0 : index
    %0 = vector.load %arg1[%c0, %c0_0] : memref<16x128xf32, #tpu.memory_space<vmem>>, vector<16x128xf32>
    %1 = vector.extract_strided_slice %0 {offsets = [0, 0], sizes = [16, 2], strides = [1, 1]} : vector<16x128xf32> to vector<16x2xf32>
    %2 = vector.extract_strided_slice %0 {offsets = [0, 2], sizes = [16, 5], strides = [1, 1]} : vector<16x128xf32> to vector<16x5xf32>
    %3 = vector.extract_strided_slice %0 {offsets = [0, 7], sizes = [16, 5], strides = [1, 1]} : vector<16x128xf32> to vector<16x5xf32>
    %4 = vector.extract_strided_slice %0 {offsets = [0, 12], sizes = [16, 5], strides = [1, 1]} : vector<16x128xf32> to vector<16x5xf32>
    %5 = vector.extract_strided_slice %0 {offsets = [0, 17], sizes = [16, 5], strides = [1, 1]} : vector<16x128xf32> to vector<16x5xf32>
    %6 = vector.extract_strided_slice %0 {offsets = [0, 22], sizes = [16, 4], strides = [1, 1]} : vector<16x128xf32> to vector<16x4xf32>
    %7 = vector.extract_strided_slice %0 {offsets = [0, 26], sizes = [16, 4], strides = [1, 1]} : vector<16x128xf32> to vector<16x4xf32>
    %8 = vector.extract_strided_slice %0 {offsets = [0, 30], sizes = [16, 4], strides = [1, 1]} : vector<16x128xf32> to vector<16x4xf32>
    %9 = vector.extract_strided_slice %0 {offsets = [0, 34], sizes = [16, 4], strides = [1, 1]} : vector<16x128xf32> to vector<16x4xf32>
    %c0_1 = arith.constant 0 : index
    %c0_2 = arith.constant 0 : index
    %10 = vector.load %arg3[%c0_1, %c0_2] : memref<2x16xf32, #tpu.memory_space<vmem>>, vector<2x16xf32>
    %c0_3 = arith.constant 0 : index
    %c0_4 = arith.constant 0 : index
    %11 = vector.load %arg4[%c0_3, %c0_4] : memref<1x16xf32, #tpu.memory_space<vmem>>, vector<1x16xf32>
    %12 = vector.extract_strided_slice %1 {offsets = [0, 0], sizes = [16, 1], strides = [1, 1]} : vector<16x2xf32> to vector<16x1xf32>
    %13 = vector.extract_strided_slice %10 {offsets = [0, 0], sizes = [1, 16], strides = [1, 1]} : vector<2x16xf32> to vector<1x16xf32>
    %14 = vector.broadcast %12 : vector<16x1xf32> to vector<16x16xf32>
    %15 = vector.broadcast %13 : vector<1x16xf32> to vector<16x16xf32>
    %16 = arith.mulf %14, %15 : vector<16x16xf32>
    %17 = vector.extract_strided_slice %1 {offsets = [0, 1], sizes = [16, 1], strides = [1, 1]} : vector<16x2xf32> to vector<16x1xf32>
    %18 = vector.extract_strided_slice %10 {offsets = [1, 0], sizes = [1, 16], strides = [1, 1]} : vector<2x16xf32> to vector<1x16xf32>
    %19 = vector.broadcast %17 : vector<16x1xf32> to vector<16x16xf32>
    %20 = vector.broadcast %18 : vector<1x16xf32> to vector<16x16xf32>
    %21 = arith.mulf %19, %20 : vector<16x16xf32>
    %22 = arith.addf %16, %21 : vector<16x16xf32>
    %23 = vector.broadcast %11 : vector<1x16xf32> to vector<16x16xf32>
    %24 = arith.addf %22, %23 : vector<16x16xf32>
    %cst = arith.constant 0.00999999977 : f32
    %25 = vector.broadcast %cst : f32 to vector<16x16xf32>
    %26 = arith.mulf %25, %24 : vector<16x16xf32>
    %27 = arith.maximumf %24, %26 : vector<16x16xf32>
    %c0_5 = arith.constant 0 : index
    %c0_6 = arith.constant 0 : index
    %28 = vector.load %arg5[%c0_5, %c0_6] : memref<16x8xf32, #tpu.memory_space<vmem>>, vector<16x8xf32>
    %cst_7 = arith.constant dense<0.000000e+00> : vector<16x8xf32>
    %29 = tpu.matmul %27, %28, %cst_7 {dimension_numbers = #tpu.dot_dimension_numbers<[1], [0], [0], [1], [0, 0, 1, 1], [], []>} : vector<16x16xf32>, vector<16x8xf32>, vector<16x8xf32> -> vector<16x8xf32>
    %c0_8 = arith.constant 0 : index
    %c0_9 = arith.constant 0 : index
    %30 = vector.load %arg6[%c0_8, %c0_9] : memref<1x8xf32, #tpu.memory_space<vmem>>, vector<1x8xf32>
    %31 = vector.broadcast %30 : vector<1x8xf32> to vector<16x8xf32>
    %32 = arith.addf %29, %31 : vector<16x8xf32>
    %cst_10 = arith.constant 0.00999999977 : f32
    %33 = vector.broadcast %cst_10 : f32 to vector<16x8xf32>
    %34 = arith.mulf %33, %32 : vector<16x8xf32>
    %35 = arith.maximumf %32, %34 : vector<16x8xf32>
    %c0_11 = arith.constant 0 : index
    %c0_12 = arith.constant 0 : index
    %36 = vector.load %arg2[%c0_11, %c0_12] : memref<16x1024xf32, #tpu.memory_space<vmem>>, vector<16x1024xf32>
    %37 = arith.truncf %36 : vector<16x1024xf32> to vector<16x1024xbf16>
    %c0_13 = arith.constant 0 : index
    %c0_14 = arith.constant 0 : index
    %38 = vector.load %arg7[%c0_13, %c0_14] : memref<1024x192xbf16, #tpu.memory_space<vmem>>, vector<1024x192xbf16>
    %cst_15 = arith.constant dense<0.000000e+00> : vector<16x192xf32>
    %39 = tpu.matmul %37, %38, %cst_15 {dimension_numbers = #tpu.dot_dimension_numbers<[1], [0], [0], [1], [0, 0, 1, 1], [], []>} : vector<16x1024xbf16>, vector<1024x192xbf16>, vector<16x192xf32> -> vector<16x192xf32>
    %c0_16 = arith.constant 0 : index
    %c0_17 = arith.constant 0 : index
    %40 = vector.load %arg8[%c0_16, %c0_17] : memref<1x192xf32, #tpu.memory_space<vmem>>, vector<1x192xf32>
    %41 = vector.broadcast %40 : vector<1x192xf32> to vector<16x192xf32>
    %42 = arith.addf %39, %41 : vector<16x192xf32>
    %cst_18 = arith.constant 0.00999999977 : f32
    %43 = vector.broadcast %cst_18 : f32 to vector<16x192xf32>
    %44 = arith.mulf %43, %42 : vector<16x192xf32>
    %45 = arith.maximumf %42, %44 : vector<16x192xf32>
    %c0_19 = arith.constant 0 : index
    %c0_20 = arith.constant 0 : index
    %46 = vector.load %arg9[%c0_19, %c0_20] : memref<2x3xf32, #tpu.memory_space<vmem>>, vector<2x3xf32>
    %c0_21 = arith.constant 0 : index
    %c0_22 = arith.constant 0 : index
    %47 = vector.load %arg10[%c0_21, %c0_22] : memref<1x3xf32, #tpu.memory_space<vmem>>, vector<1x3xf32>
    %c0_23 = arith.constant 0 : index
    %c0_24 = arith.constant 0 : index
    %48 = vector.load %arg13[%c0_23, %c0_24] : memref<3x64xf32, #tpu.memory_space<vmem>>, vector<3x64xf32>
    %c0_25 = arith.constant 0 : index
    %c0_26 = arith.constant 0 : index
    %49 = vector.load %arg14[%c0_25, %c0_26] : memref<1x64xf32, #tpu.memory_space<vmem>>, vector<1x64xf32>
    %c0_27 = arith.constant 0 : index
    %c0_28 = arith.constant 0 : index
    %50 = vector.load %arg15[%c0_27, %c0_28] : memref<64x3xf32, #tpu.memory_space<vmem>>, vector<64x3xf32>
    %c0_29 = arith.constant 0 : index
    %c0_30 = arith.constant 0 : index
    %51 = vector.load %arg16[%c0_29, %c0_30] : memref<1x64xf32, #tpu.memory_space<vmem>>, vector<1x64xf32>
    %c0_31 = arith.constant 0 : index
    %c0_32 = arith.constant 0 : index
    %52 = vector.load %arg17[%c0_31, %c0_32] : memref<3x64xf32, #tpu.memory_space<vmem>>, vector<3x64xf32>
    %c0_33 = arith.constant 0 : index
    %c0_34 = arith.constant 0 : index
    %53 = vector.load %arg18[%c0_33, %c0_34] : memref<1x64xf32, #tpu.memory_space<vmem>>, vector<1x64xf32>
    %c0_35 = arith.constant 0 : index
    %c0_36 = arith.constant 0 : index
    %54 = vector.load %arg19[%c0_35, %c0_36] : memref<64x64xf32, #tpu.memory_space<vmem>>, vector<64x64xf32>
    %c0_37 = arith.constant 0 : index
    %c0_38 = arith.constant 0 : index
    %55 = vector.load %arg20[%c0_37, %c0_38] : memref<1x64xf32, #tpu.memory_space<vmem>>, vector<1x64xf32>
    %56 = vector.extract_strided_slice %1 {offsets = [0, 0], sizes = [16, 1], strides = [1, 1]} : vector<16x2xf32> to vector<16x1xf32>
    %57 = vector.extract_strided_slice %46 {offsets = [0, 0], sizes = [1, 3], strides = [1, 1]} : vector<2x3xf32> to vector<1x3xf32>
    %58 = vector.broadcast %56 : vector<16x1xf32> to vector<16x3xf32>
    %59 = vector.broadcast %57 : vector<1x3xf32> to vector<16x3xf32>
    %60 = arith.mulf %58, %59 : vector<16x3xf32>
    %61 = vector.extract_strided_slice %1 {offsets = [0, 1], sizes = [16, 1], strides = [1, 1]} : vector<16x2xf32> to vector<16x1xf32>
    %62 = vector.extract_strided_slice %46 {offsets = [1, 0], sizes = [1, 3], strides = [1, 1]} : vector<2x3xf32> to vector<1x3xf32>
    %63 = vector.broadcast %61 : vector<16x1xf32> to vector<16x3xf32>
    %64 = vector.broadcast %62 : vector<1x3xf32> to vector<16x3xf32>
    %65 = arith.mulf %63, %64 : vector<16x3xf32>
    %66 = arith.addf %60, %65 : vector<16x3xf32>
    %67 = vector.broadcast %47 : vector<1x3xf32> to vector<16x3xf32>
    %68 = arith.addf %66, %67 : vector<16x3xf32>
    %69 = vector.extract_strided_slice %68 {offsets = [0, 0], sizes = [16, 1], strides = [1, 1]} : vector<16x3xf32> to vector<16x1xf32>
    %70 = vector.extract_strided_slice %48 {offsets = [0, 0], sizes = [1, 64], strides = [1, 1]} : vector<3x64xf32> to vector<1x64xf32>
    %71 = vector.broadcast %69 : vector<16x1xf32> to vector<16x64xf32>
    %72 = vector.broadcast %70 : vector<1x64xf32> to vector<16x64xf32>
    %73 = arith.mulf %71, %72 : vector<16x64xf32>
    %74 = vector.extract_strided_slice %68 {offsets = [0, 1], sizes = [16, 1], strides = [1, 1]} : vector<16x3xf32> to vector<16x1xf32>
    %75 = vector.extract_strided_slice %48 {offsets = [1, 0], sizes = [1, 64], strides = [1, 1]} : vector<3x64xf32> to vector<1x64xf32>
    %76 = vector.broadcast %74 : vector<16x1xf32> to vector<16x64xf32>
    %77 = vector.broadcast %75 : vector<1x64xf32> to vector<16x64xf32>
    %78 = arith.mulf %76, %77 : vector<16x64xf32>
    %79 = arith.addf %73, %78 : vector<16x64xf32>
    %80 = vector.extract_strided_slice %68 {offsets = [0, 2], sizes = [16, 1], strides = [1, 1]} : vector<16x3xf32> to vector<16x1xf32>
    %81 = vector.extract_strided_slice %48 {offsets = [2, 0], sizes = [1, 64], strides = [1, 1]} : vector<3x64xf32> to vector<1x64xf32>
    %82 = vector.broadcast %80 : vector<16x1xf32> to vector<16x64xf32>
    %83 = vector.broadcast %81 : vector<1x64xf32> to vector<16x64xf32>
    %84 = arith.mulf %82, %83 : vector<16x64xf32>
    %85 = arith.addf %79, %84 : vector<16x64xf32>
    %86 = vector.broadcast %49 : vector<1x64xf32> to vector<16x64xf32>
    %87 = arith.addf %85, %86 : vector<16x64xf32>
    %cst_39 = arith.constant dense<0.000000e+00> : vector<16x3xf32>
    %88 = tpu.matmul %87, %50, %cst_39 {dimension_numbers = #tpu.dot_dimension_numbers<[1], [0], [0], [1], [0, 0, 1, 1], [], []>} : vector<16x64xf32>, vector<64x3xf32>, vector<16x3xf32> -> vector<16x3xf32>
    %89 = vector.broadcast %51 : vector<1x64xf32> to vector<16x64xf32>
    %90 = arith.mulf %87, %89 : vector<16x64xf32>
    %cst_40 = arith.constant dense<0.000000e+00> : vector<16xf32>
    %91 = vector.multi_reduction <add>, %90, %cst_40 [1] : vector<16x64xf32> to vector<16xf32>
    %92 = vector.shape_cast %91 : vector<16xf32> to vector<16x1xf32>
    %93 = vector.extract_strided_slice %88 {offsets = [0, 0], sizes = [16, 1], strides = [1, 1]} : vector<16x3xf32> to vector<16x1xf32>
    %94 = vector.broadcast %93 : vector<16x1xf32> to vector<16x5xf32>
    %95 = arith.mulf %94, %2 : vector<16x5xf32>
    %96 = vector.extract_strided_slice %88 {offsets = [0, 1], sizes = [16, 1], strides = [1, 1]} : vector<16x3xf32> to vector<16x1xf32>
    %97 = vector.broadcast %96 : vector<16x1xf32> to vector<16x5xf32>
    %98 = arith.mulf %97, %3 : vector<16x5xf32>
    %99 = arith.addf %95, %98 : vector<16x5xf32>
    %100 = vector.extract_strided_slice %88 {offsets = [0, 2], sizes = [16, 1], strides = [1, 1]} : vector<16x3xf32> to vector<16x1xf32>
    %101 = vector.broadcast %100 : vector<16x1xf32> to vector<16x5xf32>
    %102 = arith.mulf %101, %4 : vector<16x5xf32>
    %103 = arith.addf %99, %102 : vector<16x5xf32>
    %104 = vector.broadcast %92 : vector<16x1xf32> to vector<16x5xf32>
    %105 = arith.addf %103, %104 : vector<16x5xf32>
    %cst_41 = arith.constant 1.250000e-01 : f32
    %106 = vector.broadcast %cst_41 : f32 to vector<16x5xf32>
    %107 = arith.mulf %105, %106 : vector<16x5xf32>
    %cst_42 = arith.constant 0.000000e+00 : f32
    %108 = vector.broadcast %cst_42 : f32 to vector<16x5xf32>
    %109 = arith.cmpf ogt, %5, %108 : vector<16x5xf32>
    %cst_43 = arith.constant -1.000000e+09 : f32
    %110 = vector.broadcast %cst_43 : f32 to vector<16x5xf32>
    %111 = arith.select %109, %107, %110 : vector<16x5xi1>, vector<16x5xf32>
    %cst_44 = arith.constant dense<0xFF800000> : vector<16xf32>
    %112 = vector.multi_reduction <maximumf>, %111, %cst_44 [1] : vector<16x5xf32> to vector<16xf32>
    %113 = vector.shape_cast %112 : vector<16xf32> to vector<16x1xf32>
    %114 = vector.broadcast %113 : vector<16x1xf32> to vector<16x5xf32>
    %115 = arith.subf %111, %114 : vector<16x5xf32>
    %116 = math.exp %115 : vector<16x5xf32>
    %cst_45 = arith.constant dense<0.000000e+00> : vector<16xf32>
    %117 = vector.multi_reduction <add>, %116, %cst_45 [1] : vector<16x5xf32> to vector<16xf32>
    %118 = vector.shape_cast %117 : vector<16xf32> to vector<16x1xf32>
    %119 = tpu.reciprocal %118 {approx = true} : vector<16x1xf32> -> vector<16x1xf32>
    %120 = arith.mulf %116, %2 : vector<16x5xf32>
    %cst_46 = arith.constant dense<0.000000e+00> : vector<16xf32>
    %121 = vector.multi_reduction <add>, %120, %cst_46 [1] : vector<16x5xf32> to vector<16xf32>
    %122 = vector.shape_cast %121 : vector<16xf32> to vector<16x1xf32>
    %123 = arith.mulf %116, %3 : vector<16x5xf32>
    %cst_47 = arith.constant dense<0.000000e+00> : vector<16xf32>
    %124 = vector.multi_reduction <add>, %123, %cst_47 [1] : vector<16x5xf32> to vector<16xf32>
    %125 = vector.shape_cast %124 : vector<16xf32> to vector<16x1xf32>
    %126 = arith.mulf %116, %4 : vector<16x5xf32>
    %cst_48 = arith.constant dense<0.000000e+00> : vector<16xf32>
    %127 = vector.multi_reduction <add>, %126, %cst_48 [1] : vector<16x5xf32> to vector<16xf32>
    %128 = vector.shape_cast %127 : vector<16xf32> to vector<16x1xf32>
    %129 = vector.extract_strided_slice %52 {offsets = [0, 0], sizes = [1, 64], strides = [1, 1]} : vector<3x64xf32> to vector<1x64xf32>
    %130 = vector.broadcast %122 : vector<16x1xf32> to vector<16x64xf32>
    %131 = vector.broadcast %129 : vector<1x64xf32> to vector<16x64xf32>
    %132 = arith.mulf %130, %131 : vector<16x64xf32>
    %133 = vector.extract_strided_slice %52 {offsets = [1, 0], sizes = [1, 64], strides = [1, 1]} : vector<3x64xf32> to vector<1x64xf32>
    %134 = vector.broadcast %125 : vector<16x1xf32> to vector<16x64xf32>
    %135 = vector.broadcast %133 : vector<1x64xf32> to vector<16x64xf32>
    %136 = arith.mulf %134, %135 : vector<16x64xf32>
    %137 = arith.addf %132, %136 : vector<16x64xf32>
    %138 = vector.extract_strided_slice %52 {offsets = [2, 0], sizes = [1, 64], strides = [1, 1]} : vector<3x64xf32> to vector<1x64xf32>
    %139 = vector.broadcast %128 : vector<16x1xf32> to vector<16x64xf32>
    %140 = vector.broadcast %138 : vector<1x64xf32> to vector<16x64xf32>
    %141 = arith.mulf %139, %140 : vector<16x64xf32>
    %142 = arith.addf %137, %141 : vector<16x64xf32>
    %143 = vector.broadcast %118 : vector<16x1xf32> to vector<16x64xf32>
    %144 = vector.broadcast %53 : vector<1x64xf32> to vector<16x64xf32>
    %145 = arith.mulf %143, %144 : vector<16x64xf32>
    %146 = arith.addf %142, %145 : vector<16x64xf32>
    %147 = vector.broadcast %119 : vector<16x1xf32> to vector<16x64xf32>
    %148 = arith.mulf %146, %147 : vector<16x64xf32>
    %cst_49 = arith.constant dense<0.000000e+00> : vector<16x64xf32>
    %149 = tpu.matmul %148, %54, %cst_49 {dimension_numbers = #tpu.dot_dimension_numbers<[1], [0], [0], [1], [0, 0, 1, 1], [], []>} : vector<16x64xf32>, vector<64x64xf32>, vector<16x64xf32> -> vector<16x64xf32>
    %150 = vector.broadcast %55 : vector<1x64xf32> to vector<16x64xf32>
    %151 = arith.addf %149, %150 : vector<16x64xf32>
    %c0_50 = arith.constant 0 : index
    %c0_51 = arith.constant 0 : index
    %152 = vector.load %arg11[%c0_50, %c0_51] : memref<2x3xf32, #tpu.memory_space<vmem>>, vector<2x3xf32>
    %c0_52 = arith.constant 0 : index
    %c0_53 = arith.constant 0 : index
    %153 = vector.load %arg12[%c0_52, %c0_53] : memref<1x3xf32, #tpu.memory_space<vmem>>, vector<1x3xf32>
    %c0_54 = arith.constant 0 : index
    %c0_55 = arith.constant 0 : index
    %154 = vector.load %arg21[%c0_54, %c0_55] : memref<3x64xf32, #tpu.memory_space<vmem>>, vector<3x64xf32>
    %c0_56 = arith.constant 0 : index
    %c0_57 = arith.constant 0 : index
    %155 = vector.load %arg22[%c0_56, %c0_57] : memref<1x64xf32, #tpu.memory_space<vmem>>, vector<1x64xf32>
    %c0_58 = arith.constant 0 : index
    %c0_59 = arith.constant 0 : index
    %156 = vector.load %arg23[%c0_58, %c0_59] : memref<64x3xf32, #tpu.memory_space<vmem>>, vector<64x3xf32>
    %c0_60 = arith.constant 0 : index
    %c0_61 = arith.constant 0 : index
    %157 = vector.load %arg24[%c0_60, %c0_61] : memref<1x64xf32, #tpu.memory_space<vmem>>, vector<1x64xf32>
    %c0_62 = arith.constant 0 : index
    %c0_63 = arith.constant 0 : index
    %158 = vector.load %arg25[%c0_62, %c0_63] : memref<3x64xf32, #tpu.memory_space<vmem>>, vector<3x64xf32>
    %c0_64 = arith.constant 0 : index
    %c0_65 = arith.constant 0 : index
    %159 = vector.load %arg26[%c0_64, %c0_65] : memref<1x64xf32, #tpu.memory_space<vmem>>, vector<1x64xf32>
    %c0_66 = arith.constant 0 : index
    %c0_67 = arith.constant 0 : index
    %160 = vector.load %arg27[%c0_66, %c0_67] : memref<64x64xf32, #tpu.memory_space<vmem>>, vector<64x64xf32>
    %c0_68 = arith.constant 0 : index
    %c0_69 = arith.constant 0 : index
    %161 = vector.load %arg28[%c0_68, %c0_69] : memref<1x64xf32, #tpu.memory_space<vmem>>, vector<1x64xf32>
    %162 = vector.extract_strided_slice %1 {offsets = [0, 0], sizes = [16, 1], strides = [1, 1]} : vector<16x2xf32> to vector<16x1xf32>
    %163 = vector.extract_strided_slice %152 {offsets = [0, 0], sizes = [1, 3], strides = [1, 1]} : vector<2x3xf32> to vector<1x3xf32>
    %164 = vector.broadcast %162 : vector<16x1xf32> to vector<16x3xf32>
    %165 = vector.broadcast %163 : vector<1x3xf32> to vector<16x3xf32>
    %166 = arith.mulf %164, %165 : vector<16x3xf32>
    %167 = vector.extract_strided_slice %1 {offsets = [0, 1], sizes = [16, 1], strides = [1, 1]} : vector<16x2xf32> to vector<16x1xf32>
    %168 = vector.extract_strided_slice %152 {offsets = [1, 0], sizes = [1, 3], strides = [1, 1]} : vector<2x3xf32> to vector<1x3xf32>
    %169 = vector.broadcast %167 : vector<16x1xf32> to vector<16x3xf32>
    %170 = vector.broadcast %168 : vector<1x3xf32> to vector<16x3xf32>
    %171 = arith.mulf %169, %170 : vector<16x3xf32>
    %172 = arith.addf %166, %171 : vector<16x3xf32>
    %173 = vector.broadcast %153 : vector<1x3xf32> to vector<16x3xf32>
    %174 = arith.addf %172, %173 : vector<16x3xf32>
    %175 = vector.extract_strided_slice %174 {offsets = [0, 0], sizes = [16, 1], strides = [1, 1]} : vector<16x3xf32> to vector<16x1xf32>
    %176 = vector.extract_strided_slice %154 {offsets = [0, 0], sizes = [1, 64], strides = [1, 1]} : vector<3x64xf32> to vector<1x64xf32>
    %177 = vector.broadcast %175 : vector<16x1xf32> to vector<16x64xf32>
    %178 = vector.broadcast %176 : vector<1x64xf32> to vector<16x64xf32>
    %179 = arith.mulf %177, %178 : vector<16x64xf32>
    %180 = vector.extract_strided_slice %174 {offsets = [0, 1], sizes = [16, 1], strides = [1, 1]} : vector<16x3xf32> to vector<16x1xf32>
    %181 = vector.extract_strided_slice %154 {offsets = [1, 0], sizes = [1, 64], strides = [1, 1]} : vector<3x64xf32> to vector<1x64xf32>
    %182 = vector.broadcast %180 : vector<16x1xf32> to vector<16x64xf32>
    %183 = vector.broadcast %181 : vector<1x64xf32> to vector<16x64xf32>
    %184 = arith.mulf %182, %183 : vector<16x64xf32>
    %185 = arith.addf %179, %184 : vector<16x64xf32>
    %186 = vector.extract_strided_slice %174 {offsets = [0, 2], sizes = [16, 1], strides = [1, 1]} : vector<16x3xf32> to vector<16x1xf32>
    %187 = vector.extract_strided_slice %154 {offsets = [2, 0], sizes = [1, 64], strides = [1, 1]} : vector<3x64xf32> to vector<1x64xf32>
    %188 = vector.broadcast %186 : vector<16x1xf32> to vector<16x64xf32>
    %189 = vector.broadcast %187 : vector<1x64xf32> to vector<16x64xf32>
    %190 = arith.mulf %188, %189 : vector<16x64xf32>
    %191 = arith.addf %185, %190 : vector<16x64xf32>
    %192 = vector.broadcast %155 : vector<1x64xf32> to vector<16x64xf32>
    %193 = arith.addf %191, %192 : vector<16x64xf32>
    %cst_70 = arith.constant dense<0.000000e+00> : vector<16x3xf32>
    %194 = tpu.matmul %193, %156, %cst_70 {dimension_numbers = #tpu.dot_dimension_numbers<[1], [0], [0], [1], [0, 0, 1, 1], [], []>} : vector<16x64xf32>, vector<64x3xf32>, vector<16x3xf32> -> vector<16x3xf32>
    %195 = vector.broadcast %157 : vector<1x64xf32> to vector<16x64xf32>
    %196 = arith.mulf %193, %195 : vector<16x64xf32>
    %cst_71 = arith.constant dense<0.000000e+00> : vector<16xf32>
    %197 = vector.multi_reduction <add>, %196, %cst_71 [1] : vector<16x64xf32> to vector<16xf32>
    %198 = vector.shape_cast %197 : vector<16xf32> to vector<16x1xf32>
    %199 = vector.extract_strided_slice %194 {offsets = [0, 0], sizes = [16, 1], strides = [1, 1]} : vector<16x3xf32> to vector<16x1xf32>
    %200 = vector.broadcast %199 : vector<16x1xf32> to vector<16x4xf32>
    %201 = arith.mulf %200, %6 : vector<16x4xf32>
    %202 = vector.extract_strided_slice %194 {offsets = [0, 1], sizes = [16, 1], strides = [1, 1]} : vector<16x3xf32> to vector<16x1xf32>
    %203 = vector.broadcast %202 : vector<16x1xf32> to vector<16x4xf32>
    %204 = arith.mulf %203, %7 : vector<16x4xf32>
    %205 = arith.addf %201, %204 : vector<16x4xf32>
    %206 = vector.extract_strided_slice %194 {offsets = [0, 2], sizes = [16, 1], strides = [1, 1]} : vector<16x3xf32> to vector<16x1xf32>
    %207 = vector.broadcast %206 : vector<16x1xf32> to vector<16x4xf32>
    %208 = arith.mulf %207, %8 : vector<16x4xf32>
    %209 = arith.addf %205, %208 : vector<16x4xf32>
    %210 = vector.broadcast %198 : vector<16x1xf32> to vector<16x4xf32>
    %211 = arith.addf %209, %210 : vector<16x4xf32>
    %cst_72 = arith.constant 1.250000e-01 : f32
    %212 = vector.broadcast %cst_72 : f32 to vector<16x4xf32>
    %213 = arith.mulf %211, %212 : vector<16x4xf32>
    %cst_73 = arith.constant 0.000000e+00 : f32
    %214 = vector.broadcast %cst_73 : f32 to vector<16x4xf32>
    %215 = arith.cmpf ogt, %9, %214 : vector<16x4xf32>
    %cst_74 = arith.constant -1.000000e+09 : f32
    %216 = vector.broadcast %cst_74 : f32 to vector<16x4xf32>
    %217 = arith.select %215, %213, %216 : vector<16x4xi1>, vector<16x4xf32>
    %cst_75 = arith.constant dense<0xFF800000> : vector<16xf32>
    %218 = vector.multi_reduction <maximumf>, %217, %cst_75 [1] : vector<16x4xf32> to vector<16xf32>
    %219 = vector.shape_cast %218 : vector<16xf32> to vector<16x1xf32>
    %220 = vector.broadcast %219 : vector<16x1xf32> to vector<16x4xf32>
    %221 = arith.subf %217, %220 : vector<16x4xf32>
    %222 = math.exp %221 : vector<16x4xf32>
    %cst_76 = arith.constant dense<0.000000e+00> : vector<16xf32>
    %223 = vector.multi_reduction <add>, %222, %cst_76 [1] : vector<16x4xf32> to vector<16xf32>
    %224 = vector.shape_cast %223 : vector<16xf32> to vector<16x1xf32>
    %225 = tpu.reciprocal %224 {approx = true} : vector<16x1xf32> -> vector<16x1xf32>
    %226 = arith.mulf %222, %6 : vector<16x4xf32>
    %cst_77 = arith.constant dense<0.000000e+00> : vector<16xf32>
    %227 = vector.multi_reduction <add>, %226, %cst_77 [1] : vector<16x4xf32> to vector<16xf32>
    %228 = vector.shape_cast %227 : vector<16xf32> to vector<16x1xf32>
    %229 = arith.mulf %222, %7 : vector<16x4xf32>
    %cst_78 = arith.constant dense<0.000000e+00> : vector<16xf32>
    %230 = vector.multi_reduction <add>, %229, %cst_78 [1] : vector<16x4xf32> to vector<16xf32>
    %231 = vector.shape_cast %230 : vector<16xf32> to vector<16x1xf32>
    %232 = arith.mulf %222, %8 : vector<16x4xf32>
    %cst_79 = arith.constant dense<0.000000e+00> : vector<16xf32>
    %233 = vector.multi_reduction <add>, %232, %cst_79 [1] : vector<16x4xf32> to vector<16xf32>
    %234 = vector.shape_cast %233 : vector<16xf32> to vector<16x1xf32>
    %235 = vector.extract_strided_slice %158 {offsets = [0, 0], sizes = [1, 64], strides = [1, 1]} : vector<3x64xf32> to vector<1x64xf32>
    %236 = vector.broadcast %228 : vector<16x1xf32> to vector<16x64xf32>
    %237 = vector.broadcast %235 : vector<1x64xf32> to vector<16x64xf32>
    %238 = arith.mulf %236, %237 : vector<16x64xf32>
    %239 = vector.extract_strided_slice %158 {offsets = [1, 0], sizes = [1, 64], strides = [1, 1]} : vector<3x64xf32> to vector<1x64xf32>
    %240 = vector.broadcast %231 : vector<16x1xf32> to vector<16x64xf32>
    %241 = vector.broadcast %239 : vector<1x64xf32> to vector<16x64xf32>
    %242 = arith.mulf %240, %241 : vector<16x64xf32>
    %243 = arith.addf %238, %242 : vector<16x64xf32>
    %244 = vector.extract_strided_slice %158 {offsets = [2, 0], sizes = [1, 64], strides = [1, 1]} : vector<3x64xf32> to vector<1x64xf32>
    %245 = vector.broadcast %234 : vector<16x1xf32> to vector<16x64xf32>
    %246 = vector.broadcast %244 : vector<1x64xf32> to vector<16x64xf32>
    %247 = arith.mulf %245, %246 : vector<16x64xf32>
    %248 = arith.addf %243, %247 : vector<16x64xf32>
    %249 = vector.broadcast %224 : vector<16x1xf32> to vector<16x64xf32>
    %250 = vector.broadcast %159 : vector<1x64xf32> to vector<16x64xf32>
    %251 = arith.mulf %249, %250 : vector<16x64xf32>
    %252 = arith.addf %248, %251 : vector<16x64xf32>
    %253 = vector.broadcast %225 : vector<16x1xf32> to vector<16x64xf32>
    %254 = arith.mulf %252, %253 : vector<16x64xf32>
    %cst_80 = arith.constant dense<0.000000e+00> : vector<16x64xf32>
    %255 = tpu.matmul %254, %160, %cst_80 {dimension_numbers = #tpu.dot_dimension_numbers<[1], [0], [0], [1], [0, 0, 1, 1], [], []>} : vector<16x64xf32>, vector<64x64xf32>, vector<16x64xf32> -> vector<16x64xf32>
    %256 = vector.broadcast %161 : vector<1x64xf32> to vector<16x64xf32>
    %257 = arith.addf %255, %256 : vector<16x64xf32>
    %c0_81 = arith.constant 0 : index
    %c0_82 = arith.constant 0 : index
    %258 = vector.load %arg29[%c0_81, %c0_82] : memref<456x64xf32, #tpu.memory_space<vmem>>, vector<456x64xf32>
    %259 = tpu.concatenate %151, %87, %257, %193 in 1 : vector<16x64xf32>, vector<16x64xf32>, vector<16x64xf32>, vector<16x64xf32> -> vector<16x256xf32>
    %260 = vector.extract_strided_slice %258 {offsets = [0, 0], sizes = [8, 64], strides = [1, 1]} : vector<456x64xf32> to vector<8x64xf32>
    %cst_83 = arith.constant dense<0.000000e+00> : vector<16x64xf32>
    %261 = tpu.matmul %35, %260, %cst_83 {dimension_numbers = #tpu.dot_dimension_numbers<[1], [0], [0], [1], [0, 0, 1, 1], [], []>} : vector<16x8xf32>, vector<8x64xf32>, vector<16x64xf32> -> vector<16x64xf32>
    %262 = vector.extract_strided_slice %258 {offsets = [8, 0], sizes = [192, 64], strides = [1, 1]} : vector<456x64xf32> to vector<192x64xf32>
    %cst_84 = arith.constant dense<0.000000e+00> : vector<16x64xf32>
    %263 = tpu.matmul %45, %262, %cst_84 {dimension_numbers = #tpu.dot_dimension_numbers<[1], [0], [0], [1], [0, 0, 1, 1], [], []>} : vector<16x192xf32>, vector<192x64xf32>, vector<16x64xf32> -> vector<16x64xf32>
    %264 = arith.addf %261, %263 : vector<16x64xf32>
    %265 = vector.extract_strided_slice %258 {offsets = [200, 0], sizes = [256, 64], strides = [1, 1]} : vector<456x64xf32> to vector<256x64xf32>
    %cst_85 = arith.constant dense<0.000000e+00> : vector<16x64xf32>
    %266 = tpu.matmul %259, %265, %cst_85 {dimension_numbers = #tpu.dot_dimension_numbers<[1], [0], [0], [1], [0, 0, 1, 1], [], []>} : vector<16x256xf32>, vector<256x64xf32>, vector<16x64xf32> -> vector<16x64xf32>
    %267 = arith.addf %264, %266 : vector<16x64xf32>
    %c0_86 = arith.constant 0 : index
    %c0_87 = arith.constant 0 : index
    %268 = vector.load %arg30[%c0_86, %c0_87] : memref<1x64xf32, #tpu.memory_space<vmem>>, vector<1x64xf32>
    %269 = vector.broadcast %268 : vector<1x64xf32> to vector<16x64xf32>
    %270 = arith.addf %267, %269 : vector<16x64xf32>
    %cst_88 = arith.constant 0.00999999977 : f32
    %271 = vector.broadcast %cst_88 : f32 to vector<16x64xf32>
    %272 = arith.mulf %271, %270 : vector<16x64xf32>
    %273 = arith.maximumf %270, %272 : vector<16x64xf32>
    %c0_89 = arith.constant 0 : index
    %c0_90 = arith.constant 0 : index
    %274 = vector.load %arg31[%c0_89, %c0_90] : memref<64x192xf32, #tpu.memory_space<vmem>>, vector<64x192xf32>
    %cst_91 = arith.constant dense<0.000000e+00> : vector<16x192xf32>
    %275 = tpu.matmul %273, %274, %cst_91 {dimension_numbers = #tpu.dot_dimension_numbers<[1], [0], [0], [1], [0, 0, 1, 1], [], []>} : vector<16x64xf32>, vector<64x192xf32>, vector<16x192xf32> -> vector<16x192xf32>
    %c0_92 = arith.constant 0 : index
    %c0_93 = arith.constant 0 : index
    %276 = vector.load %arg32[%c0_92, %c0_93] : memref<1x192xf32, #tpu.memory_space<vmem>>, vector<1x192xf32>
    %277 = vector.broadcast %276 : vector<1x192xf32> to vector<16x192xf32>
    %278 = arith.addf %275, %277 : vector<16x192xf32>
    %cst_94 = arith.constant 0.00999999977 : f32
    %279 = vector.broadcast %cst_94 : f32 to vector<16x192xf32>
    %280 = arith.mulf %279, %278 : vector<16x192xf32>
    %281 = arith.maximumf %278, %280 : vector<16x192xf32>
    %c0_95 = arith.constant 0 : index
    %c0_96 = arith.constant 0 : index
    %282 = vector.load %arg33[%c0_95, %c0_96] : memref<192x64xf32, #tpu.memory_space<vmem>>, vector<192x64xf32>
    %cst_97 = arith.constant dense<0.000000e+00> : vector<16x64xf32>
    %283 = tpu.matmul %281, %282, %cst_97 {dimension_numbers = #tpu.dot_dimension_numbers<[1], [0], [0], [1], [0, 0, 1, 1], [], []>} : vector<16x192xf32>, vector<192x64xf32>, vector<16x64xf32> -> vector<16x64xf32>
    %c0_98 = arith.constant 0 : index
    %c0_99 = arith.constant 0 : index
    %284 = vector.load %arg34[%c0_98, %c0_99] : memref<1x64xf32, #tpu.memory_space<vmem>>, vector<1x64xf32>
    %285 = vector.broadcast %284 : vector<1x64xf32> to vector<16x64xf32>
    %286 = arith.addf %283, %285 : vector<16x64xf32>
    %287 = vector.extract_strided_slice %286 {offsets = [0, 0], sizes = [16, 32], strides = [1, 1]} : vector<16x64xf32> to vector<16x32xf32>
    %cst_100 = arith.constant 0.00999999977 : f32
    %288 = vector.broadcast %cst_100 : f32 to vector<16x32xf32>
    %289 = arith.mulf %288, %287 : vector<16x32xf32>
    %290 = arith.maximumf %287, %289 : vector<16x32xf32>
    %291 = vector.extract_strided_slice %286 {offsets = [0, 32], sizes = [16, 32], strides = [1, 1]} : vector<16x64xf32> to vector<16x32xf32>
    %cst_101 = arith.constant 0.00999999977 : f32
    %292 = vector.broadcast %cst_101 : f32 to vector<16x32xf32>
    %293 = arith.mulf %292, %291 : vector<16x32xf32>
    %294 = arith.maximumf %291, %293 : vector<16x32xf32>
    %c0_102 = arith.constant 0 : index
    %c0_103 = arith.constant 0 : index
    %295 = vector.load %arg35[%c0_102, %c0_103] : memref<32x36xf32, #tpu.memory_space<vmem>>, vector<32x36xf32>
    %cst_104 = arith.constant dense<0.000000e+00> : vector<16x36xf32>
    %296 = tpu.matmul %290, %295, %cst_104 {dimension_numbers = #tpu.dot_dimension_numbers<[1], [0], [0], [1], [0, 0, 1, 1], [], []>} : vector<16x32xf32>, vector<32x36xf32>, vector<16x36xf32> -> vector<16x36xf32>
    %c0_105 = arith.constant 0 : index
    %c0_106 = arith.constant 0 : index
    %297 = vector.load %arg36[%c0_105, %c0_106] : memref<1x36xf32, #tpu.memory_space<vmem>>, vector<1x36xf32>
    %298 = vector.broadcast %297 : vector<1x36xf32> to vector<16x36xf32>
    %299 = arith.addf %296, %298 : vector<16x36xf32>
    %cst_107 = arith.constant dense<0xFF800000> : vector<16xf32>
    %300 = vector.multi_reduction <maximumf>, %299, %cst_107 [1] : vector<16x36xf32> to vector<16xf32>
    %301 = vector.shape_cast %300 : vector<16xf32> to vector<16x1xf32>
    %302 = tpu.iota {dimensions = array<i32: 1>} : vector<16x36xi32>
    %303 = arith.sitofp %302 : vector<16x36xi32> to vector<16x36xf32>
    %304 = vector.broadcast %301 : vector<16x1xf32> to vector<16x36xf32>
    %305 = arith.cmpf oge, %299, %304 : vector<16x36xf32>
    %cst_108 = arith.constant 3.600000e+01 : f32
    %306 = vector.broadcast %cst_108 : f32 to vector<16x36xf32>
    %307 = arith.select %305, %303, %306 : vector<16x36xi1>, vector<16x36xf32>
    %cst_109 = arith.constant dense<0x7F800000> : vector<16xf32>
    %308 = vector.multi_reduction <minimumf>, %307, %cst_109 [1] : vector<16x36xf32> to vector<16xf32>
    %309 = vector.shape_cast %308 : vector<16xf32> to vector<16x1xf32>
    %310 = vector.broadcast %301 : vector<16x1xf32> to vector<16x36xf32>
    %311 = arith.subf %299, %310 : vector<16x36xf32>
    %312 = math.exp %311 : vector<16x36xf32>
    %cst_110 = arith.constant dense<0.000000e+00> : vector<16xf32>
    %313 = vector.multi_reduction <add>, %312, %cst_110 [1] : vector<16x36xf32> to vector<16xf32>
    %314 = vector.shape_cast %313 : vector<16xf32> to vector<16x1xf32>
    %315 = math.log %314 : vector<16x1xf32>
    %316 = arith.addf %301, %315 : vector<16x1xf32>
    %317 = arith.subf %301, %316 : vector<16x1xf32>
    %c0_111 = arith.constant 0 : index
    %c0_112 = arith.constant 0 : index
    %318 = vector.load %arg37[%c0_111, %c0_112] : memref<1x32xf32, #tpu.memory_space<vmem>>, vector<1x32xf32>
    %319 = vector.broadcast %318 : vector<1x32xf32> to vector<16x32xf32>
    %320 = arith.mulf %294, %319 : vector<16x32xf32>
    %cst_113 = arith.constant dense<0.000000e+00> : vector<16xf32>
    %321 = vector.multi_reduction <add>, %320, %cst_113 [1] : vector<16x32xf32> to vector<16xf32>
    %322 = vector.shape_cast %321 : vector<16xf32> to vector<16x1xf32>
    %c0_114 = arith.constant 0 : index
    %c0_115 = arith.constant 0 : index
    %323 = vector.load %arg38[%c0_114, %c0_115] : memref<1x1xf32, #tpu.memory_space<vmem>>, vector<1x1xf32>
    %324 = vector.broadcast %323 : vector<1x1xf32> to vector<16x1xf32>
    %325 = arith.addf %322, %324 : vector<16x1xf32>
    %cst_116 = arith.constant 0.000000e+00 : f32
    %326 = vector.broadcast %cst_116 : f32 to vector<16x89xf32>
    %327 = tpu.concatenate %299, %325, %317, %309, %326 in 1 : vector<16x36xf32>, vector<16x1xf32>, vector<16x1xf32>, vector<16x1xf32>, vector<16x89xf32> -> vector<16x128xf32>
    %c0_117 = arith.constant 0 : index
    %c0_118 = arith.constant 0 : index
    %328 = vector.load %arg39[%c0_117, %c0_118] : memref<16x128xf32, #tpu.memory_space<vmem>>, vector<16x128xf32>
    tpu.vector_store %arg39[%c0_117, %c0_118], %327 {strides = array<i32>} : memref<16x128xf32, #tpu.memory_space<vmem>>, vector<16x128xf32>,
    return
  }
  func.func @transform_0(%arg0: i32) -> (i32, i32) {
    %c0_i32 = arith.constant 0 : i32
    %c0_i32_0 = arith.constant 0 : i32
    return %arg0, %c0_i32 : i32, i32
  }
  func.func @transform_1(%arg0: i32) -> (i32, i32) {
    %c0_i32 = arith.constant 0 : i32
    %c0_i32_0 = arith.constant 0 : i32
    return %arg0, %c0_i32 : i32, i32
  }
  func.func @transform_2(%arg0: i32) -> (i32, i32) {
    %c0_i32 = arith.constant 0 : i32
    %c0_i32_0 = arith.constant 0 : i32
    %c0_i32_1 = arith.constant 0 : i32
    return %c0_i32, %c0_i32_0 : i32, i32
  }
  func.func @transform_3(%arg0: i32) -> (i32, i32) {
    %c0_i32 = arith.constant 0 : i32
    %c0_i32_0 = arith.constant 0 : i32
    %c0_i32_1 = arith.constant 0 : i32
    return %c0_i32, %c0_i32_0 : i32, i32
  }
  func.func @transform_4(%arg0: i32) -> (i32, i32) {
    %c0_i32 = arith.constant 0 : i32
    %c0_i32_0 = arith.constant 0 : i32
    %c0_i32_1 = arith.constant 0 : i32
    return %c0_i32, %c0_i32_0 : i32, i32
  }
  func.func @transform_5(%arg0: i32) -> (i32, i32) {
    %c0_i32 = arith.constant 0 : i32
    %c0_i32_0 = arith.constant 0 : i32
    %c0_i32_1 = arith.constant 0 : i32
    return %c0_i32, %c0_i32_0 : i32, i32
  }
  func.func @transform_6(%arg0: i32) -> (i32, i32) {
    %c0_i32 = arith.constant 0 : i32
    %c0_i32_0 = arith.constant 0 : i32
    %c0_i32_1 = arith.constant 0 : i32
    return %c0_i32, %c0_i32_0 : i32, i32
  }
  func.func @transform_7(%arg0: i32) -> (i32, i32) {
    %c0_i32 = arith.constant 0 : i32
    %c0_i32_0 = arith.constant 0 : i32
    %c0_i32_1 = arith.constant 0 : i32
    return %c0_i32, %c0_i32_0 : i32, i32
  }
  func.func @transform_8(%arg0: i32) -> (i32, i32) {
    %c0_i32 = arith.constant 0 : i32
    %c0_i32_0 = arith.constant 0 : i32
    %c0_i32_1 = arith.constant 0 : i32
    return %c0_i32, %c0_i32_0 : i32, i32
  }
  func.func @transform_9(%arg0: i32) -> (i32, i32) {
    %c0_i32 = arith.constant 0 : i32
    %c0_i32_0 = arith.constant 0 : i32
    %c0_i32_1 = arith.constant 0 : i32
    return %c0_i32, %c0_i32_0 : i32, i32
  }
  func.func @transform_10(%arg0: i32) -> (i32, i32) {
    %c0_i32 = arith.constant 0 : i32
    %c0_i32_0 = arith.constant 0 : i32
    %c0_i32_1 = arith.constant 0 : i32
    return %c0_i32, %c0_i32_0 : i32, i32
  }
  func.func @transform_11(%arg0: i32) -> (i32, i32) {
    %c0_i32 = arith.constant 0 : i32
    %c0_i32_0 = arith.constant 0 : i32
    %c0_i32_1 = arith.constant 0 : i32
    return %c0_i32, %c0_i32_0 : i32, i32
  }
  func.func @transform_12(%arg0: i32) -> (i32, i32) {
    %c0_i32 = arith.constant 0 : i32
    %c0_i32_0 = arith.constant 0 : i32
    %c0_i32_1 = arith.constant 0 : i32
    return %c0_i32, %c0_i32_0 : i32, i32
  }
  func.func @transform_13(%arg0: i32) -> (i32, i32) {
    %c0_i32 = arith.constant 0 : i32
    %c0_i32_0 = arith.constant 0 : i32
    %c0_i32_1 = arith.constant 0 : i32
    return %c0_i32, %c0_i32_0 : i32, i32
  }
  func.func @transform_14(%arg0: i32) -> (i32, i32) {
    %c0_i32 = arith.constant 0 : i32
    %c0_i32_0 = arith.constant 0 : i32
    %c0_i32_1 = arith.constant 0 : i32
    return %c0_i32, %c0_i32_0 : i32, i32
  }
  func.func @transform_15(%arg0: i32) -> (i32, i32) {
    %c0_i32 = arith.constant 0 : i32
    %c0_i32_0 = arith.constant 0 : i32
    %c0_i32_1 = arith.constant 0 : i32
    return %c0_i32, %c0_i32_0 : i32, i32
  }
  func.func @transform_16(%arg0: i32) -> (i32, i32) {
    %c0_i32 = arith.constant 0 : i32
    %c0_i32_0 = arith.constant 0 : i32
    %c0_i32_1 = arith.constant 0 : i32
    return %c0_i32, %c0_i32_0 : i32, i32
  }
  func.func @transform_17(%arg0: i32) -> (i32, i32) {
    %c0_i32 = arith.constant 0 : i32
    %c0_i32_0 = arith.constant 0 : i32
    %c0_i32_1 = arith.constant 0 : i32
    return %c0_i32, %c0_i32_0 : i32, i32
  }
  func.func @transform_18(%arg0: i32) -> (i32, i32) {
    %c0_i32 = arith.constant 0 : i32
    %c0_i32_0 = arith.constant 0 : i32
    %c0_i32_1 = arith.constant 0 : i32
    return %c0_i32, %c0_i32_0 : i32, i32
  }
  func.func @transform_19(%arg0: i32) -> (i32, i32) {
    %c0_i32 = arith.constant 0 : i32
    %c0_i32_0 = arith.constant 0 : i32
    %c0_i32_1 = arith.constant 0 : i32
    return %c0_i32, %c0_i32_0 : i32, i32
  }
  func.func @transform_20(%arg0: i32) -> (i32, i32) {
    %c0_i32 = arith.constant 0 : i32
    %c0_i32_0 = arith.constant 0 : i32
    %c0_i32_1 = arith.constant 0 : i32
    return %c0_i32, %c0_i32_0 : i32, i32
  }
  func.func @transform_21(%arg0: i32) -> (i32, i32) {
    %c0_i32 = arith.constant 0 : i32
    %c0_i32_0 = arith.constant 0 : i32
    %c0_i32_1 = arith.constant 0 : i32
    return %c0_i32, %c0_i32_0 : i32, i32
  }
  func.func @transform_22(%arg0: i32) -> (i32, i32) {
    %c0_i32 = arith.constant 0 : i32
    %c0_i32_0 = arith.constant 0 : i32
    %c0_i32_1 = arith.constant 0 : i32
    return %c0_i32, %c0_i32_0 : i32, i32
  }
  func.func @transform_23(%arg0: i32) -> (i32, i32) {
    %c0_i32 = arith.constant 0 : i32
    %c0_i32_0 = arith.constant 0 : i32
    %c0_i32_1 = arith.constant 0 : i32
    return %c0_i32, %c0_i32_0 : i32, i32
  }
  func.func @transform_24(%arg0: i32) -> (i32, i32) {
    %c0_i32 = arith.constant 0 : i32
    %c0_i32_0 = arith.constant 0 : i32
    %c0_i32_1 = arith.constant 0 : i32
    return %c0_i32, %c0_i32_0 : i32, i32
  }
  func.func @transform_25(%arg0: i32) -> (i32, i32) {
    %c0_i32 = arith.constant 0 : i32
    %c0_i32_0 = arith.constant 0 : i32
    %c0_i32_1 = arith.constant 0 : i32
    return %c0_i32, %c0_i32_0 : i32, i32
  }
  func.func @transform_26(%arg0: i32) -> (i32, i32) {
    %c0_i32 = arith.constant 0 : i32
    %c0_i32_0 = arith.constant 0 : i32
    %c0_i32_1 = arith.constant 0 : i32
    return %c0_i32, %c0_i32_0 : i32, i32
  }
  func.func @transform_27(%arg0: i32) -> (i32, i32) {
    %c0_i32 = arith.constant 0 : i32
    %c0_i32_0 = arith.constant 0 : i32
    %c0_i32_1 = arith.constant 0 : i32
    return %c0_i32, %c0_i32_0 : i32, i32
  }
  func.func @transform_28(%arg0: i32) -> (i32, i32) {
    %c0_i32 = arith.constant 0 : i32
    %c0_i32_0 = arith.constant 0 : i32
    %c0_i32_1 = arith.constant 0 : i32
    return %c0_i32, %c0_i32_0 : i32, i32
  }
  func.func @transform_29(%arg0: i32) -> (i32, i32) {
    %c0_i32 = arith.constant 0 : i32
    %c0_i32_0 = arith.constant 0 : i32
    %c0_i32_1 = arith.constant 0 : i32
    return %c0_i32, %c0_i32_0 : i32, i32
  }
  func.func @transform_30(%arg0: i32) -> (i32, i32) {
    %c0_i32 = arith.constant 0 : i32
    %c0_i32_0 = arith.constant 0 : i32
    %c0_i32_1 = arith.constant 0 : i32
    return %c0_i32, %c0_i32_0 : i32, i32
  }
  func.func @transform_31(%arg0: i32) -> (i32, i32) {
    %c0_i32 = arith.constant 0 : i32
    %c0_i32_0 = arith.constant 0 : i32
    %c0_i32_1 = arith.constant 0 : i32
    return %c0_i32, %c0_i32_0 : i32, i32
  }
  func.func @transform_32(%arg0: i32) -> (i32, i32) {
    %c0_i32 = arith.constant 0 : i32
    %c0_i32_0 = arith.constant 0 : i32
    %c0_i32_1 = arith.constant 0 : i32
    return %c0_i32, %c0_i32_0 : i32, i32
  }
  func.func @transform_33(%arg0: i32) -> (i32, i32) {
    %c0_i32 = arith.constant 0 : i32
    %c0_i32_0 = arith.constant 0 : i32
    %c0_i32_1 = arith.constant 0 : i32
    return %c0_i32, %c0_i32_0 : i32, i32
  }
  func.func @transform_34(%arg0: i32) -> (i32, i32) {
    %c0_i32 = arith.constant 0 : i32
    %c0_i32_0 = arith.constant 0 : i32
    %c0_i32_1 = arith.constant 0 : i32
    return %c0_i32, %c0_i32_0 : i32, i32
  }
  func.func @transform_35(%arg0: i32) -> (i32, i32) {
    %c0_i32 = arith.constant 0 : i32
    %c0_i32_0 = arith.constant 0 : i32
    %c0_i32_1 = arith.constant 0 : i32
    return %c0_i32, %c0_i32_0 : i32, i32
  }
  func.func @transform_36(%arg0: i32) -> (i32, i32) {
    %c0_i32 = arith.constant 0 : i32
    %c0_i32_0 = arith.constant 0 : i32
    %c0_i32_1 = arith.constant 0 : i32
    return %c0_i32, %c0_i32_0 : i32, i32
  }
  func.func @transform_37(%arg0: i32) -> (i32, i32) {
    %c0_i32 = arith.constant 0 : i32
    %c0_i32_0 = arith.constant 0 : i32
    %c0_i32_1 = arith.constant 0 : i32
    return %c0_i32, %c0_i32_0 : i32, i32
  }
  func.func @transform_38(%arg0: i32) -> (i32, i32) {
    %c0_i32 = arith.constant 0 : i32
    %c0_i32_0 = arith.constant 0 : i32
    return %arg0, %c0_i32 : i32, i32
  }
}

</mosaic_0001>

<bundles_post_ra>
// kernel: tpu_custom_call.1
= control target key start
LH: loop header
LB: loop body
LE: loop exit
PB: predicated region body
PF: predicated region fallthrough
CT: control target
= control target key end

     0   :  { %s3742_s6 = smov 1   ;;  %s3743_s10 = smov 2   ;;  %s4578_s0 = inlined_call_operand.smem [shape: u32[39], index: -1, kind: input, shape index: {}] }
   0x1   :  { %s3810_s5 = sld [smem:[%s4578_s0]]   ;;  %s3744_s14 = smov 3  }
   0x2   :  { %s3815_s9 = sld [smem:[%s4578_s0 + %s3742_s6]]   ;;  %s3745_s18 = smov 4  }
   0x3   :  { %s3820_s13 = sld [smem:[%s4578_s0 + %s3743_s10]]   ;;  %s3746_s22 = smov 5  }
   0x4   :  { %s3825_s17 = sld [smem:[%s4578_s0 + %s3744_s14]]   ;;  %s3747_s26 = smov 6  }
   0x5   :  { %s3830_s21 = sld [smem:[%s4578_s0 + %s3745_s18]]   ;;  %s3748_s30 = smov 7  }
   0x6   :  { %s3835_s25 = sld [smem:[%s4578_s0 + %s3746_s22]]   ;;  %s3749_s4 = smov 8  }
   0x7   :  { %s3840_s29 = sld [smem:[%s4578_s0 + %s3747_s26]]   ;;  %s3750_s10 = smov 9  }
   0x8   :  { %s3845_s3 = sld [smem:[%s4578_s0 + %s3748_s30]]   ;;  %s3751_s15 = smov 10  }
   0x9   :  { %s3850_s8 = sld [smem:[%s4578_s0 + %s3749_s4]]   ;;  %s3752_s20 = smov 11  }
   0xa   :  { %s3855_s14 = sld [smem:[%s4578_s0 + %s3750_s10]]   ;;  %s3753_s26 = smov 12  }
   0xb   :  { %s3860_s19 = sld [smem:[%s4578_s0 + %s3751_s15]]   ;;  %s3754_s1 = smov 13  }
   0xc   :  { %4585 = sst [smem:[#allocation6_spill]] %s3835_s25  ;;  %s3755_s7 = smov 14  }
   0xd   :  { %s3865_s24 = sld [smem:[%s4578_s0 + %s3752_s20]]   ;;  %s3756_s15 = smov 15  }
   0xe   :  { %4586 = sst [smem:[#allocation7_spill]] %s3845_s3  ;;  %s3757_s22 = smov 16  }
   0xf   :  { %s3870_s30 = sld [smem:[%s4578_s0 + %s3753_s26]]   ;;  %s3758_s28 = smov 17  }
  0x10   :  { %s3875_s6 = sld [smem:[%s4578_s0 + %s3754_s1]]   ;;  %s3779_s10 = smov 38  }
  0x11   :  { %s3880_s12 = sld [smem:[%s4578_s0 + %s3755_s7]]   ;;  %s3759_s7 = smov 18  }
  0x12   :  { %s3885_s20 = sld [smem:[%s4578_s0 + %s3756_s15]]   ;;  %s3760_s15 = smov 19  }
  0x13   :  { %s3890_s27 = sld [smem:[%s4578_s0 + %s3757_s22]]   ;;  %s3761_s22 = smov 20  }
  0x14   :  { %s3895_s4 = sld [smem:[%s4578_s0 + %s3758_s28]]   ;;  %s3762_s28 = smov 21  }
  0x15   :  { %s3900_s25 = sld [smem:[%s4578_s0 + %s3759_s7]]   ;;  %s3763_s7 = smov 22  }
  0x16   :  { %s3905_s3 = sld [smem:[%s4578_s0 + %s3760_s15]]   ;;  %s3764_s15 = smov 23  }
  0x18   :  { %4587 = sst [smem:[#allocation8_spill]] %s3885_s20 }
  0x19   :  { %4588 = sst [smem:[#allocation9_spill]] %s3890_s27 }
  0x1a   :  { %4589 = sst [smem:[#allocation10_spill]] %s3895_s4 }
  0x1b   :  { %4590 = sst [smem:[#allocation11_spill]] %s3900_s25 }
  0x1c   :  { %4591 = sst [smem:[#allocation12_spill]] %s3905_s3 }
  0x1d   :  { %s3910_s27 = sld [smem:[%s4578_s0 + %s3761_s22]]   ;;  %s3765_s22 = smov 24  }
  0x1e   :  { %s3915_s4 = sld [smem:[%s4578_s0 + %s3762_s28]]   ;;  %s3766_s28 = smov 25  }
  0x1f   :  { %s3920_s25 = sld [smem:[%s4578_s0 + %s3763_s7]]   ;;  %s3767_s7 = smov 26  }
  0x20   :  { %s3925_s3 = sld [smem:[%s4578_s0 + %s3764_s15]]   ;;  %s3768_s15 = smov 27  }
  0x21   :  { %s3940_s20 = sld [smem:[%s4578_s0 + %s3767_s7]]   ;;  %s3771_s7 = smov 30  }
  0x23   :  { %4592 = sst [smem:[#allocation13_spill]] %s3910_s27 }
  0x24   :  { %4593 = sst [smem:[#allocation14_spill]] %s3915_s4 }
  0x25   :  { %s3930_s27 = sld [smem:[%s4578_s0 + %s3765_s22]]   ;;  %s3769_s22 = smov 28  }
  0x26   :  { %4594 = sst [smem:[#allocation15_spill]] %s3925_s3 }
  0x27   :  { %s3935_s4 = sld [smem:[%s4578_s0 + %s3766_s28]]   ;;  %s3770_s28 = smov 29  }
  0x28   :  { %4597 = sst [smem:[#allocation18_spill]] %s3940_s20 }
  0x29   :  { %s3945_s3 = sld [smem:[%s4578_s0 + %s3768_s15]]   ;;  %s3772_s15 = smov 31  }
  0x2a   :  { %s3960_s20 = sld [smem:[%s4578_s0 + %s3771_s7]]   ;;  %s3775_s7 = smov 34  }
  0x2b   :  { %4595 = sst [smem:[#allocation16_spill]] %s3930_s27 }
  0x2c   :  { %s3950_s27 = sld [smem:[%s4578_s0 + %s3769_s22]]   ;;  %s3773_s22 = smov 32  }
  0x2d   :  { %4596 = sst [smem:[#allocation17_spill]] %s3935_s4 }
  0x2e   :  { %s3955_s4 = sld [smem:[%s4578_s0 + %s3770_s28]]   ;;  %s3774_s28 = smov 33  }
  0x2f   :  { %4598 = sst [smem:[#allocation19_spill]] %s3945_s3 }
  0x30   :  { %4601 = sst [smem:[#allocation22_spill]] %s3960_s20 }
  0x31   :  { %s3965_s3 = sld [smem:[%s4578_s0 + %s3772_s15]]   ;;  %s3776_s15 = smov 35  }
  0x32   :  { %4599 = sst [smem:[#allocation20_spill]] %s3950_s27 }
  0x33   :  { %s3970_s27 = sld [smem:[%s4578_s0 + %s3773_s22]]   ;;  %s3777_s22 = smov 36  }
  0x34   :  { %4600 = sst [smem:[#allocation21_spill]] %s3955_s4 }
  0x35   :  { %s3975_s4 = sld [smem:[%s4578_s0 + %s3774_s28]]   ;;  %s3778_s28 = smov 37  }
  0x36   :  { %s3980_s20 = sld [smem:[%s4578_s0 + %s3775_s7]]  }
  0x37   :  { %4602 = sst [smem:[#allocation23_spill]] %s3965_s3 }
  0x38   :  { %s3985_s3 = sld [smem:[%s4578_s0 + %s3776_s15]]  }
  0x39   :  { %4603 = sst [smem:[#allocation24_spill]] %s3970_s27 }
  0x3a   :  { %s3990_s27 = sld [smem:[%s4578_s0 + %s3777_s22]]  }
  0x3b   :  { %4604 = sst [smem:[#allocation25_spill]] %s3975_s4 }
  0x3c   :  { %4605 = sst [smem:[#allocation26_spill]] %s3980_s20 }
  0x3d   :  { %s3052_s4 = sld [smem:[%s4578_s0 + %s3778_s28]]  }
  0x3e   :  { %s3998_s20 = sld [smem:[%s4578_s0 + %s3779_s10]]  }
  0x43   :  { %v82_v0 = vstv %s3052_s4 }
  0x44   :  { %83 = vst [vmem:[#allocation2] sm:$0x1] %v82_v0 }
  0x45   :  { %v162_v1 = vld [vmem:[%s3810_s5 + $0x8] sm:$0xff]  ;;  %v161_v2 = vld [vmem:[%s3810_s5] sm:$0xff]  ;;  %v3780_v3 = vmov 0   ;;  %v3502_v4 = vld [vmem:[%s3840_s29 + $0x74] ss:$8 sps:$4 sm:$0xff]   ;;  %v3781_v9 = vmov 1  }
  0x46   :  { %3471 = vset.pattern.permute.xlu1 %v3780_v3  ;;  %3469 = vset.pattern.permute.xlu0 %v3780_v3  ;;  %v3504_v5 = vld [vmem:[%s3840_s29 + $0x70] ss:$8 sps:$4 sm:$0xff]   ;;  %v3505_v6 = vld [vmem:[%s3840_s29 + $0x64] ss:$8 sps:$4 sm:$0xff]   ;;  %v3507_v7 = vld [vmem:[%s3840_s29 + $0x60] ss:$8 sps:$4 sm:$0xff]  }
  0x47   :  { %172 = vperm.xlu1 %3471, %v162_v1   ;;  %167 = vperm.xlu0 %3469, %v161_v2   ;;  %v3508_v8 = vld [vmem:[%s3840_s29 + $0x54] ss:$8 sps:$4 sm:$0xff]   ;;  %v3510_v10 = vld [vmem:[%s3840_s29 + $0x50] ss:$8 sps:$4 sm:$0xff]   ;;  %v3511_v11 = vld [vmem:[%s3840_s29 + $0x44] ss:$8 sps:$4 sm:$0xff]  }
  0x48   :  { %1108 = vmatprep.subr.bf16.mxu1 %v3502_v4  ;;  %v3513_v12 = vld [vmem:[%s3840_s29 + $0x40] ss:$8 sps:$4 sm:$0xff]   ;;  %v3514_v13 = vld [vmem:[%s3840_s29 + $0x34] ss:$8 sps:$4 sm:$0xff]   ;;  %v3516_v14 = vld [vmem:[%s3840_s29 + $0x30] ss:$8 sps:$4 sm:$0xff]  }
  0x49   :  { %1109 = vmatpush1.bf16.msra.mxu1 %v3504_v5  ;;  %v3517_v15 = vld [vmem:[%s3840_s29 + $0x24] ss:$8 sps:$4 sm:$0xff]   ;;  %v3519_v18 = vld [vmem:[%s3840_s29 + $0x20] ss:$8 sps:$4 sm:$0xff]   ;;  %v3520_v19 = vld [vmem:[%s3840_s29 + $0x14] ss:$8 sps:$4 sm:$0xff]  }
  0x4a   :  { %1110 = vmatprep.subr.bf16.mxu1 %v3505_v6  ;;  %v210_v16 = vld [vmem:[%s3830_s21 + $0x8] sm:$0xff]  ;;  %v209_v17 = vld [vmem:[%s3830_s21] sm:$0xff]  ;;  %v3546_v20 = vld [vmem:[%s3840_s29 + $0x174] ss:$8 sps:$4 sm:$0xff]  }
  0x4b   :  { %3472 = vset.pattern.permute.xlu1 %v3781_v9  ;;  %3470 = vset.pattern.permute.xlu0 %v3781_v9  ;;  %v3522_v21 = vld [vmem:[%s3840_s29 + $0x10] ss:$8 sps:$4 sm:$0xff]   ;;  %v3523_v22 = vld [vmem:[%s3840_s29 + $0x4] ss:$8 sps:$4 sm:$0xff]   ;;  %v3525_v23 = vld [vmem:[%s3840_s29] ss:$8 sps:$4 sm:$0xff]  }
  0x4c   :  { %186 = vperm.xlu1 %3472, %v162_v1   ;;  %182 = vperm.xlu0 %3470, %v161_v2   ;;  %v305_v24 = vld [vmem:[%s3815_s9 + $0x8] sm:$0xff]  ;;  %v3526_v26 = vld [vmem:[%s3840_s29 + $0xf4] ss:$8 sps:$4 sm:$0xff]   ;;  %v3528_v28 = vld [vmem:[%s3840_s29 + $0xf0] ss:$8 sps:$4 sm:$0xff]  }
  0x4d   :  { %1111 = vmatpush1.bf16.msra.mxu1 %v3507_v7  ;;  %3310 = vmatprep.subr.mxu0 %v210_v16  ;;  %v313_v25 = vld [vmem:[%s3815_s9 + $0x48] sm:$0xff]  ;;  %v3532_v31 = vld [vmem:[%s3840_s29 + $0xd4] ss:$8 sps:$4 sm:$0xff]   ;;  %v3534_v32 = vld [vmem:[%s3840_s29 + $0xd0] ss:$8 sps:$4 sm:$0xff]  }
  0x4e   :  { %1112 = vmatprep.subr.bf16.mxu1 %v3508_v8  ;;  %3311 = vmatpush3.msra.mxu0 %v210_v16  ;;  %v321_v27 = vpack.c.bf16 %v313_v25, %v305_v24  ;;  %v3529_v29 = vld [vmem:[%s3840_s29 + $0xe4] ss:$8 sps:$4 sm:$0xff]   ;;  %v3531_v30 = vld [vmem:[%s3840_s29 + $0xe0] ss:$8 sps:$4 sm:$0xff]   ;;  %v3538_v35 = vld [vmem:[%s3840_s29 + $0xb4] ss:$8 sps:$4 sm:$0xff]  }
  0x4f   :  { %3312 = vmatprep.subr.mxu0 %v209_v17  ;;  %v3535_v33 = vld [vmem:[%s3840_s29 + $0xc4] ss:$8 sps:$4 sm:$0xff]   ;;  %v3537_v34 = vld [vmem:[%s3840_s29 + $0xc0] ss:$8 sps:$4 sm:$0xff]   ;;  %v3540_v36 = vld [vmem:[%s3840_s29 + $0xb0] ss:$8 sps:$4 sm:$0xff]  }
  0x50   :  { %3473 = vset.pattern.permute.xlu1 %v3780_v3  ;;  %3313 = vmatpush3.msra.mxu0 %v209_v17  ;;  %v3541_v37 = vld [vmem:[%s3840_s29 + $0xa4] ss:$8 sps:$4 sm:$0xff]   ;;  %v3543_v38 = vld [vmem:[%s3840_s29 + $0xa0] ss:$8 sps:$4 sm:$0xff]   ;;  %v3547_v39 = vld [vmem:[%s3840_s29 + $0x94] ss:$8 sps:$4 sm:$0xff]  }
  0x51   :  { %1113 = vmatpush1.bf16.msra.mxu1 %v3510_v10  ;;  %1151 = vmatprep.subr.bf16.mxu0 %v3546_v20  ;;  %v3549_v40 = vld [vmem:[%s3840_s29 + $0x90] ss:$8 sps:$4 sm:$0xff]   ;;  %v3553_v41 = vld [vmem:[%s3840_s29 + $0x84] ss:$8 sps:$4 sm:$0xff]   ;;  %v3555_v42 = vld [vmem:[%s3840_s29 + $0x80] ss:$8 sps:$4 sm:$0xff]  }
  0x52   :  { %1114 = vmatprep.subr.bf16.mxu1 %v3511_v11  ;;  %1140 = vmatprep.mubr.bf16.mxu1 %v321_v27  ;;  %v3561_v43 = vld [vmem:[%s3840_s29 + $0x274] ss:$8 sps:$4 sm:$0xff]   ;;  %v304_v44 = vld [vmem:[%s3815_s9] sm:$0xff]  ;;  %v3559_v47 = vld [vmem:[%s3840_s29 + $0x270] ss:$8 sps:$4 sm:$0xff]  }
  0x53   :  { %v312_v45 = vld [vmem:[%s3815_s9 + $0x40] sm:$0xff]  ;;  %v3573_v50 = vld [vmem:[%s3840_s29 + $0x254] ss:$8 sps:$4 sm:$0xff]   ;;  %v3571_v51 = vld [vmem:[%s3840_s29 + $0x250] ss:$8 sps:$4 sm:$0xff]  }
  0x54   :  { %v320_v46 = vpack.c.bf16 %v312_v45, %v304_v44  ;;  %v3567_v48 = vld [vmem:[%s3840_s29 + $0x264] ss:$8 sps:$4 sm:$0xff]   ;;  %v3565_v49 = vld [vmem:[%s3840_s29 + $0x260] ss:$8 sps:$4 sm:$0xff]   ;;  %v3585_v54 = vld [vmem:[%s3840_s29 + $0x234] ss:$8 sps:$4 sm:$0xff]  }
  0x55   :  { %1115 = vmatpush1.bf16.msra.mxu1 %v3513_v12  ;;  %v3579_v52 = vld [vmem:[%s3840_s29 + $0x244] ss:$8 sps:$4 sm:$0xff]   ;;  %v3577_v53 = vld [vmem:[%s3840_s29 + $0x240] ss:$8 sps:$4 sm:$0xff]   ;;  %v3583_v55 = vld [vmem:[%s3840_s29 + $0x230] ss:$8 sps:$4 sm:$0xff]  }
  0x56   :  { %1116 = vmatprep.subr.bf16.mxu1 %v3514_v13  ;;  %v3591_v56 = vld [vmem:[%s3840_s29 + $0x224] ss:$8 sps:$4 sm:$0xff]  }
  0x59   :  { %1117 = vmatpush1.bf16.msra.mxu1 %v3516_v14 }
  0x5a   :  { %1118 = vmatprep.subr.bf16.mxu1 %v3517_v15 }
  0x5d   :  { %1119 = vmatpush1.bf16.msra.mxu1 %v3519_v18 }
  0x5e   :  { %1120 = vmatprep.subr.bf16.mxu1 %v3520_v19 }
  0x61   :  { %1121 = vmatpush1.bf16.msra.mxu1 %v3522_v21 }
  0x62   :  { %1122 = vmatprep.subr.bf16.mxu1 %v3523_v22 }
  0x65   :  { %1123 = vmatpush1.bf16.msra.mxu1 %v3525_v23 }
  0x66   :  { %1124 = vmatprep.subr.bf16.mxu1 %v3526_v26 }
  0x69   :  { %1125 = vmatpush2.bf16.msra.mxu1 %v3528_v28 }
  0x6a   :  { %1126 = vmatprep.subr.bf16.mxu1 %v3529_v29 }
  0x6d   :  { %1127 = vmatpush2.bf16.msra.mxu1 %v3531_v30 }
  0x6e   :  { %1128 = vmatprep.subr.bf16.mxu1 %v3532_v31 }
  0x71   :  { %1129 = vmatpush2.bf16.msra.mxu1 %v3534_v32 }
  0x72   :  { %1130 = vmatprep.subr.bf16.mxu1 %v3535_v33 }
  0x75   :  { %1131 = vmatpush2.bf16.msra.mxu1 %v3537_v34 }
  0x76   :  { %1132 = vmatprep.subr.bf16.mxu1 %v3538_v35 }
  0x79   :  { %1133 = vmatpush2.bf16.msra.mxu1 %v3540_v36 }
  0x7a   :  { %1134 = vmatprep.subr.bf16.mxu1 %v3541_v37 }
  0x7d   :  { %1135 = vmatpush2.bf16.msra.mxu1 %v3543_v38 }
  0x7e   :  { %1136 = vmatprep.subr.bf16.mxu1 %v3547_v39 }
  0x81   :  { %1137 = vmatpush2.bf16.msra.mxu1 %v3549_v40 }
  0x82   :  { %1138 = vmatprep.subr.bf16.mxu1 %v3553_v41 }
  0x85   :  { %1139 = vmatpush2.bf16.msra.mxu1 %v3555_v42 }
  0x86   :  { %1194 = vmatprep.subr.bf16.mxu1 %v3561_v43 }
  0x88   :  { %1141 = vmatmul.mubr.bf16.vlgmr.msra.gmra.mxu1 %v320_v46 }
  0x89   :  { %1195 = vmatpush1.bf16.msra.mxu1 %v3559_v47 }
  0x8a   :  { %1196 = vmatprep.subr.bf16.mxu1 %v3567_v48 }
  0x8d   :  { %1197 = vmatpush1.bf16.msra.mxu1 %v3565_v49 }
  0x8e   :  { %1198 = vmatprep.subr.bf16.mxu1 %v3573_v50 }
  0x91   :  { %1199 = vmatpush1.bf16.msra.mxu1 %v3571_v51 }
  0x92   :  { %1200 = vmatprep.subr.bf16.mxu1 %v3579_v52 }
  0x95   :  { %1201 = vmatpush1.bf16.msra.mxu1 %v3577_v53 }
  0x96   :  { %1202 = vmatprep.subr.bf16.mxu1 %v3585_v54 }
  0x97   :  { %84 = vsyncpa [#allocation4], 0  ;;  %v3589_v57 = vld [vmem:[%s3840_s29 + $0x220] ss:$8 sps:$4 sm:$0xff]   ;;  %v3597_v58 = vld [vmem:[%s3840_s29 + $0x214] ss:$8 sps:$4 sm:$0xff]   ;;  %v175_v14 = vlaneseq }
  0x98   :  { %v309_v59 = vld [vmem:[%s3815_s9 + $0x28] sm:$0xff]  ;;  %v3595_v62 = vld [vmem:[%s3840_s29 + $0x210] ss:$8 sps:$4 sm:$0xff]   ;;  %v3609_v1 = vld [vmem:[%s3840_s29 + $0x2f4] ss:$8 sps:$4 sm:$0xff]   ;;  %vm218_vm0 = vcmask 130048  }
  0x99   :  { %1203 = vmatpush1.bf16.msra.mxu1 %v3583_v55  ;;  %v317_v60 = vld [vmem:[%s3815_s9 + $0x68] sm:$0xff]  ;;  %v3607_v2 = vld [vmem:[%s3840_s29 + $0x2f0] ss:$8 sps:$4 sm:$0xff]   ;;  %v3621_v6 = vld [vmem:[%s3840_s29 + $0x2d4] ss:$8 sps:$4 sm:$0xff]   ;;  %v4078_v17 = vshrl.u32 %v175_v14, 7 }
  0x9a   :  { %1204 = vmatprep.subr.bf16.mxu1 %v3591_v56  ;;  %v325_v61 = vpack.c.bf16 %v317_v60, %v309_v59  ;;  %v3603_v63 = vld [vmem:[%s3840_s29 + $0x204] ss:$8 sps:$4 sm:$0xff]   ;;  %v3601_v0 = vld [vmem:[%s3840_s29 + $0x200] ss:$8 sps:$4 sm:$0xff]   ;;  %v3619_v7 = vld [vmem:[%s3840_s29 + $0x2d0] ss:$8 sps:$4 sm:$0xff]  }
  0x9b   :  { %v3615_v4 = vld [vmem:[%s3840_s29 + $0x2e4] ss:$8 sps:$4 sm:$0xff]   ;;  %v3613_v5 = vld [vmem:[%s3840_s29 + $0x2e0] ss:$8 sps:$4 sm:$0xff]   ;;  %v3633_v11 = vld [vmem:[%s3840_s29 + $0x2b4] ss:$8 sps:$4 sm:$0xff]  }
  0x9c   :  { %1226 = vmatprep.mubr.bf16.mxu1 %v325_v61  ;;  %v3627_v8 = vld [vmem:[%s3840_s29 + $0x2c4] ss:$8 sps:$4 sm:$0xff]   ;;  %v3625_v10 = vld [vmem:[%s3840_s29 + $0x2c0] ss:$8 sps:$4 sm:$0xff]   ;;  %v3631_v12 = vld [vmem:[%s3840_s29 + $0x2b0] ss:$8 sps:$4 sm:$0xff]  }
  0x9d   :  { %1205 = vmatpush1.bf16.msra.mxu1 %v3589_v57  ;;  %v3639_v13 = vld [vmem:[%s3840_s29 + $0x2a4] ss:$8 sps:$4 sm:$0xff]   ;;  %v3637_v15 = vld [vmem:[%s3840_s29 + $0x2a0] ss:$8 sps:$4 sm:$0xff]   ;;  %v3645_v16 = vld [vmem:[%s3840_s29 + $0x294] ss:$8 sps:$4 sm:$0xff]  }
  0x9e   :  { %1206 = vmatprep.subr.bf16.mxu1 %v3597_v58  ;;  %v3643_v18 = vld [vmem:[%s3840_s29 + $0x290] ss:$8 sps:$4 sm:$0xff]   ;;  %v3651_v19 = vld [vmem:[%s3840_s29 + $0x284] ss:$8 sps:$4 sm:$0xff]   ;;  %v163_v20 = vld [vmem:[%s3820_s13] sm:$0x3] }
  0x9f   :  { %v4084_v21 = vsub.s32 0, %v4078_v17  ;;  %v4087_v22 = vsub.s32 1, %v4078_v17  ;;  %v3649_v23 = vld [vmem:[%s3840_s29 + $0x280] ss:$8 sps:$4 sm:$0xff]   ;;  %v307_v56 = vld [vmem:[%s3815_s9 + $0x18] sm:$0xff]  ;;  %s4606_s0 = sld [smem:[#allocation8_spill]] }
  0xa0   :  { %v308_v24 = vld [vmem:[%s3815_s9 + $0x20] sm:$0xff]  ;;  %v315_v57 = vld [vmem:[%s3815_s9 + $0x58] sm:$0xff]  ;;  %vm1390_vm1 = vcmask 523264   ;;  %s4608_s13 = sld [smem:[#allocation14_spill]]  ;;  %vm1554_vm3 = vcmask 179336   ;;  %vm2034_vm4 = vcmask 310544  }
  0xa1   :  { %1207 = vmatpush1.bf16.msra.mxu1 %v3595_v62  ;;  %v316_v25 = vld [vmem:[%s3815_s9 + $0x60] sm:$0xff]  ;;  %v178_v29 = vrot.slane %v163_v20, %v4084_v21  ;;  %v192_v30 = vrot.slane %v163_v20, %v4087_v22  ;;  %v3544_v62 = vld [vmem:[%s3840_s29 + $0x170] ss:$8 sps:$4 sm:$0xff]   ;;  %s4610_s21 = sld [smem:[#allocation7_spill]]  ;;  %s3793_s4 = smov 4   ;;  %vm1575_vm6 = vcmask 39936  }
  0xa2   :  { %1208 = vmatprep.subr.bf16.mxu1 %v3603_v63  ;;  %v1288_v26 = vld [vmem:[%s3850_s8] sm:$0x3]  ;;  %v324_v31 = vpack.c.bf16 %v316_v25, %v308_v24  ;;  %v3570_v24 = vld [vmem:[%s3840_s29 + $0x134] ss:$8 sps:$4 sm:$0xff]   ;;  %v3568_v25 = vld [vmem:[%s3840_s29 + $0x130] ss:$8 sps:$4 sm:$0xff]  }
  0xa3   :  { %v1315_v32 = vrot.slane %v1288_v26, %v4084_v21  ;;  %v1321_v33 = vrot.slane %v1288_v26, %v4087_v22  ;;  %v3054_v44 = vld [vmem:[%s3825_s17] ss:$0 sm:$0xff]  ;;  %v1781_v26 = vld [vmem:[%s3920_s25 + $0x30] sm:$0xff]  ;;  %s4609_s17 = sld [smem:[#allocation20_spill]]  ;;  %s3785_s8 = smov 118   ;;  %vm2055_vm7 = vcmask 31744  }
  0xa4   :  { %v3186_v45 = vld [vmem:[%s3855_s14] ss:$0 sm:$0xff]  ;;  %s3786_s14 = smov 124   ;;  %s3794_s15 = smov 111   ;;  %vm2405_vm8 = vcmask 64512   ;;  %vm2823_vm9 = vcmask 261120  }
  0xa5   :  { %1209 = vmatpush1.bf16.msra.mxu1 %v3601_v0  ;;  %v1771_v51 = vld [vmem:[%s3860_s19] sm:$0x3]  ;;  %v323_v0 = vpack.c.bf16 %v315_v57, %v307_v56  ;;  %v314_v56 = vld [vmem:[%s3815_s9 + $0x50] sm:$0xff]  ;;  %s3787_s19 = smov 120   ;;  %s3795_s16 = smov 94   ;;  %vm2905_vm10 = vcmask 293888  }
  0xa6   :  { %1210 = vmatprep.subr.bf16.mxu1 %v3609_v1  ;;  %v1804_v58 = vrot.slane %v1771_v51, %v4087_v22  ;;  %v1798_v61 = vrot.slane %v1771_v51, %v4084_v21  ;;  %v3552_v1 = vld [vmem:[%s3840_s29 + $0x164] ss:$8 sps:$4 sm:$0xff]   ;;  %v3562_v20 = vld [vmem:[%s3840_s29 + $0x140] ss:$8 sps:$4 sm:$0xff]   ;;  %v3630_v51 = vld [vmem:[%s3840_s29 + $0x194] ss:$8 sps:$4 sm:$0xff]  }
  0xa7   :  { %v3642_v57 = vld [vmem:[%s3840_s29 + $0x374] ss:$8 sps:$4 sm:$0xff]   ;;  %s4612_s18 = sld [smem:[#allocation11_spill]]  ;;  %s3796_s26 = smov 64   ;;  %vm2989_vm13 = vcmask 302080   ;;  %vm2992_vm14 = vcmask 310272  }
  0xa8   :  { %s4613_s22 = sld [smem:[#allocation18_spill]]  ;;  %vm2995_vm15 = vcmask 318464  }
  0xa9   :  { %1211 = vmatpush2.bf16.msra.mxu1 %v3607_v2  ;;  %s4614_s23 = sld [smem:[#allocation9_spill]] }
  0xaa   :  { %1212 = vmatprep.subr.bf16.mxu1 %v3615_v4  ;;  %s4615_s28 = sld [smem:[#allocation10_spill]] }
  0xab   :  { %s4616_s1 = sld [smem:[#allocation16_spill]] }
  0xac   :  { %s4617_s2 = sld [smem:[#allocation17_spill]] }
  0xad   :  { %1213 = vmatpush2.bf16.msra.mxu1 %v3613_v5  ;;  %s4618_s10 = sld [smem:[#allocation6_spill]] }
  0xae   :  { %1214 = vmatprep.subr.bf16.mxu1 %v3621_v6  ;;  %v3550_v6 = vld [vmem:[%s3840_s29 + $0x160] ss:$8 sps:$4 sm:$0xff]   ;;  %s4619_s7 = sld [smem:[#allocation22_spill]] }
  0xaf   :  { %s4620_s11 = sld [smem:[#allocation19_spill]] }
  0xb1   :  { %1215 = vmatpush2.bf16.msra.mxu1 %v3619_v7 }
  0xb2   :  { %1216 = vmatprep.subr.bf16.mxu1 %v3627_v8  ;;  %v3558_v8 = vld [vmem:[%s3840_s29 + $0x154] ss:$8 sps:$4 sm:$0xff]  }
  0xb5   :  { %1217 = vmatpush2.bf16.msra.mxu1 %v3625_v10  ;;  %v3782_v10 = vmov 2  }
  0xb6   :  { %1218 = vmatprep.subr.bf16.mxu1 %v3633_v11 }
  0xb9   :  { %1219 = vmatpush2.bf16.msra.mxu1 %v3631_v12 }
  0xba   :  { %1220 = vmatprep.subr.bf16.mxu1 %v3639_v13  ;;  %v3195_v13 = vld [vmem:[%s3865_s24] ss:$0 sm:$0xff]  ;;  %s3789_s24 = smov 12  }
  0xbd   :  { %1221 = vmatpush2.bf16.msra.mxu1 %v3637_v15  ;;  %v3556_v15 = vld [vmem:[%s3840_s29 + $0x150] ss:$8 sps:$4 sm:$0xff]  }
  0xbe   :  { %1222 = vmatprep.subr.bf16.mxu1 %v3645_v16  ;;  %v3564_v16 = vld [vmem:[%s3840_s29 + $0x144] ss:$8 sps:$4 sm:$0xff]  }
  0xc1   :  { %1223 = vmatpush2.bf16.msra.mxu1 %v3643_v18 }
  0xc2   :  { %v168_v27 = vpop.permute.xlu0 %167  ;;  %v173_v28 = vpop.permute.xlu1 %172  ;;  %1224 = vmatprep.subr.bf16.mxu1 %v3651_v19 }
  0xc3   :  { %v180_v34 = vmul.f32 %v178_v29, %v173_v28  ;;  %v179_v37 = vmul.f32 %v178_v29, %v168_v27  ;;  %v1316_v40 = vmul.f32 %v1315_v32, %v168_v27  ;;  %v1317_v41 = vmul.f32 %v1315_v32, %v173_v28  ;;  %v3574_v29 = vld [vmem:[%s3840_s29 + $0x120] ss:$8 sps:$4 sm:$0xff]   ;;  %v1778_v32 = vld [vmem:[%s3920_s25 + $0x18] sm:$0xff] }
  0xc4   :  { %v1800_v2 = vmul.f32 %v1798_v61, %v173_v28  ;;  %v1799_v7 = vmul.f32 %v1798_v61, %v168_v27  ;;  %v3576_v27 = vld [vmem:[%s3840_s29 + $0x124] ss:$8 sps:$4 sm:$0xff]   ;;  %v3640_v61 = vld [vmem:[%s3840_s29 + $0x370] ss:$8 sps:$4 sm:$0xff]  }
  0xc5   :  { %1225 = vmatpush2.bf16.msra.mxu1 %v3649_v23  ;;  %v1782_v23 = vld [vmem:[%s3920_s25 + $0x38] sm:$0xff]  ;;  %v1780_v28 = vld [vmem:[%s3920_s25 + $0x28] sm:$0xff] }
  0xc6   :  { %3355 = vmatprep.subr.mxu1 %v1782_v23 }
  0xc7   :  { %v187_v35 = vpop.permute.xlu1 %186  ;;  %v183_v36 = vpop.permute.xlu0 %182 }
  0xc8   :  { %v194_v38 = vmul.f32 %v192_v30, %v187_v35  ;;  %v193_v39 = vmul.f32 %v192_v30, %v183_v36  ;;  %1227 = vmatmul.mubr.bf16.vlgmr.msra.gmra.mxu1 %v324_v31  ;;  %v1323_v42 = vmul.f32 %v1321_v33, %v187_v35  ;;  %v1322_v43 = vmul.f32 %v1321_v33, %v183_v36  ;;  %v1779_v30 = vld [vmem:[%s3920_s25 + $0x20] sm:$0xff]  ;;  %v3582_v31 = vld [vmem:[%s3840_s29 + $0x114] ss:$8 sps:$4 sm:$0xff]   ;;  %v3580_v33 = vld [vmem:[%s3840_s29 + $0x110] ss:$8 sps:$4 sm:$0xff]  }
  0xc9   :  { %v1806_v4 = vmul.f32 %v1804_v58, %v187_v35  ;;  %v1805_v5 = vmul.f32 %v1804_v58, %v183_v36  ;;  %3356 = vmatpush3.msra.mxu1 %v1782_v23  ;;  %v3588_v35 = vld [vmem:[%s3840_s29 + $0x104] ss:$8 sps:$4 sm:$0xff]   ;;  %v311_v58 = vld [vmem:[%s3815_s9 + $0x38] sm:$0xff]  ;;  %v3673_v23 = vld [vmem:[%s3840_s29 + $0x3e0] ss:$8 sps:$4 sm:$0xff]  }
  0xca   :  { %v195_v46 = vadd.f32 %v193_v39, %v179_v37  ;;  %v196_v47 = vadd.f32 %v194_v38, %v180_v34  ;;  %v1324_v48 = vadd.f32 %v1322_v43, %v1316_v40  ;;  %v1325_v53 = vadd.f32 %v1323_v42, %v1317_v41  ;;  %3357 = vmatprep.subr.mxu1 %v1781_v26  ;;  %v1777_v34 = vld [vmem:[%s3920_s25 + $0x10] sm:$0xff]  ;;  %v1776_v36 = vld [vmem:[%s3920_s25 + $0x8] sm:$0xff]  ;;  %v1775_v38 = vld [vmem:[%s3920_s25] sm:$0xff]  ;;  %s4611_s25 = sld [smem:[#allocation15_spill]] }
  0xcb   :  { %v1808_v11 = vadd.f32 %v1806_v4, %v1800_v2  ;;  %v1807_v12 = vadd.f32 %v1805_v5, %v1799_v7  ;;  %3358 = vmatpush3.msra.mxu1 %v1781_v26  ;;  %v3586_v37 = vld [vmem:[%s3840_s29 + $0x100] ss:$8 sps:$4 sm:$0xff]   ;;  %v3594_v39 = vld [vmem:[%s3840_s29 + $0x1f4] ss:$8 sps:$4 sm:$0xff]   ;;  %v3592_v40 = vld [vmem:[%s3840_s29 + $0x1f0] ss:$8 sps:$4 sm:$0xff]  }
  0xcc   :  { %v203_v49 = vadd.f32 %v3054_v44, %v195_v46  ;;  %v204_v50 = vadd.f32 %v3054_v44, %v196_v47  ;;  %v1332_v52 = vadd.f32 %v3186_v45, %v1324_v48  ;;  %v1333_v63 = vadd.f32 %v3186_v45, %v1325_v53  ;;  %3359 = vmatprep.subr.mxu1 %v1780_v28  ;;  %v3600_v41 = vld [vmem:[%s3840_s29 + $0x1e4] ss:$8 sps:$4 sm:$0xff]   ;;  %v3598_v42 = vld [vmem:[%s3840_s29 + $0x1e0] ss:$8 sps:$4 sm:$0xff]   ;;  %v3606_v43 = vld [vmem:[%s3840_s29 + $0x1d4] ss:$8 sps:$4 sm:$0xff]  }
  0xcd   :  { %v1816_v18 = vadd.f32 %v3195_v13, %v1808_v11  ;;  %v1815_v19 = vadd.f32 %v3195_v13, %v1807_v12  ;;  %3360 = vmatpush3.msra.mxu1 %v1780_v28  ;;  %v3604_v44 = vld [vmem:[%s3840_s29 + $0x1d0] ss:$8 sps:$4 sm:$0xff]   ;;  %v3612_v45 = vld [vmem:[%s3840_s29 + $0x1c4] ss:$8 sps:$4 sm:$0xff]   ;;  %v3610_v46 = vld [vmem:[%s3840_s29 + $0x1c0] ss:$8 sps:$4 sm:$0xff]  }
  0xce   :  { %v205_v54 = vmul.f32 0.01, %v203_v49  ;;  %v206_v55 = vmul.f32 0.01, %v204_v50  ;;  %1351 = vperm.xlu0 %3470, %v1332_v52   ;;  %1336 = vperm.xlu1 %3473, %v1332_v52   ;;  %v3618_v47 = vld [vmem:[%s3840_s29 + $0x1b4] ss:$8 sps:$4 sm:$0xff]  }
  0xcf   :  { %3361 = vmatprep.subr.mxu1 %v1779_v30  ;;  %v3616_v48 = vld [vmem:[%s3840_s29 + $0x1b0] ss:$8 sps:$4 sm:$0xff]   ;;  %v3636_v53 = vld [vmem:[%s3840_s29 + $0x184] ss:$8 sps:$4 sm:$0xff]   ;;  %v3655_v5 = vld [vmem:[%s3840_s29 + $0x340] ss:$8 sps:$4 sm:$0xff]  }
  0xd0   :  { %v207_v59 = vmax.f32 %v203_v49, %v205_v54  ;;  %v208_v60 = vmax.f32 %v204_v50, %v206_v55  ;;  %3362 = vmatpush3.msra.mxu1 %v1779_v30  ;;  %v3624_v49 = vld [vmem:[%s3840_s29 + $0x1a4] ss:$8 sps:$4 sm:$0xff]   ;;  %v3622_v50 = vld [vmem:[%s3840_s29 + $0x1a0] ss:$8 sps:$4 sm:$0xff]   ;;  %v306_v55 = vld [vmem:[%s3815_s9 + $0x10] sm:$0xff] }
  0xd1   :  { %3363 = vmatprep.subr.mxu1 %v1778_v32  ;;  %v3634_v54 = vld [vmem:[%s3840_s29 + $0x180] ss:$8 sps:$4 sm:$0xff]   ;;  %v3652_v2 = vld [vmem:[%s3840_s29 + $0x350] ss:$8 sps:$4 sm:$0xff]   ;;  %v3657_v4 = vld [vmem:[%s3840_s29 + $0x344] ss:$8 sps:$4 sm:$0xff]  }
  0xd2   :  { %3314 = vmatprep.mubr.msk.f32.mxu0 %vm218_vm0, %v207_v59  ;;  %1355 = vperm.xlu0 %3470, %v1333_v63   ;;  %v319_v59 = vld [vmem:[%s3815_s9 + $0x78] sm:$0xff]  ;;  %v3661_v11 = vld [vmem:[%s3840_s29 + $0x320] ss:$8 sps:$4 sm:$0xff]   ;;  %v3681_v26 = vld [vmem:[%s3840_s29 + $0x3c4] ss:$8 sps:$4 sm:$0xff]  }
  0xd3   :  { %1341 = vperm.xlu1 %3473, %v1333_v63   ;;  %3315 = vmatmul.mubr.msk.f32.vlgmr.msra.gmra.mxu0 %vm218_vm0, %v208_v60  ;;  %v322_v60 = vpack.c.bf16 %v314_v56, %v306_v55  ;;  %v3658_v7 = vld [vmem:[%s3840_s29 + $0x330] ss:$8 sps:$4 sm:$0xff]   ;;  %v3666_v12 = vld [vmem:[%s3840_s29 + $0x314] ss:$8 sps:$4 sm:$0xff]   ;;  %v3687_v30 = vld [vmem:[%s3840_s29 + $0x3a4] ss:$8 sps:$4 sm:$0xff]  }
  0xd4   :  { %1152 = vmatpush1.bf16.msra.mxu0 %v3544_v62  ;;  %1183 = vmatprep.mubr.bf16.mxu0 %v323_v0  ;;  %v327_v62 = vpack.c.bf16 %v319_v59, %v311_v58  ;;  %v3646_v0 = vld [vmem:[%s3840_s29 + $0x360] ss:$8 sps:$4 sm:$0xff]   ;;  %v3664_v13 = vld [vmem:[%s3840_s29 + $0x310] ss:$8 sps:$4 sm:$0xff]   ;;  %v3684_v28 = vld [vmem:[%s3840_s29 + $0x3b4] ss:$8 sps:$4 sm:$0xff]  }
  0xd5   :  { %1153 = vmatprep.subr.bf16.mxu0 %v3552_v1  ;;  %3364 = vmatpush3.msra.mxu1 %v1778_v32  ;;  %v3654_v1 = vld [vmem:[%s3840_s29 + $0x354] ss:$8 sps:$4 sm:$0xff]   ;;  %v3187_v59 = vld [vmem:[%s3875_s6] ss:$0 sm:$0xff]  ;;  %s3791_s6 = smov 5  }
  0xd6   :  { %3475 = vset.pattern.permute.xlu0 %v3782_v10  ;;  %3365 = vmatprep.subr.mxu1 %v1777_v34  ;;  %v3690_v32 = vld [vmem:[%s3840_s29 + $0x394] ss:$8 sps:$4 sm:$0xff]  }
  0xd7   :  { %3474 = vset.pattern.permute.xlu1 %v3782_v10  ;;  %1371 = vperm.xlu0 %3475, %v1333_v63   ;;  %v3648_v63 = vld [vmem:[%s3840_s29 + $0x364] ss:$8 sps:$4 sm:$0xff]  }
  0xd8   :  { %1367 = vperm.xlu1 %3474, %v1332_v52   ;;  %1154 = vmatpush1.bf16.msra.mxu0 %v3550_v6  ;;  %v3628_v52 = vld [vmem:[%s3840_s29 + $0x190] ss:$8 sps:$4 sm:$0xff]   ;;  %v3660_v6 = vld [vmem:[%s3840_s29 + $0x334] ss:$8 sps:$4 sm:$0xff]  }
  0xd9   :  { %1155 = vmatprep.subr.bf16.mxu0 %v3558_v8  ;;  %3366 = vmatpush3.msra.mxu1 %v1777_v34  ;;  %v3663_v8 = vld [vmem:[%s3840_s29 + $0x324] ss:$8 sps:$4 sm:$0xff]   ;;  %v3688_v34 = vld [vmem:[%s3840_s29 + $0x390] ss:$8 sps:$4 sm:$0xff]  }
  0xda   :  { %3367 = vmatprep.subr.mxu1 %v1776_v36 }
  0xdb   :  { %3478 = vset.pattern.permute.xlu0 %v3780_v3  ;;  %3368 = vmatpush3.msra.mxu1 %v1776_v36 }
  0xdc   :  { %3476 = vset.pattern.permute.xlu1 %v3780_v3  ;;  %1156 = vmatpush1.bf16.msra.mxu0 %v3556_v15  ;;  %v3669_v15 = vld [vmem:[%s3840_s29 + $0x304] ss:$8 sps:$4 sm:$0xff]  }
  0xdd   :  { %1824 = vperm.xlu0 %3478, %v1816_v18   ;;  %1819 = vperm.xlu1 %3476, %v1815_v19  }
  0xde   :  { %1157 = vmatprep.subr.bf16.mxu0 %v3564_v16  ;;  %3369 = vmatprep.subr.mxu1 %v1775_v38  ;;  %v3667_v16 = vld [vmem:[%s3840_s29 + $0x300] ss:$8 sps:$4 sm:$0xff]  }
  0xdf   :  { %3370 = vmatpush3.msra.mxu1 %v1775_v38  ;;  %v4189_v38 = vsub.s32 2, %v4078_v17 }
  0xe0   :  { %1158 = vmatpush1.bf16.msra.mxu0 %v3562_v20  ;;  %v3675_v20 = vld [vmem:[%s3840_s29 + $0x3e4] ss:$8 sps:$4 sm:$0xff]  }
  0xe1   :  { %3480 = vset.pattern.permute.xlu0 %v3782_v10  ;;  %3477 = vset.pattern.permute.xlu1 %v3781_v9 }
  0xe2   :  { %1854 = vperm.xlu0 %3480, %v1816_v18   ;;  %1834 = vperm.xlu1 %3477, %v1815_v19  }
  0xe3   :  { %1159 = vmatprep.subr.bf16.mxu0 %v3570_v24  ;;  %v3678_v24 = vld [vmem:[%s3840_s29 + $0x3d4] ss:$8 sps:$4 sm:$0xff]  }
  0xe4   :  { %1160 = vmatpush1.bf16.msra.mxu0 %v3568_v25  ;;  %v3676_v25 = vld [vmem:[%s3840_s29 + $0x3d0] ss:$8 sps:$4 sm:$0xff]  }
  0xe5   :  { %1161 = vmatprep.subr.bf16.mxu0 %v3576_v27  ;;  %v3679_v27 = vld [vmem:[%s3840_s29 + $0x3c0] ss:$8 sps:$4 sm:$0xff]  }
  0xe6   :  { %1838 = vperm.xlu1 %3477, %v1816_v18   ;;  %v3672_v18 = vld [vmem:[%s3840_s29 + $0x3f4] ss:$8 sps:$4 sm:$0xff]  }
  0xe8   :  { %1162 = vmatpush1.bf16.msra.mxu0 %v3574_v29  ;;  %v3682_v29 = vld [vmem:[%s3840_s29 + $0x3b0] ss:$8 sps:$4 sm:$0xff]  }
  0xe9   :  { %1163 = vmatprep.subr.bf16.mxu0 %v3582_v31  ;;  %v3685_v31 = vld [vmem:[%s3840_s29 + $0x3a0] ss:$8 sps:$4 sm:$0xff]  }
  0xea   :  { %3479 = vset.pattern.permute.xlu1 %v3782_v10 }
  0xeb   :  { %1850 = vperm.xlu1 %3479, %v1815_v19   ;;  %v3670_v19 = vld [vmem:[%s3840_s29 + $0x3f0] ss:$8 sps:$4 sm:$0xff]  }
  0xec   :  { %1164 = vmatpush1.bf16.msra.mxu0 %v3580_v33  ;;  %v1290_v33 = vld [vmem:[%s3870_s30] sm:$0x7]  ;;  %s3790_s30 = smov 10  }
  0xed   :  { %1165 = vmatprep.subr.bf16.mxu0 %v3588_v35 }
  0xef   :  { %3481 = vset.pattern.permute.xlu1 %v3781_v9 }
  0xf0   :  { %1166 = vmatpush1.bf16.msra.mxu0 %v3586_v37  ;;  %v3693_v37 = vld [vmem:[%s3840_s29 + $0x384] ss:$8 sps:$4 sm:$0xff]  }
  0xf1   :  { %1167 = vmatprep.subr.bf16.mxu0 %v3594_v39  ;;  %v1361_v39 = vrot.slane %v1290_v33, %v4087_v22 }
  0xf4   :  { %1168 = vmatpush2.bf16.msra.mxu0 %v3592_v40  ;;  %v1347_v40 = vrot.slane %v1290_v33, %v4084_v21 }
  0xf5   :  { %1169 = vmatprep.subr.bf16.mxu0 %v3600_v41  ;;  %v310_v41 = vld [vmem:[%s3815_s9 + $0x30] sm:$0xff] }
  0xf8   :  { %1170 = vmatpush2.bf16.msra.mxu0 %v3598_v42  ;;  %v318_v42 = vld [vmem:[%s3815_s9 + $0x70] sm:$0xff]  ;;  %s4607_s9 = sld [smem:[#allocation13_spill]] }
  0xf9   :  { %1171 = vmatprep.subr.bf16.mxu0 %v3606_v43  ;;  %v3691_v43 = vld [vmem:[%s3840_s29 + $0x380] ss:$8 sps:$4 sm:$0xff]   ;;  %s3784_s29 = smov 123  }
  0xfc   :  { %1172 = vmatpush2.bf16.msra.mxu0 %v3604_v44 }
  0xfd   :  { %1173 = vmatprep.subr.bf16.mxu0 %v3612_v45 }
 0x100   :  { %1174 = vmatpush2.bf16.msra.mxu0 %v3610_v46  ;;  %v1377_v46 = vrot.slane %v1290_v33, %v4189_v38  ;;  %v3196_v33 = vld [vmem:[%s4608_s13] ss:$0 sm:$0xff]  ;;  %s4623_s13 = sld [smem:[#allocation21_spill]] }
 0x101   :  { %1175 = vmatprep.subr.bf16.mxu0 %v3618_v47  ;;  %v326_v47 = vpack.c.bf16 %v318_v42, %v310_v41 }
 0x104   :  { %1176 = vmatpush2.bf16.msra.mxu0 %v3616_v48  ;;  %v1299_v48 = vld [vmem:[%s3880_s12 + $0x38] sm:$0xff] }
 0x105   :  { %1177 = vmatprep.subr.bf16.mxu0 %v3624_v49 }
 0x108   :  { %1178 = vmatpush2.bf16.msra.mxu0 %v3622_v50 }
 0x109   :  { %1179 = vmatprep.subr.bf16.mxu0 %v3630_v51 }
 0x10c   :  { %1180 = vmatpush2.bf16.msra.mxu0 %v3628_v52 }
 0x10d   :  { %1181 = vmatprep.subr.bf16.mxu0 %v3636_v53 }
 0x110   :  { %1182 = vmatpush2.bf16.msra.mxu0 %v3634_v54  ;;  %v1298_v54 = vld [vmem:[%s3880_s12 + $0x30] sm:$0xff] }
 0x111   :  { %1237 = vmatprep.subr.bf16.mxu0 %v3642_v57 }
 0x113   :  { %1184 = vmatmul.mubr.bf16.vlgmr.msra.gmra.mxu0 %v322_v60  ;;  %v1297_v60 = vld [vmem:[%s3880_s12 + $0x28] sm:$0xff] }
 0x114   :  { %1238 = vmatpush1.bf16.msra.mxu0 %v3640_v61  ;;  %1269 = vmatprep.mubr.bf16.mxu0 %v327_v62 }
 0x115   :  { %1239 = vmatprep.subr.bf16.mxu0 %v3648_v63  ;;  %v1296_v63 = vld [vmem:[%s3880_s12 + $0x20] sm:$0xff] }
 0x118   :  { %1240 = vmatpush1.bf16.msra.mxu0 %v3646_v0  ;;  %v3190_v0 = vld [vmem:[%s4606_s0] ss:$0 sm:$0xff]  ;;  %s4621_s0 = sld [smem:[#allocation12_spill]] }
 0x119   :  { %1241 = vmatprep.subr.bf16.mxu0 %v3654_v1 }
 0x11c   :  { %1242 = vmatpush1.bf16.msra.mxu0 %v3652_v2 }
 0x11d   :  { %1243 = vmatprep.subr.bf16.mxu0 %v3657_v4 }
 0x120   :  { %1244 = vmatpush1.bf16.msra.mxu0 %v3655_v5  ;;  %v1295_v5 = vld [vmem:[%s3880_s12 + $0x18] sm:$0xff] }
 0x121   :  { %1245 = vmatprep.subr.bf16.mxu0 %v3660_v6 }
 0x124   :  { %1246 = vmatpush1.bf16.msra.mxu0 %v3658_v7 }
 0x125   :  { %1247 = vmatprep.subr.bf16.mxu0 %v3663_v8  ;;  %v1294_v8 = vld [vmem:[%s3880_s12 + $0x10] sm:$0xff] }
 0x128   :  { %1248 = vmatpush1.bf16.msra.mxu0 %v3661_v11  ;;  %v1773_v11 = vld [vmem:[%s4607_s9] sm:$0x7]  ;;  %s4622_s9 = sld [smem:[#allocation24_spill]] }
 0x129   :  { %1249 = vmatprep.subr.bf16.mxu0 %v3666_v12 }
 0x12c   :  { %1250 = vmatpush1.bf16.msra.mxu0 %v3664_v13 }
 0x12d   :  { %1251 = vmatprep.subr.bf16.mxu0 %v3669_v15 }
 0x130   :  { %1252 = vmatpush1.bf16.msra.mxu0 %v3667_v16  ;;  %v1293_v16 = vld [vmem:[%s3880_s12 + $0x8] sm:$0xff] }
 0x131   :  { %1253 = vmatprep.subr.bf16.mxu0 %v3672_v18 }
 0x134   :  { %1254 = vmatpush2.bf16.msra.mxu0 %v3670_v19  ;;  %v1830_v19 = vrot.slane %v1773_v11, %v4084_v21 }
 0x135   :  { %1255 = vmatprep.subr.bf16.mxu0 %v3675_v20  ;;  %v1292_v20 = vld [vmem:[%s3880_s12] sm:$0xff]  ;;  %s3792_s12 = smov 8  }
 0x138   :  { %1256 = vmatpush2.bf16.msra.mxu0 %v3673_v23  ;;  %v1844_v23 = vrot.slane %v1773_v11, %v4087_v22 }
 0x139   :  { %1257 = vmatprep.subr.bf16.mxu0 %v3678_v24  ;;  %v1860_v24 = vrot.slane %v1773_v11, %v4189_v38 }
 0x13c   :  { %1258 = vmatpush2.bf16.msra.mxu0 %v3676_v25 }
 0x13d   :  { %1259 = vmatprep.subr.bf16.mxu0 %v3681_v26 }
 0x140   :  { %1260 = vmatpush2.bf16.msra.mxu0 %v3679_v27 }
 0x141   :  { %1261 = vmatprep.subr.bf16.mxu0 %v3684_v28 }
 0x144   :  { %1262 = vmatpush2.bf16.msra.mxu0 %v3682_v29 }
 0x145   :  { %1263 = vmatprep.subr.bf16.mxu0 %v3687_v30 }
 0x148   :  { %1264 = vmatpush2.bf16.msra.mxu0 %v3685_v31 }
 0x149   :  { %v1352_v35 = vpop.permute.xlu0 %1351  ;;  %v1337_v36 = vpop.permute.xlu1 %1336  ;;  %1265 = vmatprep.subr.bf16.mxu0 %v3690_v32 }
 0x14a   :  { %v1362_v49 = vmul.f32 %v1361_v39, %v1352_v35  ;;  %v1348_v17 = vmul.f32 %v1347_v40, %v1337_v36 }
 0x14c   :  { %1266 = vmatpush2.bf16.msra.mxu0 %v3688_v34  ;;  %v1364_v55 = vadd.f32 %v1362_v49, %v1348_v17  ;;  %v2263_v49 = vld [vmem:[%s4609_s17 + $0x60] sm:$0xff]  ;;  %v2262_v17 = vld [vmem:[%s4609_s17 + $0x58] sm:$0xff] }
 0x14d   :  { %v1356_v44 = vpop.permute.xlu0 %1355  ;;  %1267 = vmatprep.subr.bf16.mxu0 %v3693_v37 }
 0x14e   :  { %v1342_v45 = vpop.permute.xlu1 %1341  ;;  %v1363_v50 = vmul.f32 %v1361_v39, %v1356_v44  ;;  %v3783_v39 = vmov 0.0   ;;  %v2267_v44 = vld [vmem:[%s4609_s17 + $0x80] sm:$0xff] }
 0x14f   :  { %v1349_v51 = vmul.f32 %v1347_v40, %v1342_v45  ;;  %2330 = vmatprep.subr.mxu1 %v3783_v39 }
 0x150   :  { %1268 = vmatpush2.bf16.msra.mxu0 %v3691_v43 }
 0x151   :  { %3317 = vmatprep.subr.mxu0 %v1299_v48  ;;  %v1365_v56 = vadd.f32 %v1363_v50, %v1349_v51  ;;  %v2261_v50 = vld [vmem:[%s4609_s17 + $0x50] sm:$0xff]  ;;  %v2260_v51 = vld [vmem:[%s4609_s17 + $0x48] sm:$0xff] }
 0x152   :  { %v1372_v52 = vpop.permute.xlu0 %1371 }
 0x153   :  { %v1368_v53 = vpop.permute.xlu1 %1367  ;;  %v1379_v57 = vmul.f32 %v1377_v46, %v1372_v52  ;;  %1270 = vmatmul.mubr.bf16.vlgmr.msra.gmra.mxu0 %v326_v47  ;;  %v2265_v47 = vld [vmem:[%s4609_s17 + $0x70] sm:$0xff]  ;;  %v2259_v52 = vld [vmem:[%s4609_s17 + $0x40] sm:$0xff] }
 0x154   :  { %v1378_v58 = vmul.f32 %v1377_v46, %v1368_v53  ;;  %3318 = vmatpush3.msra.mxu0 %v1299_v48  ;;  %v2266_v46 = vld [vmem:[%s4609_s17 + $0x78] sm:$0xff]  ;;  %v2264_v48 = vld [vmem:[%s4609_s17 + $0x68] sm:$0xff] }
 0x155   :  { %v1381_v61 = vadd.f32 %v1379_v57, %v1365_v56  ;;  %3319 = vmatprep.subr.mxu0 %v1298_v54  ;;  %v2258_v53 = vld [vmem:[%s4609_s17 + $0x38] sm:$0xff]  ;;  %v2255_v56 = vld [vmem:[%s4609_s17 + $0x20] sm:$0xff] }
 0x156   :  { %v1380_v62 = vadd.f32 %v1378_v58, %v1364_v55  ;;  %3320 = vmatpush3.msra.mxu0 %v1298_v54  ;;  %v2257_v54 = vld [vmem:[%s4609_s17 + $0x30] sm:$0xff]  ;;  %v2256_v55 = vld [vmem:[%s4609_s17 + $0x28] sm:$0xff]  ;;  %v2254_v57 = vld [vmem:[%s4609_s17 + $0x18] sm:$0xff] }
 0x157   :  { %v4203_v1 = vadd.f32 %v3187_v59, %v1381_v61  ;;  %3321 = vmatprep.subr.mxu0 %v1297_v60  ;;  %v2253_v58 = vld [vmem:[%s4609_s17 + $0x10] sm:$0xff]  ;;  %v2274_v61 = vld [vmem:[%s4609_s17 + $0xb8] sm:$0xff] }
 0x158   :  { %v4205_v2 = vadd.f32 %v3187_v59, %v1380_v62  ;;  %v1820_v4 = vpop.permute.xlu1 %1819  ;;  %3322 = vmatpush3.msra.mxu0 %v1297_v60  ;;  %v1825_v12 = vpop.permute.xlu0 %1824  ;;  %v2252_v59 = vld [vmem:[%s4609_s17 + $0x8] sm:$0xff]  ;;  %v2275_v60 = vld [vmem:[%s4609_s17 + $0xc0] sm:$0xff]  ;;  %v2273_v62 = vld [vmem:[%s4609_s17 + $0xb0] sm:$0xff] }
 0x159   :  { %3323 = vmatprep.subr.mxu0 %v1296_v63  ;;  %v1479_v6 = vmul.f32 %v3190_v0, %v4203_v1  ;;  %v1832_v27 = vmul.f32 %v1830_v19, %v1825_v12  ;;  %v1831_v32 = vmul.f32 %v1830_v19, %v1820_v4  ;;  %v2270_v4 = vld [vmem:[%s4609_s17 + $0x98] sm:$0xff] }
 0x15a   :  { %3333 = vmatprep.mubr.msk.f32.mxu0 %vm1390_vm1, %v4205_v2  ;;  %v1478_v7 = vmul.f32 %v3190_v0, %v4205_v2  ;;  %3324 = vmatpush3.msra.mxu0 %v1296_v63  ;;  %v2272_v63 = vld [vmem:[%s4609_s17 + $0xa8] sm:$0xff]  ;;  %v2271_v0 = vld [vmem:[%s4609_s17 + $0xa0] sm:$0xff] }
 0x15b   :  { %3325 = vmatprep.subr.mxu0 %v1295_v5  ;;  %v1483_v13 = vsel %vm1390_vm1, %v1479_v6, 0.0  ;;  %v2268_v6 = vld [vmem:[%s4609_s17 + $0x88] sm:$0xff] }
 0x15c   :  { %v1480_v15 = vsel %vm1390_vm1, %v1478_v7, 0.0  ;;  %3326 = vmatpush3.msra.mxu0 %v1295_v5  ;;  %1484 = vadd.xlane.f32.xlu0 %v1483_v13  ;;  %v2269_v5 = vld [vmem:[%s4609_s17 + $0x90] sm:$0xff]  ;;  %v1142_v7 = vpop.f32.mrf.mxu1 }
 0x15d   :  { %1481 = vadd.xlane.f32.xlu1 %v1480_v15  ;;  %v1835_v18 = vpop.permute.xlu1 %1834  ;;  %3327 = vmatprep.subr.mxu0 %v1294_v8  ;;  %v1855_v25 = vpop.permute.xlu0 %1854  ;;  %v456_v15 = vld [vmem:[%s4610_s21] sm:$0x3]  ;;  %s3797_s21 = smov 32  }
 0x15e   :  { %3328 = vmatpush3.msra.mxu0 %v1294_v8  ;;  %v1845_v29 = vmul.f32 %v1844_v23, %v1835_v18  ;;  %v1862_v30 = vmul.f32 %v1860_v24, %v1855_v25  ;;  %v1144_v8 = vpop.f32.mrf.mxu1  ;;  %v461_v19 = vrot.slane %v456_v15, %v4084_v21 }
 0x15f   :  { %3329 = vmatprep.subr.mxu0 %v1293_v16 }
 0x160   :  { %3330 = vmatpush3.msra.mxu0 %v1293_v16  ;;  %v1847_v36 = vadd.f32 %v1845_v29, %v1831_v32  ;;  %v1146_v12 = vpop.f32.mrf.mxu1  ;;  %v1143_v25 = vadd.f32 %v1142_v7, %v461_v19 }
 0x161   :  { %v1839_v26 = vpop.permute.xlu1 %1838  ;;  %3331 = vmatprep.subr.mxu0 %v1292_v20  ;;  %v1147_v29 = vadd.f32 %v1146_v12, %v461_v19 }
 0x162   :  { %v1846_v28 = vmul.f32 %v1844_v23, %v1839_v26  ;;  %3332 = vmatpush3.msra.mxu0 %v1292_v20  ;;  %v1148_v16 = vpop.f32.mrf.mxu1  ;;  %v465_v20 = vrot.slane %v456_v15, %v4087_v22 }
 0x163   :  { %3334 = vmatmul.mubr.msk.f32.vlgmr.msra.gmra.mxu0 %vm1390_vm1, %v4203_v1 }
 0x164   :  { %v1848_v31 = vadd.f32 %v1846_v28, %v1832_v27  ;;  %v1145_v26 = vadd.f32 %v1144_v8, %v465_v20 }
 0x166   :  { %v1864_v34 = vadd.f32 %v1862_v30, %v1848_v31  ;;  %v1851_v35 = vpop.permute.xlu1 %1850  ;;  %v1149_v31 = vadd.f32 %v1148_v16, %v465_v20 }
 0x167   :  { %v1861_v37 = vmul.f32 %v1860_v24, %v1851_v35 }
 0x168   :  { %v4225_v40 = vadd.f32 %v3196_v33, %v1864_v34 }
 0x169   :  { %v1863_v41 = vadd.f32 %v1861_v37, %v1847_v36 }
 0x16a   :  { %v3496_v42 = vpack.i.bf16 %v4203_v1, %v4225_v40 }
 0x16b   :  { %v4229_v43 = vadd.f32 %v3196_v33, %v1863_v41 }
 0x16d   :  { %3371 = vmatprep.mubr.msk.f32.mxu1 %vm1390_vm1, %v4229_v43  ;;  %v3491_v45 = vpack.i.bf16 %v4205_v2, %v4229_v43 }
 0x16e   :  { %3372 = vmatmul.mubr.msk.f32.vlgmr.msra.gmra.mxu1 %vm1390_vm1, %v4225_v40 }
 0x16f   :  { %2331 = vmatpush1.msra.mxu1 %v2267_v44 }
 0x170   :  { %2332 = vmatprep.subr.mxu1 %v3783_v39 }
 0x171   :  { %2333 = vmatpush1.msra.mxu1 %v2266_v46 }
 0x172   :  { %2334 = vmatprep.subr.mxu1 %v3783_v39 }
 0x173   :  { %2335 = vmatpush1.msra.mxu1 %v2265_v47 }
 0x174   :  { %2336 = vmatprep.subr.mxu1 %v3783_v39 }
 0x175   :  { %2337 = vmatpush1.msra.mxu1 %v2264_v48 }
 0x176   :  { %2338 = vmatprep.subr.mxu1 %v3783_v39 }
 0x177   :  { %2339 = vmatpush1.msra.mxu1 %v2263_v49 }
 0x178   :  { %2340 = vmatprep.subr.mxu1 %v3783_v39 }
 0x179   :  { %2341 = vmatpush1.msra.mxu1 %v2262_v17 }
 0x17a   :  { %2342 = vmatprep.subr.mxu1 %v3783_v39 }
 0x17b   :  { %2343 = vmatpush1.msra.mxu1 %v2261_v50 }
 0x17c   :  { %2344 = vmatprep.subr.mxu1 %v3783_v39 }
 0x17d   :  { %2345 = vmatpush1.msra.mxu1 %v2260_v51 }
 0x17e   :  { %2346 = vmatprep.subr.mxu1 %v3783_v39 }
 0x17f   :  { %2347 = vmatpush1.msra.mxu1 %v2259_v52 }
 0x180   :  { %2348 = vmatprep.subr.mxu1 %v3783_v39 }
 0x181   :  { %2349 = vmatpush1.msra.mxu1 %v2258_v53 }
 0x182   :  { %2350 = vmatprep.subr.mxu1 %v3783_v39 }
 0x183   :  { %2351 = vmatpush1.msra.mxu1 %v2257_v54 }
 0x184   :  { %2352 = vmatprep.subr.mxu1 %v3783_v39 }
 0x185   :  { %2353 = vmatpush1.msra.mxu1 %v2256_v55 }
 0x186   :  { %2354 = vmatprep.subr.mxu1 %v3783_v39 }
 0x187   :  { %2355 = vmatpush1.msra.mxu1 %v2255_v56 }
 0x188   :  { %2356 = vmatprep.subr.mxu1 %v3783_v39  ;;  %v1228_v24 = vpop.f32.mrf.mxu1 }
 0x189   :  { %2357 = vmatpush1.msra.mxu1 %v2254_v57 }
 0x18a   :  { %2358 = vmatprep.subr.mxu1 %v3783_v39  ;;  %v1230_v28 = vpop.f32.mrf.mxu1 }
 0x18b   :  { %2359 = vmatpush1.msra.mxu1 %v2253_v58 }
 0x18c   :  { %2360 = vmatprep.subr.mxu1 %v3783_v39  ;;  %v1232_v34 = vpop.f32.mrf.mxu1 }
 0x18d   :  { %2361 = vmatpush1.msra.mxu1 %v2252_v59 }
 0x18e   :  { %2378 = vmatprep.subr.mxu1 %v3783_v39  ;;  %v1234_v47 = vpop.f32.mrf.mxu1 }
 0x18f   :  { %2379 = vmatpush2.msra.mxu1 %v2275_v60 }
 0x190   :  { %2380 = vmatprep.subr.mxu1 %v3783_v39 }
 0x191   :  { %2381 = vmatpush2.msra.mxu1 %v2274_v61 }
 0x192   :  { %2382 = vmatprep.subr.mxu1 %v3783_v39 }
 0x193   :  { %2383 = vmatpush2.msra.mxu1 %v2273_v62  ;;  %v4285_v11 = vpop.f32.mrf.mxu0 }
 0x194   :  { %2384 = vmatprep.subr.mxu1 %v3783_v39 }
 0x195   :  { %2385 = vmatpush2.msra.mxu1 %v2272_v63  ;;  %v4287_v13 = vpop.f32.mrf.mxu0 }
 0x196   :  { %2386 = vmatprep.subr.mxu1 %v3783_v39 }
 0x197   :  { %2387 = vmatpush2.msra.mxu1 %v2271_v0 }
 0x198   :  { %2388 = vmatprep.subr.mxu1 %v3783_v39 }
 0x199   :  { %2389 = vmatpush2.msra.mxu1 %v2270_v4 }
 0x19a   :  { %2390 = vmatprep.subr.mxu1 %v3783_v39 }
 0x19b   :  { %2391 = vmatpush2.msra.mxu1 %v2269_v5 }
 0x19c   :  { %2392 = vmatprep.subr.mxu1 %v3783_v39 }
 0x19d   :  { %2393 = vmatpush2.msra.mxu1 %v2268_v6  ;;  %v3199_v6 = vld [vmem:[%s4611_s25] ss:$0 sm:$0xff]  ;;  %s4625_s25 = sld [smem:[#allocation26_spill]] }
 0x19e   :  { %2733 = vmatprep.subr.mxu1 %v3783_v39  ;;  %v1961_v7 = vmul.f32 %v3199_v6, %v4225_v40  ;;  %v1960_v12 = vmul.f32 %v3199_v6, %v4229_v43 }
 0x1a0   :  { %v1965_v8 = vsel %vm1390_vm1, %v1961_v7, 0.0  ;;  %v1962_v15 = vsel %vm1390_vm1, %v1960_v12, 0.0 }
 0x1d3   :  { %v1185_v18 = vpop.f32.mrf.mxu0 }
 0x1d4   :  { %v1186_v30 = vadd.f32 %v1185_v18, %v1143_v25 }
 0x1d5   :  { %v1187_v23 = vpop.f32.mrf.mxu0 }
 0x1d6   :  { %v1188_v32 = vadd.f32 %v1187_v23, %v1145_v26  ;;  %v1229_v35 = vadd.f32 %v1228_v24, %v1186_v30  ;;  %v4310_v24 = vld [vmem:[%s3810_s5 + $0x8] sm:$0xff] }
 0x1d7   :  { %v1189_v27 = vpop.f32.mrf.mxu0  ;;  %vm1543_vm2 = vcmp.gt.f32.partialorder %v4310_v24, 0.0 }
 0x1d8   :  { %v1190_v36 = vadd.f32 %v1189_v27, %v1147_v29  ;;  %v1231_v41 = vadd.f32 %v1230_v28, %v1188_v32  ;;  %v4315_v29 = vld [vmem:[%s3810_s5] sm:$0xff]  ;;  %s3788_s5 = smov 15  }
 0x1d9   :  { %v1191_v33 = vpop.f32.mrf.mxu0  ;;  %vm1542_vm5 = vcmp.gt.f32.partialorder %v4315_v29, 0.0 }
 0x1da   :  { %v1192_v44 = vadd.f32 %v1191_v33, %v1149_v31  ;;  %v1233_v49 = vadd.f32 %v1232_v34, %v1190_v36 }
 0x1dc   :  { %v1235_v52 = vadd.f32 %v1234_v47, %v1192_v44 }
 0x1e5   :  { %v1485_v16 = vpop.xlane.xlu0 %1484 }
 0x213   :  { %v1271_v37 = vpop.f32.mrf.mxu0 }
 0x214   :  { %v1272_v46 = vadd.f32 %v1271_v37, %v1229_v35 }
 0x215   :  { %v1273_v48 = vpop.f32.mrf.mxu0 }
 0x216   :  { %v1274_v17 = vadd.f32 %v1273_v48, %v1231_v41  ;;  %v1280_v50 = vmul.f32 0.01, %v1272_v46 }
 0x217   :  { %v1275_v51 = vpop.f32.mrf.mxu0 }
 0x218   :  { %v1281_v53 = vmul.f32 0.01, %v1274_v17  ;;  %v1276_v54 = vadd.f32 %v1275_v51, %v1233_v49  ;;  %v1284_v58 = vmax.f32 %v1272_v46, %v1280_v50 }
 0x219   :  { %v1277_v55 = vpop.f32.mrf.mxu0 }
 0x21a   :  { %v1285_v56 = vmax.f32 %v1274_v17, %v1281_v53  ;;  %v1278_v57 = vadd.f32 %v1277_v55, %v1235_v52  ;;  %v1282_v59 = vmul.f32 0.01, %v1276_v54 }
 0x21c   :  { %v1283_v60 = vmul.f32 0.01, %v1278_v57  ;;  %3204 = vmatprep.mubr.msk.f32.mxu1 %vm1390_vm1, %v1285_v56  ;;  %v1286_v62 = vmax.f32 %v1276_v54, %v1282_v59 }
 0x21d   :  { %2395 = vmatmul.mubr.f32.vlgmr.msra.gmra.mxu1 %v1284_v58 }
 0x21e   :  { %v1287_v61 = vmax.f32 %v1278_v57, %v1283_v60 }
 0x220   :  { %3205 = vmatprep.mubr.msk.f32.mxu1 %vm1390_vm1, %v1287_v61 }
 0x221   :  { %2400 = vmatmul.mubr.f32.gmra.mxu1 %v1286_v62 }
 0x223   :  { %v3335_v4 = vpop.f32.mrf.mxu0 }
 0x225   :  { %v1463_v5 = vpop.f32.mrf.mxu0 }
 0x22e   :  { %v3373_v63 = vpop.f32.mrf.mxu1 }
 0x22f   :  { %2005 = vperm.xlu0 %3480, %v3373_v63   ;;  %1985 = vperm.xlu1 %3481, %v3373_v63  }
 0x230   :  { %v1945_v0 = vpop.f32.mrf.mxu1 }
 0x233   :  { %3482 = vset.pattern.permute.xlu0 %v3781_v9  ;;  %3483 = vset.pattern.permute.xlu1 %v3782_v10 }
 0x234   :  { %2001 = vperm.xlu1 %3483, %v1945_v0   ;;  %1981 = vperm.xlu0 %3482, %v1945_v0  }
 0x238   :  { %3484 = vset.pattern.permute.xlu1 %v3781_v9  ;;  %3486 = vset.pattern.permute.xlu0 %v3780_v3 }
 0x239   :  { %1493 = vperm.xlu0 %3486, %v3335_v4   ;;  %1503 = vperm.xlu1 %3484, %v3335_v4  }
 0x23d   :  { %3488 = vset.pattern.permute.xlu0 %v3782_v10  ;;  %3485 = vset.pattern.permute.xlu1 %v3782_v10 }
 0x23e   :  { %1523 = vperm.xlu1 %3485, %v3335_v4   ;;  %1519 = vperm.xlu0 %3488, %v1463_v5  }
 0x242   :  { %3487 = vset.pattern.permute.xlu1 %v3781_v9  ;;  %3490 = vset.pattern.permute.xlu0 %v3780_v3  ;;  %v1482_v9 = vpop.xlane.xlu1 %1481 }
 0x243   :  { %1499 = vperm.xlu1 %3487, %v1463_v5  }
 0x247   :  { %3489 = vset.pattern.permute.xlu1 %v3780_v3 }
 0x25d   :  { %1966 = vadd.xlane.f32.xlu0 %v1965_v8 }
 0x267   :  { %1963 = vadd.xlane.f32.xlu1 %v1962_v15 }
 0x273   :  { %1975 = vperm.xlu0 %3490, %v3373_v63  }
 0x277   :  { %3501 = vset.pattern.permute.xlu0 %v3782_v10 }
 0x278   :  { %1970 = vperm.xlu1 %3489, %v1945_v0  }
 0x27c   :  { %1488 = vperm.xlu1 %3489, %v1463_v5  }
 0x2aa   :  { %v1986_v3 = vpop.permute.xlu1 %1985  ;;  %v2006_v18 = vpop.permute.xlu0 %2005 }
 0x2ab   :  { %v1989_v34 = vmul.f32 %v4310_v24, %v1986_v3  ;;  %v2009_v36 = vmul.f32 %v4310_v24, %v2006_v18 }
 0x2af   :  { %v2002_v19 = vpop.permute.xlu1 %2001  ;;  %v1982_v20 = vpop.permute.xlu0 %1981 }
 0x2b0   :  { %v1988_v33 = vmul.f32 %v4315_v29, %v1982_v20  ;;  %v2008_v35 = vmul.f32 %v4315_v29, %v2002_v19 }
 0x2b4   :  { %v1504_v23 = vpop.permute.xlu1 %1503  ;;  %v1494_v27 = vpop.permute.xlu0 %1493 }
 0x2b5   :  { %v1507_v25 = vmul.f32 %v4310_v24, %v1504_v23  ;;  %v1497_v50 = vmul.f32 %v4310_v24, %v1494_v27 }
 0x2b7   :  { %1512 = vrot.lane.b32.xlu1 %v1507_v25, %s3784_s29 }
 0x2b9   :  { %v1524_v26 = vpop.permute.xlu1 %1523  ;;  %v1520_v31 = vpop.permute.xlu0 %1519 }
 0x2ba   :  { %v1527_v10 = vmul.f32 %v4310_v24, %v1524_v26  ;;  %v1526_v32 = vmul.f32 %v4315_v29, %v1520_v31 }
 0x2bc   :  { %1532 = vrot.lane.b32.xlu1 %v1527_v10, %s3785_s8 }
 0x2be   :  { %v1500_v28 = vpop.permute.xlu1 %1499 }
 0x2bf   :  { %v1506_v30 = vmul.f32 %v4315_v29, %v1500_v28 }
 0x2c1   :  { %1510 = vrot.lane.b32.xlu1 %v1506_v30, %s3784_s29  ;;  %s3798_s29 = smov 96  }
 0x2c5   :  { %1530 = vrot.lane.b32.xlu1 %v1526_v32, %s3785_s8  ;;  %s3800_s8 = smov [#allocation3]  }
 0x2c9   :  { %1992 = vrot.lane.b32.xlu1 %v1988_v33, %s3786_s14 }
 0x2cd   :  { %1994 = vrot.lane.b32.xlu1 %v1989_v34, %s3786_s14  ;;  %s3005_s14 = sshll.u32 %s3800_s8, 4  ;;  %s3006_s14 = int_to_ptr.vmem [resolvable:$true] %s3005_s14 }
 0x2ce   :  { %p3725_p1 = scmp.lt.s32.totalorder %s3006_s14, %s3006_s14 }
 0x2d1   :  { %2012 = vrot.lane.b32.xlu1 %v2008_v35, %s3787_s19 }
 0x2d5   :  { %2014 = vrot.lane.b32.xlu1 %v2009_v36, %s3787_s19  ;;  %s3720_s19 = scalar_lea.vmem %s3006_s14, 256 }
 0x2d6   :  { %p3721_p0 = scmp.ne.s32.totalorder %s3006_s14, %s3720_s19  ;;  %p3726_p2 = scmp.lt.s32.totalorder %s3720_s19, %s3720_s19 }
 0x2d8   :  { %p3727_p3 = por %p3726_p2, %p3725_p1 }
 0x2da   :  { %p3728_p4 = pnand %p3727_p3, %p3721_p0 }
 0x2dd   :  { %v4323_v37 = vpop.f32.mrf.mxu1 }
 0x2df   :  { %v2398_v41 = vpop.f32.mrf.mxu1 }
 0x2e1   :  { %v4325_v44 = vpop.f32.mrf.mxu1 }
 0x2e3   :  { %v2403_v46 = vpop.f32.mrf.mxu1 }
 0x2e6   :  { %v1967_v0 = vpop.xlane.xlu0 %1966 }
 0x2ee   :  { %v1976_v6 = vpop.permute.xlu0 %1975 }
 0x2ef   :  { %v1979_v12 = vmul.f32 %v4310_v24, %v1976_v6 }
 0x2f0   :  { %v1964_v47 = vpop.xlane.xlu1 %1963 }
 0x2f4   :  { %v1971_v48 = vpop.permute.xlu1 %1970 }
 0x2f5   :  { %v1978_v5 = vmul.f32 %v4315_v29, %v1971_v48 }
 0x2f8   :  { %v1489_v49 = vpop.permute.xlu1 %1488 }
 0x2f9   :  { %v1496_v57 = vmul.f32 %v4315_v29, %v1489_v49 }
 0x329   :  { %v1513_v17 = vpop.permute.xlu1 %1512 }
 0x32a   :  { %v1517_v51 = vadd.f32 %v1513_v17, %v1497_v50 }
 0x32e   :  { %v1533_v52 = vpop.permute.xlu1 %1532 }
 0x32f   :  { %v1537_v53 = vadd.f32 %v1533_v52, %v1517_v51 }
 0x331   :  { %v1539_v54 = vadd.f32 %v1537_v53, %v1485_v16 }
 0x333   :  { %v1541_v55 = vmul.f32 0.125, %v1539_v54  ;;  %v1511_v56 = vpop.permute.xlu1 %1510 }
 0x334   :  { %v1516_v58 = vadd.f32 %v1511_v56, %v1496_v57 }
 0x335   :  { %1548 = vrot.lane.b32.xlu1 %v1541_v55, %s3788_s5 }
 0x337   :  { %v1531_v59 = vpop.permute.xlu1 %1530 }
 0x338   :  { %v1536_v60 = vadd.f32 %v1531_v59, %v1516_v58 }
 0x33a   :  { %v1538_v61 = vadd.f32 %v1536_v60, %v1482_v9 }
 0x33b   :  { %v1993_v62 = vpop.permute.xlu1 %1992 }
 0x33c   :  { %v1540_v63 = vmul.f32 0.125, %v1538_v61  ;;  %v1998_v7 = vadd.f32 %v1993_v62, %v1978_v5 }
 0x33e   :  { %1546 = vrot.lane.b32.xlu0 %v1540_v63, %s3788_s5 }
 0x33f   :  { %v1995_v4 = vpop.permute.xlu1 %1994 }
 0x340   :  { %v1999_v16 = vadd.f32 %v1995_v4, %v1979_v12 }
 0x343   :  { %v2013_v8 = vpop.permute.xlu1 %2012 }
 0x344   :  { %v2018_v15 = vadd.f32 %v2013_v8, %v1998_v7 }
 0x346   :  { %v2020_v3 = vadd.f32 %v2018_v15, %v1964_v47 }
 0x347   :  { %v2015_v18 = vpop.permute.xlu1 %2014 }
 0x348   :  { %v2022_v19 = vmul.f32 0.125, %v2020_v3  ;;  %v2019_v20 = vadd.f32 %v2015_v18, %v1999_v16 }
 0x34a   :  { %v2021_v9 = vadd.f32 %v2019_v20, %v1967_v0  ;;  %2026 = vrot.lane.b32.xlu0 %v2022_v19, %s3789_s24 }
 0x34c   :  { %v2023_v23 = vmul.f32 0.125, %v2021_v9 }
 0x34e   :  { %2028 = vrot.lane.b32.xlu1 %v2023_v23, %s3789_s24 }
 0x3a7   :  { %v1549_v25 = vpop.permute.xlu1 %1548 }
 0x3a8   :  { %v1553_v26 = vsel %vm1543_vm2, %v1549_v25, -1e+09 }
 0x3a9   :  { %v1558_v27 = vsel %vm1554_vm3, %v1553_v26, -inf }
 0x3aa   :  { %1559 = vmax.xlane.f32.xlu1 %v1558_v27 }
 0x3b0   :  { %v1547_v10 = vpop.permute.xlu0 %1546 }
 0x3b1   :  { %v1552_v32 = vsel %vm1542_vm5, %v1547_v10, -1e+09 }
 0x3b2   :  { %v1555_v34 = vsel %vm1554_vm3, %v1552_v32, -inf }
 0x3bb   :  { %1584 = vrot.lane.b32.xlu1 %v4315_v29, %s3788_s5 }
 0x3bc   :  { %v2027_v28 = vpop.permute.xlu0 %2026 }
 0x3bd   :  { %v2032_v30 = vsel %vm1542_vm5, %v2027_v28, -1e+09 }
 0x3be   :  { %v2035_v31 = vsel %vm2034_vm4, %v2032_v30, -inf }
 0x3bf   :  { %2036 = vmax.xlane.f32.xlu0 %v2035_v31  ;;  %1586 = vrot.lane.b32.xlu1 %v4310_v24, %s3788_s5 }
 0x3c0   :  { %v2029_v33 = vpop.permute.xlu1 %2028 }
 0x3c1   :  { %v2033_v35 = vsel %vm1543_vm2, %v2029_v33, -1e+09 }
 0x3c2   :  { %v2038_v36 = vsel %vm2034_vm4, %v2033_v35, -inf }
 0x3c3   :  { %1556 = vmax.xlane.f32.xlu0 %v1555_v34  ;;  %1608 = vrot.lane.b32.xlu1 %v4310_v24, %s3790_s30 }
 0x3c7   :  { %2039 = vmax.xlane.f32.xlu0 %v2038_v36  ;;  %1630 = vrot.lane.b32.xlu1 %v4310_v24, %s3791_s6 }
 0x3cb   :  { %2086 = vrot.lane.b32.xlu1 %v4315_v29, %s3792_s12 }
 0x3cf   :  { %2088 = vrot.lane.b32.xlu1 %v4310_v24, %s3792_s12 }
 0x3d3   :  { %2110 = vrot.lane.b32.xlu1 %v4310_v24, %s3793_s4 }
 0x3dd   :  { %1606 = vrot.lane.b32.xlu0 %v4315_v29, %s3790_s30 }
 0x3e1   :  { %1628 = vrot.lane.b32.xlu0 %v4315_v29, %s3791_s6 }
 0x3e5   :  { %2064 = vrot.lane.b32.xlu0 %v4315_v29, %s3789_s24 }
 0x3e9   :  { %2066 = vrot.lane.b32.xlu0 %v4310_v24, %s3789_s24 }
 0x3ed   :  { %2108 = vrot.lane.b32.xlu0 %v4315_v29, %s3793_s4 }
 0x433   :  { %v1560_v41 = vpop.xlane.xlu1 %1559 }
 0x434   :  { %v1562_v46 = vsub.f32 %v1553_v26, %v1560_v41 }
 0x436   :  { %v1565_v47 = vmul.f32 1.442695, %v1562_v46 }
 0x437   :  { %v1585_v48 = vpop.permute.xlu1 %1584 }
 0x438   :  { %3694 = vpow2.f32 %v1565_v47 }
 0x43b   :  { %v1587_v49 = vpop.permute.xlu1 %1586 }
 0x43f   :  { %v1609_v50 = vpop.permute.xlu1 %1608 }
 0x443   :  { %v1631_v62 = vpop.permute.xlu1 %1630 }
 0x445   :  { %v3695_v17 = vpop.eup %3694 }
 0x446   :  { %1571 = vrot.lane.b32.xlu1 %v3695_v17, %s3794_s15  ;;  %v1613_v51 = vmul.f32 %v3695_v17, %v1609_v50  ;;  %v1591_v63 = vmul.f32 %v3695_v17, %v1587_v49  ;;  %v1635_v0 = vmul.f32 %v3695_v17, %v1631_v62 }
 0x447   :  { %v2087_v5 = vpop.permute.xlu1 %2086 }
 0x448   :  { %v2037_v52 = vpop.xlane.xlu0 %2036 }
 0x449   :  { %v2041_v29 = vsub.f32 %v2032_v30, %v2037_v52 }
 0x44a   :  { %1618 = vrot.lane.b32.xlu1 %v1613_v51, %s3794_s15 }
 0x44b   :  { %v2043_v57 = vmul.f32 1.442695, %v2041_v29  ;;  %v2089_v16 = vpop.permute.xlu1 %2088  ;;  %v1309_v29 = vld [vmem:[%s4612_s18 + $0x30] sm:$0xff] }
 0x44c   :  { %v1557_v53 = vpop.xlane.xlu0 %1556 }
 0x44d   :  { %v1561_v54 = vsub.f32 %v1552_v32, %v1557_v53 }
 0x44f   :  { %v1563_v24 = vmul.f32 1.442695, %v1561_v54  ;;  %v2111_v20 = vpop.permute.xlu1 %2110 }
 0x450   :  { %v2040_v55 = vpop.xlane.xlu0 %2039 }
 0x451   :  { %3696 = vpow2.f32 %v1563_v24  ;;  %v2042_v56 = vsub.f32 %v2033_v35, %v2040_v55  ;;  %v1310_v24 = vld [vmem:[%s4612_s18 + $0x38] sm:$0xff] }
 0x452   :  { %3698 = vpow2.f32 %v2043_v57  ;;  %3336 = vmatprep.subr.mxu0 %v1310_v24 }
 0x453   :  { %v2045_v58 = vmul.f32 1.442695, %v2042_v56  ;;  %3337 = vmatpush3.msra.mxu0 %v1310_v24 }
 0x454   :  { %v1607_v60 = vpop.permute.xlu0 %1606  ;;  %3338 = vmatprep.subr.mxu0 %v1309_v29 }
 0x455   :  { %3700 = vpow2.f32 %v2045_v58  ;;  %v1308_v58 = vld [vmem:[%s4612_s18 + $0x28] sm:$0xff]  ;;  %3339 = vmatpush3.msra.mxu0 %v1309_v29 }
 0x456   :  { %3340 = vmatprep.subr.mxu0 %v1308_v58 }
 0x457   :  { %3341 = vmatpush3.msra.mxu0 %v1308_v58  ;;  %v1792_v58 = vld [vmem:[%s4613_s22 + $0x30] sm:$0xff] }
 0x458   :  { %v1629_v4 = vpop.permute.xlu0 %1628 }
 0x45c   :  { %v2065_v15 = vpop.permute.xlu0 %2064 }
 0x45e   :  { %v3697_v59 = vpop.eup %3696 }
 0x45f   :  { %v1612_v61 = vmul.f32 %v3697_v59, %v1607_v60  ;;  %1569 = vrot.lane.b32.xlu0 %v3697_v59, %s3794_s15  ;;  %v1590_v6 = vmul.f32 %v3697_v59, %v1585_v48  ;;  %v3699_v7 = vpop.eup %3698  ;;  %v1634_v12 = vmul.f32 %v3697_v59, %v1629_v4  ;;  %v1306_v4 = vld [vmem:[%s4612_s18 + $0x18] sm:$0xff] }
 0x460   :  { %v2092_v3 = vmul.f32 %v3699_v7, %v2087_v5  ;;  %v2067_v19 = vpop.permute.xlu0 %2066  ;;  %v2070_v9 = vmul.f32 %v3699_v7, %v2065_v15 }
 0x461   :  { %1616 = vrot.lane.b32.xlu1 %v1612_v61, %s3794_s15 }
 0x462   :  { %v3701_v8 = vpop.eup %3700 }
 0x463   :  { %1596 = vrot.lane.b32.xlu0 %v1591_v63, %s3794_s15  ;;  %v2093_v18 = vmul.f32 %v3701_v8, %v2089_v16  ;;  %v2115_v23 = vmul.f32 %v3701_v8, %v2111_v20  ;;  %v2071_v25 = vmul.f32 %v3701_v8, %v2067_v19  ;;  %v1307_v63 = vld [vmem:[%s4612_s18 + $0x20] sm:$0xff] }
 0x464   :  { %v2109_v26 = vpop.permute.xlu0 %2108  ;;  %3342 = vmatprep.subr.mxu0 %v1307_v63  ;;  %v1303_v16 = vld [vmem:[%s4612_s18] sm:$0xff] }
 0x465   :  { %1640 = vrot.lane.b32.xlu1 %v1635_v0, %s3794_s15  ;;  %v2114_v27 = vmul.f32 %v3699_v7, %v2109_v26  ;;  %3343 = vmatpush3.msra.mxu0 %v1307_v63  ;;  %v3200_v63 = vld [vmem:[%s4617_s2] ss:$0 sm:$0xff] }
 0x466   :  { %3344 = vmatprep.subr.mxu0 %v1306_v4 }
 0x467   :  { %1594 = vrot.lane.b32.xlu0 %v1590_v6, %s3794_s15  ;;  %3345 = vmatpush3.msra.mxu0 %v1306_v4 }
 0x469   :  { %2051 = vrot.lane.b32.xlu1 %v3701_v8, %s3795_s16  ;;  %v1305_v8 = vld [vmem:[%s4612_s18 + $0x10] sm:$0xff] }
 0x46a   :  { %3346 = vmatprep.subr.mxu0 %v1305_v8 }
 0x46b   :  { %1638 = vrot.lane.b32.xlu0 %v1634_v12, %s3794_s15  ;;  %v1304_v12 = vld [vmem:[%s4612_s18 + $0x8] sm:$0xff]  ;;  %3347 = vmatpush3.msra.mxu0 %v1305_v8 }
 0x46c   :  { %3348 = vmatprep.subr.mxu0 %v1304_v12 }
 0x46d   :  { %2096 = vrot.lane.b32.xlu1 %v2092_v3, %s3795_s16  ;;  %3349 = vmatpush3.msra.mxu0 %v1304_v12  ;;  %v1793_v3 = vld [vmem:[%s4613_s22 + $0x38] sm:$0xff] }
 0x46e   :  { %3350 = vmatprep.subr.mxu0 %v1303_v16  ;;  %v1789_v12 = vld [vmem:[%s4613_s22 + $0x18] sm:$0xff] }
 0x46f   :  { %2049 = vrot.lane.b32.xlu0 %v3699_v7, %s3795_s16  ;;  %3351 = vmatpush3.msra.mxu0 %v1303_v16 }
 0x470   :  { %3374 = vmatprep.subr.mxu0 %v1793_v3 }
 0x471   :  { %2098 = vrot.lane.b32.xlu1 %v2093_v18, %s3795_s16 }
 0x473   :  { %2074 = vrot.lane.b32.xlu0 %v2070_v9, %s3795_s16  ;;  %v1301_v9 = vld [vmem:[%s4614_s23] sm:$0x7] }
 0x474   :  { %v1653_v26 = vrot.slane %v1301_v9, %v4084_v21  ;;  %v1667_v2 = vrot.slane %v1301_v9, %v4189_v38 }
 0x475   :  { %2120 = vrot.lane.b32.xlu1 %v2115_v23, %s3795_s16 }
 0x477   :  { %2076 = vrot.lane.b32.xlu0 %v2071_v25, %s3795_s16 }
 0x47b   :  { %2118 = vrot.lane.b32.xlu0 %v2114_v27, %s3795_s16  ;;  %v1659_v27 = vrot.slane %v1301_v9, %v4087_v22 }
 0x4b8   :  { %v1572_v10 = vpop.permute.xlu1 %1571 }
 0x4b9   :  { %v1579_v28 = vsel %vm1575_vm6, %v1572_v10, 0.0 }
 0x4ba   :  { %1580 = vadd.xlane.f32.xlu1 %v1579_v28 }
 0x4bc   :  { %v1619_v30 = vpop.permute.xlu1 %1618 }
 0x4bd   :  { %v1625_v35 = vsel %vm1575_vm6, %v1619_v30, 0.0 }
 0x4d1   :  { %v1570_v31 = vpop.permute.xlu0 %1569 }
 0x4d2   :  { %v1576_v32 = vsel %vm1575_vm6, %v1570_v31, 0.0  ;;  %v3191_v31 = vld [vmem:[%s4615_s28] ss:$0 sm:$0xff] }
 0x4d3   :  { %v1617_v33 = vpop.permute.xlu1 %1616  ;;  %1577 = vadd.xlane.f32.xlu0 %v1576_v32 }
 0x4d4   :  { %v1622_v17 = vsel %vm1575_vm6, %v1617_v33, 0.0 }
 0x4d5   :  { %v1597_v34 = vpop.permute.xlu0 %1596 }
 0x4d6   :  { %v1603_v36 = vsel %vm1575_vm6, %v1597_v34, 0.0 }
 0x4d7   :  { %v1641_v41 = vpop.permute.xlu1 %1640  ;;  %1626 = vadd.xlane.f32.xlu0 %v1625_v35  ;;  %1604 = vadd.xlane.f32.xlu1 %v1603_v36 }
 0x4d8   :  { %v1647_v52 = vsel %vm1575_vm6, %v1641_v41, 0.0 }
 0x4d9   :  { %v1595_v46 = vpop.permute.xlu0 %1594 }
 0x4da   :  { %v1600_v47 = vsel %vm1575_vm6, %v1595_v46, 0.0 }
 0x4db   :  { %1601 = vadd.xlane.f32.xlu0 %v1600_v47  ;;  %v2052_v48 = vpop.permute.xlu1 %2051 }
 0x4dc   :  { %v2059_v56 = vsel %vm2055_vm7, %v2052_v48, 0.0 }
 0x4dd   :  { %v1639_v49 = vpop.permute.xlu0 %1638 }
 0x4de   :  { %v1644_v50 = vsel %vm1575_vm6, %v1639_v49, 0.0  ;;  %v1784_v49 = vld [vmem:[%s4616_s1] sm:$0x7] }
 0x4df   :  { %1623 = vadd.xlane.f32.xlu0 %v1622_v17  ;;  %1645 = vadd.xlane.f32.xlu1 %v1644_v50  ;;  %v2097_v54 = vpop.permute.xlu1 %2096  ;;  %v2133_v29 = vrot.slane %v1784_v49, %v4084_v21 }
 0x4e0   :  { %v2102_v62 = vsel %vm2055_vm7, %v2097_v54, 0.0 }
 0x4e1   :  { %v2050_v51 = vpop.permute.xlu0 %2049 }
 0x4e2   :  { %v2056_v53 = vsel %vm2055_vm7, %v2050_v51, 0.0 }
 0x4e3   :  { %1648 = vadd.xlane.f32.xlu0 %v1647_v52  ;;  %2057 = vadd.xlane.f32.xlu1 %v2056_v53  ;;  %v2099_v59 = vpop.permute.xlu1 %2098  ;;  %v2139_v53 = vrot.slane %v1784_v49, %v4087_v22 }
 0x4e4   :  { %v2105_v6 = vsel %vm2055_vm7, %v2099_v59, 0.0 }
 0x4e5   :  { %v2075_v55 = vpop.permute.xlu0 %2074 }
 0x4e6   :  { %v2080_v57 = vsel %vm2055_vm7, %v2075_v55, 0.0 }
 0x4e7   :  { %2060 = vadd.xlane.f32.xlu0 %v2059_v56  ;;  %2081 = vadd.xlane.f32.xlu1 %v2080_v57  ;;  %v2121_v7 = vpop.permute.xlu1 %2120 }
 0x4e8   :  { %v2127_v15 = vsel %vm2055_vm7, %v2121_v7, 0.0 }
 0x4e9   :  { %v2077_v60 = vpop.permute.xlu0 %2076 }
 0x4ea   :  { %v2083_v61 = vsel %vm2055_vm7, %v2077_v60, 0.0  ;;  %v2147_v60 = vrot.slane %v1784_v49, %v4189_v38  ;;  %v2303_v49 = vld [vmem:[%s4609_s17 + $0x1a0] sm:$0xff] }
 0x4eb   :  { %2103 = vadd.xlane.f32.xlu0 %v2102_v62  ;;  %2084 = vadd.xlane.f32.xlu1 %v2083_v61  ;;  %v1791_v61 = vld [vmem:[%s4613_s22 + $0x28] sm:$0xff] }
 0x4ed   :  { %v2119_v0 = vpop.permute.xlu0 %2118 }
 0x4ee   :  { %v2124_v5 = vsel %vm2055_vm7, %v2119_v0, 0.0 }
 0x4ef   :  { %2106 = vadd.xlane.f32.xlu0 %v2105_v6  ;;  %2125 = vadd.xlane.f32.xlu1 %v2124_v5  ;;  %v1790_v5 = vld [vmem:[%s4613_s22 + $0x20] sm:$0xff] }
 0x4f3   :  { %2128 = vadd.xlane.f32.xlu0 %v2127_v15  ;;  %v3055_v15 = vld [vmem:[%s4618_s10] ss:$0 sm:$0xff] }
 0x500   :  { %3492 = vrot.lane.b32.xlu1 %v3491_v45, %s3796_s26 }
 0x509   :  { %3497 = vrot.lane.b32.xlu0 %v3496_v42, %s3796_s26 }
 0x543   :  { %v1581_v19 = vpop.xlane.xlu1 %1580 }
 0x544   :  { %v1679_v46 = vmul.f32 %v3191_v31, %v1581_v19 }
 0x55c   :  { %v1578_v18 = vpop.xlane.xlu0 %1577 }
 0x55d   :  { %3702 = vrcp.f32 %v1578_v18  ;;  %v1678_v34 = vmul.f32 %v3191_v31, %v1578_v18  ;;  %v292_v18 = vadd.f32 %v3055_v15, %v4287_v13 }
 0x55e   :  { %3704 = vrcp.f32 %v1581_v19 }
 0x55f   :  { %v300_v13 = vmul.f32 0.01, %v292_v18 }
 0x560   :  { %v1627_v20 = vpop.xlane.xlu0 %1626  ;;  %v1605_v23 = vpop.xlane.xlu1 %1604 }
 0x561   :  { %v1655_v10 = vmul.f32 %v1653_v26, %v1605_v23  ;;  %v1661_v1 = vmul.f32 %v1659_v27, %v1627_v20  ;;  %v1788_v20 = vld [vmem:[%s4613_s22 + $0x10] sm:$0xff]  ;;  %v302_v31 = vmax.f32 %v292_v18, %v300_v13  ;;  %v3201_v18 = vld [vmem:[%s4620_s11] ss:$0 sm:$0xff] }
 0x563   :  { %v1663_v35 = vadd.f32 %v1661_v1, %v1655_v10  ;;  %v1786_v1 = vld [vmem:[%s4613_s22] sm:$0xff] }
 0x564   :  { %v1602_v25 = vpop.xlane.xlu0 %1601 }
 0x565   :  { %v1654_v40 = vmul.f32 %v1653_v26, %v1602_v25 }
 0x568   :  { %v1646_v43 = vpop.xlane.xlu1 %1645  ;;  %v1624_v45 = vpop.xlane.xlu0 %1623 }
 0x569   :  { %v1660_v42 = vmul.f32 %v1659_v27, %v1624_v45  ;;  %v1668_v28 = vmul.f32 %v1667_v2, %v1646_v43  ;;  %v1787_v27 = vld [vmem:[%s4613_s22 + $0x8] sm:$0xff] }
 0x56a   :  { %v3703_v51 = vpop.eup %3702 }
 0x56b   :  { %v1662_v30 = vadd.f32 %v1660_v42, %v1654_v40  ;;  %v3705_v54 = vpop.eup %3704 }
 0x56c   :  { %v2058_v32 = vpop.xlane.xlu1 %2057  ;;  %v1649_v33 = vpop.xlane.xlu0 %1648 }
 0x56d   :  { %v1670_v36 = vadd.f32 %v1668_v28, %v1662_v30  ;;  %v1669_v41 = vmul.f32 %v1667_v2, %v1649_v33  ;;  %3706 = vrcp.f32 %v2058_v32  ;;  %v2158_v38 = vmul.f32 %v3200_v63, %v2058_v32  ;;  %v2251_v28 = vld [vmem:[%s4609_s17] sm:$0xff] }
 0x56e   :  { %v297_v2 = vadd.f32 %v4285_v11, %v3055_v15  ;;  %v2307_v32 = vld [vmem:[%s4609_s17 + $0x1c0] sm:$0xff] }
 0x56f   :  { %v1680_v47 = vadd.f32 %v1678_v34, %v1670_v36  ;;  %v1671_v48 = vadd.f32 %v1669_v41, %v1663_v35  ;;  %v2291_v34 = vld [vmem:[%s4609_s17 + $0x140] sm:$0xff]  ;;  %v2306_v35 = vld [vmem:[%s4609_s17 + $0x1b8] sm:$0xff]  ;;  %v2305_v41 = vld [vmem:[%s4609_s17 + $0x1b0] sm:$0xff] }
 0x570   :  { %v2082_v17 = vpop.xlane.xlu1 %2081  ;;  %v2061_v50 = vpop.xlane.xlu0 %2060  ;;  %v301_v30 = vmul.f32 0.01, %v297_v2  ;;  %v2290_v36 = vld [vmem:[%s4609_s17 + $0x138] sm:$0xff] }
 0x571   :  { %v1681_v52 = vadd.f32 %v1679_v46, %v1671_v48  ;;  %v1682_v24 = vmul.f32 %v3703_v51, %v1680_v47  ;;  %3708 = vrcp.f32 %v2061_v50  ;;  %v2134_v62 = vmul.f32 %v2133_v29, %v2082_v17  ;;  %v2289_v46 = vld [vmem:[%s4609_s17 + $0x130] sm:$0xff]  ;;  %v2304_v47 = vld [vmem:[%s4609_s17 + $0x1a8] sm:$0xff]  ;;  %v2287_v17 = vld [vmem:[%s4609_s17 + $0x120] sm:$0xff] }
 0x572   :  { %v2159_v43 = vmul.f32 %v3200_v63, %v2061_v50  ;;  %v303_v33 = vmax.f32 %v297_v2, %v301_v30  ;;  %v2288_v48 = vld [vmem:[%s4609_s17 + $0x128] sm:$0xff]  ;;  %v2302_v50 = vld [vmem:[%s4609_s17 + $0x198] sm:$0xff]  ;;  %v2279_v63 = vld [vmem:[%s4609_s17 + $0xe0] sm:$0xff] }
 0x573   :  { %v1683_v55 = vmul.f32 %v3705_v54, %v1681_v52  ;;  %3352 = vmatprep.mubr.msk.f32.mxu0 %vm1390_vm1, %v1682_v24  ;;  %v2286_v51 = vld [vmem:[%s4609_s17 + $0x118] sm:$0xff]  ;;  %v2301_v52 = vld [vmem:[%s4609_s17 + $0x190] sm:$0xff]  ;;  %v2300_v54 = vld [vmem:[%s4609_s17 + $0x188] sm:$0xff] }
 0x574   :  { %v2085_v56 = vpop.xlane.xlu1 %2084  ;;  %v2104_v57 = vpop.xlane.xlu0 %2103  ;;  %v2284_v24 = vld [vmem:[%s4609_s17 + $0x108] sm:$0xff] }
 0x575   :  { %v2140_v59 = vmul.f32 %v2139_v53, %v2104_v57  ;;  %3353 = vmatmul.mubr.msk.f32.vlgmr.msra.gmra.mxu0 %vm1390_vm1, %v1683_v55  ;;  %v2135_v16 = vmul.f32 %v2133_v29, %v2085_v56  ;;  %v2299_v55 = vld [vmem:[%s4609_s17 + $0x180] sm:$0xff]  ;;  %v2298_v56 = vld [vmem:[%s4609_s17 + $0x178] sm:$0xff] }
 0x576   :  { %3375 = vmatpush3.msra.mxu0 %v1793_v3  ;;  %v2283_v29 = vld [vmem:[%s4609_s17 + $0x100] sm:$0xff]  ;;  %v2282_v57 = vld [vmem:[%s4609_s17 + $0xf8] sm:$0xff] }
 0x577   :  { %3376 = vmatprep.subr.mxu0 %v1792_v58  ;;  %v2142_v6 = vadd.f32 %v2140_v59, %v2134_v62  ;;  %v2281_v59 = vld [vmem:[%s4609_s17 + $0xf0] sm:$0xff]  ;;  %v2295_v62 = vld [vmem:[%s4609_s17 + $0x160] sm:$0xff] }
 0x578   :  { %v2126_v0 = vpop.xlane.xlu1 %2125  ;;  %3377 = vmatpush3.msra.mxu0 %v1792_v58  ;;  %v2107_v4 = vpop.xlane.xlu0 %2106  ;;  %v2297_v58 = vld [vmem:[%s4609_s17 + $0x170] sm:$0xff] }
 0x579   :  { %v2148_v7 = vmul.f32 %v2147_v60, %v2126_v0  ;;  %v2141_v8 = vmul.f32 %v2139_v53, %v2107_v4  ;;  %3378 = vmatprep.subr.mxu0 %v1791_v61  ;;  %v2285_v53 = vld [vmem:[%s4609_s17 + $0x110] sm:$0xff]  ;;  %v2294_v0 = vld [vmem:[%s4609_s17 + $0x158] sm:$0xff] }
 0x57a   :  { %3379 = vmatpush3.msra.mxu0 %v1791_v61  ;;  %v3707_v26 = vpop.eup %3706  ;;  %v2280_v61 = vld [vmem:[%s4609_s17 + $0xe8] sm:$0xff]  ;;  %v2278_v4 = vld [vmem:[%s4609_s17 + $0xd8] sm:$0xff] }
 0x57b   :  { %v2150_v3 = vadd.f32 %v2148_v7, %v2142_v6  ;;  %3380 = vmatprep.subr.mxu0 %v1790_v5  ;;  %v2143_v23 = vadd.f32 %v2141_v8, %v2135_v16  ;;  %v2277_v6 = vld [vmem:[%s4609_s17 + $0xd0] sm:$0xff]  ;;  %v2292_v7 = vld [vmem:[%s4609_s17 + $0x148] sm:$0xff] }
 0x57c   :  { %3381 = vmatpush3.msra.mxu0 %v1790_v5  ;;  %v2129_v19 = vpop.xlane.xlu0 %2128  ;;  %v2293_v5 = vld [vmem:[%s4609_s17 + $0x150] sm:$0xff]  ;;  %v2276_v8 = vld [vmem:[%s4609_s17 + $0xc8] sm:$0xff]  ;;  %v3493_v16 = vpop.permute.xlu1 %3492 }
 0x57d   :  { %v2160_v9 = vadd.f32 %v2158_v38, %v2150_v3  ;;  %v2149_v25 = vmul.f32 %v2147_v60, %v2129_v19  ;;  %3382 = vmatprep.subr.mxu0 %v1789_v12  ;;  %v2296_v60 = vld [vmem:[%s4609_s17 + $0x168] sm:$0xff]  ;;  %v3192_v19 = vld [vmem:[%s4621_s0] ss:$0 sm:$0xff]  ;;  %v3495_v2 = vunpack.i.h.bf16 %v3493_v16  ;;  %s4624_s17 = sld [smem:[#allocation23_spill]] }
 0x57e   :  { %3383 = vmatpush3.msra.mxu0 %v1789_v12  ;;  %v3709_v42 = vpop.eup %3708  ;;  %v2592_v12 = vld [vmem:[%s4619_s7 + $0x78] sm:$0xff] }
 0x57f   :  { %v2162_v45 = vmul.f32 %v3707_v26, %v2160_v9  ;;  %v2151_v10 = vadd.f32 %v2149_v25, %v2143_v23  ;;  %3384 = vmatprep.subr.mxu0 %v1788_v20  ;;  %v3494_v25 = vunpack.i.l.bf16 %v3493_v16  ;;  %v3208_v16 = vld [vmem:[%s4623_s13] ss:$0 sm:$0xff] }
 0x580   :  { %3385 = vmatpush3.msra.mxu0 %v1788_v20  ;;  %v3498_v20 = vpop.permute.xlu0 %3497 }
 0x581   :  { %v2161_v40 = vadd.f32 %v2159_v43, %v2151_v10  ;;  %3386 = vmatprep.subr.mxu0 %v1787_v27  ;;  %3390 = vmatprep.mubr.msk.f32.mxu0 %vm1390_vm1, %v2162_v45  ;;  %v3499_v43 = vunpack.i.l.bf16 %v3498_v20  ;;  %v2591_v10 = vld [vmem:[%s4619_s7 + $0x70] sm:$0xff] }
 0x582   :  { %3387 = vmatpush3.msra.mxu0 %v1787_v27 }
 0x583   :  { %v2163_v11 = vmul.f32 %v3709_v42, %v2161_v40  ;;  %3388 = vmatprep.subr.mxu0 %v1786_v1  ;;  %v2590_v40 = vld [vmem:[%s4619_s7 + $0x68] sm:$0xff] }
 0x584   :  { %3389 = vmatpush3.msra.mxu0 %v1786_v1 }
 0x585   :  { %3391 = vmatmul.mubr.msk.f32.vlgmr.msra.gmra.mxu0 %vm1390_vm1, %v2163_v11  ;;  %3393 = vmatprep.subr.mxu0 %v2251_v28  ;;  %v2589_v11 = vld [vmem:[%s4619_s7 + $0x60] sm:$0xff] }
 0x586   :  { %3395 = vmatprep.mubr.msk.f32.mxu0 %vm2405_vm8, %v302_v31  ;;  %3394 = vmatpush3.msra.mxu0 %v2251_v28  ;;  %v3500_v28 = vunpack.i.h.bf16 %v3498_v20  ;;  %v2588_v31 = vld [vmem:[%s4619_s7 + $0x58] sm:$0xff] }
 0x587   :  { %3266 = vmatprep.subr.mxu0 %v2307_v32  ;;  %v2587_v32 = vld [vmem:[%s4619_s7 + $0x50] sm:$0xff] }
 0x589   :  { %3396 = vmatmul.mubr.msk.f32.vlgmr.msra.gmra.mxu0 %vm2405_vm8, %v303_v33  ;;  %v2586_v33 = vld [vmem:[%s4619_s7 + $0x48] sm:$0xff] }
 0x58a   :  { %3267 = vmatpush3.msra.mxu0 %v2291_v34  ;;  %v2585_v34 = vld [vmem:[%s4619_s7 + $0x40] sm:$0xff] }
 0x58b   :  { %3268 = vmatprep.subr.mxu0 %v2306_v35  ;;  %v2584_v35 = vld [vmem:[%s4619_s7 + $0x38] sm:$0xff] }
 0x58c   :  { %3269 = vmatpush3.msra.mxu0 %v2290_v36  ;;  %v2583_v36 = vld [vmem:[%s4619_s7 + $0x30] sm:$0xff] }
 0x58d   :  { %3270 = vmatprep.subr.mxu0 %v2305_v41  ;;  %v2582_v41 = vld [vmem:[%s4619_s7 + $0x28] sm:$0xff] }
 0x58e   :  { %3271 = vmatpush3.msra.mxu0 %v2289_v46  ;;  %v2581_v46 = vld [vmem:[%s4619_s7 + $0x20] sm:$0xff] }
 0x58f   :  { %3272 = vmatprep.subr.mxu0 %v2304_v47  ;;  %v2580_v47 = vld [vmem:[%s4619_s7 + $0x18] sm:$0xff] }
 0x590   :  { %3273 = vmatpush3.msra.mxu0 %v2288_v48  ;;  %v2579_v48 = vld [vmem:[%s4619_s7 + $0x10] sm:$0xff] }
 0x591   :  { %3274 = vmatprep.subr.mxu0 %v2303_v49  ;;  %v2578_v49 = vld [vmem:[%s4619_s7 + $0x8] sm:$0xff] }
 0x592   :  { %3275 = vmatpush3.msra.mxu0 %v2287_v17  ;;  %v2577_v17 = vld [vmem:[%s4619_s7] sm:$0xff] }
 0x593   :  { %3276 = vmatprep.subr.mxu0 %v2302_v50  ;;  %v2711_v50 = vld [vmem:[%s4622_s9 + $0x78] sm:$0xff] }
 0x594   :  { %3277 = vmatpush3.msra.mxu0 %v2286_v51  ;;  %v2710_v51 = vld [vmem:[%s4622_s9 + $0x70] sm:$0xff]  ;;  %2734 = vmatpush1.msra.mxu1 %v2711_v50  ;;  %v2815_v50 = vld [vmem:[%s4625_s25 + $0x18] sm:$0xff] }
 0x595   :  { %3278 = vmatprep.subr.mxu0 %v2301_v52  ;;  %2735 = vmatprep.subr.mxu1 %v3783_v39  ;;  %v2709_v52 = vld [vmem:[%s4622_s9 + $0x68] sm:$0xff] }
 0x596   :  { %3279 = vmatpush3.msra.mxu0 %v2285_v53  ;;  %2736 = vmatpush1.msra.mxu1 %v2710_v51  ;;  %v2708_v53 = vld [vmem:[%s4622_s9 + $0x60] sm:$0xff]  ;;  %v2814_v51 = vld [vmem:[%s4625_s25 + $0x10] sm:$0xff] }
 0x597   :  { %3280 = vmatprep.subr.mxu0 %v2300_v54  ;;  %2737 = vmatprep.subr.mxu1 %v3783_v39  ;;  %v2707_v54 = vld [vmem:[%s4622_s9 + $0x58] sm:$0xff] }
 0x598   :  { %3281 = vmatpush3.msra.mxu0 %v2284_v24  ;;  %2738 = vmatpush1.msra.mxu1 %v2709_v52  ;;  %v2706_v24 = vld [vmem:[%s4622_s9 + $0x50] sm:$0xff]  ;;  %v2813_v52 = vld [vmem:[%s4625_s25 + $0x8] sm:$0xff] }
 0x599   :  { %3282 = vmatprep.subr.mxu0 %v2299_v55  ;;  %2739 = vmatprep.subr.mxu1 %v3783_v39  ;;  %v2705_v55 = vld [vmem:[%s4622_s9 + $0x48] sm:$0xff] }
 0x59a   :  { %3283 = vmatpush3.msra.mxu0 %v2283_v29  ;;  %2740 = vmatpush1.msra.mxu1 %v2708_v53  ;;  %v2704_v29 = vld [vmem:[%s4622_s9 + $0x40] sm:$0xff] }
 0x59b   :  { %3284 = vmatprep.subr.mxu0 %v2298_v56  ;;  %2741 = vmatprep.subr.mxu1 %v3783_v39  ;;  %v2703_v56 = vld [vmem:[%s4622_s9 + $0x38] sm:$0xff]  ;;  %v2812_v53 = vld [vmem:[%s4625_s25] sm:$0xff] }
 0x59c   :  { %3285 = vmatpush3.msra.mxu0 %v2282_v57  ;;  %2742 = vmatpush1.msra.mxu1 %v2707_v54  ;;  %v2702_v57 = vld [vmem:[%s4622_s9 + $0x30] sm:$0xff] }
 0x59d   :  { %3286 = vmatprep.subr.mxu0 %v2297_v58  ;;  %2743 = vmatprep.subr.mxu1 %v3783_v39  ;;  %v2701_v58 = vld [vmem:[%s4622_s9 + $0x28] sm:$0xff] }
 0x59e   :  { %3287 = vmatpush3.msra.mxu0 %v2281_v59  ;;  %2744 = vmatpush1.msra.mxu1 %v2706_v24  ;;  %v2700_v59 = vld [vmem:[%s4622_s9 + $0x20] sm:$0xff] }
 0x59f   :  { %3288 = vmatprep.subr.mxu0 %v2296_v60  ;;  %2745 = vmatprep.subr.mxu1 %v3783_v39  ;;  %v2699_v60 = vld [vmem:[%s4622_s9 + $0x18] sm:$0xff] }
 0x5a0   :  { %3289 = vmatpush3.msra.mxu0 %v2280_v61  ;;  %2746 = vmatpush1.msra.mxu1 %v2705_v55  ;;  %v2698_v61 = vld [vmem:[%s4622_s9 + $0x10] sm:$0xff] }
 0x5a1   :  { %3290 = vmatprep.subr.mxu0 %v2295_v62  ;;  %2747 = vmatprep.subr.mxu1 %v3783_v39  ;;  %v2697_v62 = vld [vmem:[%s4622_s9 + $0x8] sm:$0xff] }
 0x5a2   :  { %3291 = vmatpush3.msra.mxu0 %v2279_v63  ;;  %2748 = vmatpush1.msra.mxu1 %v2704_v29  ;;  %v2696_v63 = vld [vmem:[%s4622_s9] sm:$0xff] }
 0x5a3   :  { %3292 = vmatprep.subr.mxu0 %v2294_v0  ;;  %2749 = vmatprep.subr.mxu1 %v3783_v39  ;;  %v2719_v0 = vld [vmem:[%s4622_s9 + $0xb8] sm:$0xff] }
 0x5a4   :  { %3293 = vmatpush3.msra.mxu0 %v2278_v4  ;;  %2750 = vmatpush1.msra.mxu1 %v2703_v56  ;;  %v2718_v4 = vld [vmem:[%s4622_s9 + $0xb0] sm:$0xff] }
 0x5a5   :  { %3294 = vmatprep.subr.mxu0 %v2293_v5  ;;  %2751 = vmatprep.subr.mxu1 %v3783_v39  ;;  %v2717_v5 = vld [vmem:[%s4622_s9 + $0xa8] sm:$0xff] }
 0x5a6   :  { %3295 = vmatpush3.msra.mxu0 %v2277_v6  ;;  %2752 = vmatpush1.msra.mxu1 %v2702_v57 }
 0x5a7   :  { %3296 = vmatprep.subr.mxu0 %v2292_v7  ;;  %2753 = vmatprep.subr.mxu1 %v3783_v39 }
 0x5a8   :  { %3297 = vmatpush3.msra.mxu0 %v2276_v8  ;;  %2754 = vmatpush1.msra.mxu1 %v2701_v58 }
 0x5a9   :  { %2627 = vmatprep.subr.mxu0 %v2592_v12  ;;  %2755 = vmatprep.subr.mxu1 %v3783_v39 }
 0x5aa   :  { %2756 = vmatpush1.msra.mxu1 %v2700_v59 }
 0x5ab   :  { %2757 = vmatprep.subr.mxu1 %v3783_v39 }
 0x5ac   :  { %2758 = vmatpush1.msra.mxu1 %v2699_v60 }
 0x5ad   :  { %2759 = vmatprep.subr.mxu1 %v3783_v39 }
 0x5ae   :  { %2760 = vmatpush1.msra.mxu1 %v2698_v61 }
 0x5af   :  { %2761 = vmatprep.subr.mxu1 %v3783_v39 }
 0x5b0   :  { %2762 = vmatpush1.msra.mxu1 %v2697_v62 }
 0x5b1   :  { %2763 = vmatprep.subr.mxu1 %v3783_v39 }
 0x5b2   :  { %2764 = vmatpush1.msra.mxu1 %v2696_v63  ;;  %v3214_v63 = vld [vmem:[%s3985_s3] ss:$0 sm:$0xff]  ;;  %s3799_s3 = smov 36  }
 0x5b3   :  { %2781 = vmatprep.subr.mxu1 %v3783_v39 }
 0x5b4   :  { %2782 = vmatpush2.msra.mxu1 %v2719_v0 }
 0x5b5   :  { %2783 = vmatprep.subr.mxu1 %v3783_v39 }
 0x5b6   :  { %2784 = vmatpush2.msra.mxu1 %v2718_v4 }
 0x5b7   :  { %2785 = vmatprep.subr.mxu1 %v3783_v39 }
 0x5b8   :  { %2786 = vmatpush2.msra.mxu1 %v2717_v5 }
 0x5b9   :  { %2787 = vmatprep.subr.mxu1 %v3783_v39 }
 0x635   :  { %v3354_v15 = vpop.f32.mrf.mxu0 }
 0x636   :  { %v1768_v13 = vadd.f32 %v3354_v15, %v3192_v19 }
 0x637   :  { %v1762_v38 = vpop.f32.mrf.mxu0 }
 0x638   :  { %v1763_v9 = vadd.f32 %v3192_v19, %v1762_v38  ;;  %v2321_v30 = vsel %vm1390_vm1, %v1768_v13, %v3500_v28  ;;  %v2713_v13 = vld [vmem:[%s4622_s9 + $0x88] sm:$0xff] }
 0x63a   :  { %v2320_v1 = vsel %vm1390_vm1, %v1763_v9, %v3495_v2 }
 0x645   :  { %v3392_v3 = vpop.f32.mrf.mxu0 }
 0x646   :  { %v2248_v26 = vadd.f32 %v3392_v3, %v3201_v18 }
 0x647   :  { %v2242_v23 = vpop.f32.mrf.mxu0 }
 0x648   :  { %v2243_v27 = vadd.f32 %v3201_v18, %v2242_v23  ;;  %v2323_v42 = vsel %vm1390_vm1, %v2248_v26, %v3499_v43 }
 0x649   :  { %v3397_v6 = vpop.f32.mrf.mxu0 }
 0x64a   :  { %v2322_v45 = vsel %vm1390_vm1, %v2243_v27, %v3494_v25  ;;  %v2484_v20 = vadd.f32 %v3397_v6, %v4325_v44  ;;  %v2715_v44 = vld [vmem:[%s4622_s9 + $0x98] sm:$0xff] }
 0x64b   :  { %2551 = vmatprep.mubr.f32.mxu0 %v2322_v45  ;;  %v2478_v7 = vpop.f32.mrf.mxu0  ;;  %v2716_v45 = vld [vmem:[%s4622_s9 + $0xa0] sm:$0xff] }
 0x64c   :  { %2552 = vmatmul.mubr.f32.vlgmr.msra.gmra.mxu0 %v2320_v1  ;;  %v2479_v15 = vadd.f32 %v2478_v7, %v4323_v37  ;;  %2788 = vmatpush2.msra.mxu1 %v2716_v45  ;;  %v2712_v1 = vld [vmem:[%s4622_s9 + $0x80] sm:$0xff] }
 0x64d   :  { %2556 = vmatprep.mubr.f32.mxu0 %v2323_v42  ;;  %2628 = vmatpush1.msra.mxu0 %v2591_v10  ;;  %v2714_v10 = vld [vmem:[%s4622_s9 + $0x90] sm:$0xff]  ;;  %v2593_v42 = vld [vmem:[%s4624_s17] sm:$0x3] }
 0x64e   :  { %2629 = vmatprep.subr.mxu0 %v2590_v40  ;;  %2789 = vmatprep.subr.mxu1 %v3783_v39  ;;  %v3217_v40 = vld [vmem:[%s3990_s27] ss:$0 sm:$0xff]  ;;  %v2598_v28 = vrot.slane %v2593_v42, %v4084_v21  ;;  %s4626_s27 = sld [smem:[#allocation25_spill]] }
 0x64f   :  { %2630 = vmatpush1.msra.mxu0 %v2589_v11  ;;  %2790 = vmatpush2.msra.mxu1 %v2715_v44 }
 0x650   :  { %2557 = vmatmul.mubr.f32.gmra.mxu0 %v2321_v30  ;;  %2631 = vmatprep.subr.mxu0 %v2588_v31  ;;  %v2602_v30 = vrot.slane %v2593_v42, %v4087_v22  ;;  %v3218_v42 = vld [vmem:[#allocation2] ss:$0 sm:$0xff] }
 0x651   :  { %2675 = vmatprep.mubr.f32.mxu0 %v3783_v39  ;;  %2632 = vmatpush1.msra.mxu0 %v2587_v32 }
 0x652   :  { %2633 = vmatprep.subr.mxu0 %v2586_v33  ;;  %2791 = vmatprep.subr.mxu1 %v3783_v39 }
 0x653   :  { %2634 = vmatpush1.msra.mxu0 %v2585_v34  ;;  %2792 = vmatpush2.msra.mxu1 %v2714_v10 }
 0x654   :  { %2635 = vmatprep.subr.mxu0 %v2584_v35  ;;  %2793 = vmatprep.subr.mxu1 %v3783_v39  ;;  %v3211_v54 = vld [vmem:[%s4626_s27] ss:$0 sm:$0xff] }
 0x655   :  { %2636 = vmatpush1.msra.mxu0 %v2583_v36  ;;  %2794 = vmatpush2.msra.mxu1 %v2713_v13 }
 0x656   :  { %2637 = vmatprep.subr.mxu0 %v2582_v41  ;;  %2795 = vmatprep.subr.mxu1 %v3783_v39 }
 0x657   :  { %2638 = vmatpush1.msra.mxu0 %v2581_v46  ;;  %2796 = vmatpush2.msra.mxu1 %v2712_v1 }
 0x658   :  { %2639 = vmatprep.subr.mxu0 %v2580_v47  ;;  %2951 = vrot.lane.b32.xlu0 %v3217_v40, %s3797_s21 }
 0x659   :  { %2640 = vmatpush1.msra.mxu0 %v2579_v48 }
 0x65a   :  { %2641 = vmatprep.subr.mxu0 %v2578_v49 }
 0x65b   :  { %2642 = vmatpush1.msra.mxu0 %v2577_v17 }
 0x65c   :  { %3398 = vmatprep.subr.mxu0 %v2815_v50 }
 0x70c   :  { %v3298_v8 = vpop.f32.mrf.mxu0 }
 0x70e   :  { %v3299_v12 = vpop.f32.mrf.mxu0 }
 0x70f   :  { %v3300_v38 = vadd.f32 %v3299_v12, %v3298_v8  ;;  %v2952_v12 = vpop.permute.xlu0 %2951 }
 0x710   :  { %v3301_v3 = vpop.f32.mrf.mxu0 }
 0x711   :  { %v2562_v18 = vadd.f32 %v3300_v38, %v2479_v15 }
 0x712   :  { %v3302_v19 = vpop.f32.mrf.mxu0 }
 0x713   :  { %v2571_v9 = vadd.f32 %v3208_v16, %v2562_v18  ;;  %v3303_v23 = vadd.f32 %v3302_v19, %v3301_v3 }
 0x715   :  { %v2573_v25 = vmul.f32 0.01, %v2571_v9  ;;  %v2563_v26 = vadd.f32 %v3303_v23, %v2484_v20 }
 0x717   :  { %v2575_v27 = vmax.f32 %v2571_v9, %v2573_v25  ;;  %v2572_v2 = vadd.f32 %v3208_v16, %v2563_v26  ;;  %v2913_v16 = vand.u32 127, %v175_v14 }
 0x719   :  { %v2574_v43 = vmul.f32 0.01, %v2572_v2  ;;  %3209 = vmatmul.mubr.msk.f32.vlgmr.msra.gmra.mxu0 %vm1390_vm1, %v2575_v27  ;;  %v2914_v20 = vcvt.s32.f32 %v2913_v16 }
 0x71a   :  { %2681 = vmatprep.mubr.f32.mxu0 %v3783_v39  ;;  %3399 = vmatpush3.msra.mxu0 %v2815_v50 }
 0x71b   :  { %v2576_v37 = vmax.f32 %v2572_v2, %v2574_v43  ;;  %3400 = vmatprep.subr.mxu0 %v2814_v51 }
 0x71c   :  { %3401 = vmatpush3.msra.mxu0 %v2814_v51 }
 0x71d   :  { %3210 = vmatmul.mubr.msk.f32.gmra.mxu0 %vm1390_vm1, %v2576_v37  ;;  %3402 = vmatprep.subr.mxu0 %v2813_v52 }
 0x71e   :  { %3403 = vmatpush3.msra.mxu0 %v2813_v52 }
 0x71f   :  { %3404 = vmatprep.subr.mxu0 %v2812_v53 }
 0x720   :  { %3405 = vmatpush3.msra.mxu0 %v2812_v53 }
 0x7d9   :  { %v2677_v11 = vpop.f32.mrf.mxu0 }
 0x7da   :  { %v2678_v31 = vadd.f32 %v2677_v11, %v2598_v28 }
 0x7db   :  { %v2679_v32 = vpop.f32.mrf.mxu0 }
 0x7dc   :  { %v2680_v33 = vadd.f32 %v2679_v32, %v2602_v30  ;;  %v2688_v34 = vmul.f32 0.01, %v2678_v31 }
 0x7dd   :  { %v2683_v35 = vpop.f32.mrf.mxu0 }
 0x7de   :  { %v2689_v36 = vmul.f32 0.01, %v2680_v33  ;;  %v2684_v41 = vadd.f32 %v2683_v35, %v2598_v28  ;;  %v2692_v48 = vmax.f32 %v2678_v31, %v2688_v34 }
 0x7df   :  { %v2685_v39 = vpop.f32.mrf.mxu0 }
 0x7e0   :  { %v2693_v46 = vmax.f32 %v2680_v33, %v2689_v36  ;;  %v2686_v47 = vadd.f32 %v2685_v39, %v2602_v30  ;;  %v2690_v49 = vmul.f32 0.01, %v2684_v41 }
 0x7e2   :  { %v2691_v17 = vmul.f32 0.01, %v2686_v47  ;;  %3212 = vmatprep.mubr.msk.f32.mxu1 %vm1390_vm1, %v2693_v46  ;;  %v2694_v22 = vmax.f32 %v2684_v41, %v2690_v49 }
 0x7e3   :  { %2798 = vmatmul.mubr.f32.vlgmr.msra.gmra.mxu1 %v2692_v48 }
 0x7e4   :  { %v2695_v21 = vmax.f32 %v2686_v47, %v2691_v17 }
 0x7e6   :  { %3213 = vmatprep.mubr.msk.f32.mxu1 %vm1390_vm1, %v2695_v21 }
 0x7e7   :  { %2803 = vmatmul.mubr.f32.gmra.mxu1 %v2694_v22 }
 0x8a3   :  { %v2799_v24 = vpop.f32.mrf.mxu1 }
 0x8a4   :  { %v2800_v55 = vadd.f32 %v3211_v54, %v2799_v24 }
 0x8a5   :  { %v2801_v29 = vpop.f32.mrf.mxu1 }
 0x8a6   :  { %v2808_v56 = vmul.f32 0.01, %v2800_v55 }
 0x8a7   :  { %v2804_v57 = vpop.f32.mrf.mxu1 }
 0x8a8   :  { %v2810_v58 = vmax.f32 %v2800_v55, %v2808_v56  ;;  %v2805_v59 = vadd.f32 %v3211_v54, %v2804_v57 }
 0x8a9   :  { %v2806_v60 = vpop.f32.mrf.mxu1 }
 0x8aa   :  { %v2809_v61 = vmul.f32 0.01, %v2805_v59  ;;  %3406 = vmatprep.mubr.msk.f32.mxu0 %vm2823_vm9, %v2810_v58  ;;  %v2954_v38 = vmul.f32 %v2952_v12, %v2810_v58 }
 0x8ac   :  { %v2811_v62 = vmax.f32 %v2805_v59, %v2809_v61 }
 0x8ae   :  { %3407 = vmatmul.mubr.msk.f32.vlgmr.msra.gmra.mxu0 %vm2823_vm9, %v2811_v62  ;;  %v2955_v15 = vmul.f32 %v2952_v12, %v2811_v62 }
 0x96e   :  { %v3408_v0 = vpop.f32.mrf.mxu0 }
 0x96f   :  { %v4547_v4 = vadd.f32 %v3408_v0, %v3214_v63 }
 0x970   :  { %v2896_v5 = vpop.f32.mrf.mxu0 }
 0x971   :  { %v4549_v6 = vadd.f32 %v3214_v63, %v2896_v5  ;;  %v2909_v7 = vsel %vm2905_vm10, %v4547_v4, -inf }
 0x972   :  { %2910 = vmax.xlane.f32.xlu0 %v2909_v7 }
 0x973   :  { %v2906_v8 = vsel %vm2905_vm10, %v4549_v6, -inf }
 0x974   :  { %2907 = vmax.xlane.f32.xlu1 %v2906_v8 }
 0x985   :  { %2960 = vrot.lane.b32.xlu1 %v2955_v15, %s3798_s29 }
 0x988   :  { %2958 = vrot.lane.b32.xlu0 %v2954_v38, %s3798_s29 }
 0x9fb   :  { %v4556_v3 = vpop.xlane.xlu0 %2910 }
 0x9fc   :  { %v2926_v18 = vsub.f32 %v4547_v4, %v4556_v3  ;;  %vm2916_vm11 = vcmp.ge.f32.partialorder %v4547_v4, %v4556_v3 }
 0x9fd   :  { %v2908_v19 = vpop.xlane.xlu1 %2907  ;;  %v2918_v2 = vsel %vm2916_vm11, %v2914_v20, 36.0 }
 0x9fe   :  { %v2929_v9 = vmul.f32 1.442695, %v2926_v18  ;;  %v2925_v23 = vsub.f32 %v4549_v6, %v2908_v19  ;;  %vm2915_vm12 = vcmp.ge.f32.partialorder %v4549_v6, %v2908_v19  ;;  %v2922_v37 = vsel %vm2905_vm10, %v2918_v2, inf }
 0x9ff   :  { %v2959_v25 = vpop.permute.xlu0 %2958  ;;  %v2917_v45 = vsel %vm2915_vm12, %v2914_v20, 36.0 }
 0xa00   :  { %3710 = vpow2.f32 %v2929_v9  ;;  %v2927_v26 = vmul.f32 1.442695, %v2925_v23  ;;  %v2964_v27 = vsel %vm2823_vm9, %v2959_v25, 0.0  ;;  %v2919_v44 = vsel %vm2905_vm10, %v2917_v45, inf }
 0xa01   :  { %2965 = vadd.xlane.f32.xlu1 %v2964_v27  ;;  %v2961_v14 = vpop.permute.xlu1 %2960 }
 0xa02   :  { %3712 = vpow2.f32 %v2927_v26  ;;  %v2967_v43 = vsel %vm2823_vm9, %v2961_v14, 0.0 }
 0xa03   :  { %2968 = vadd.xlane.f32.xlu0 %v2967_v43 }
 0xa05   :  { %2923 = vmin.xlane.f32.xlu1 %v2922_v37 }
 0xa09   :  { %2920 = vmin.xlane.f32.xlu1 %v2919_v44 }
 0xa0d   :  { %v3711_v10 = vpop.eup %3710 }
 0xa0e   :  { %v2934_v13 = vsel %vm2905_vm10, %v3711_v10, 0.0 }
 0xa0f   :  { %v3713_v1 = vpop.eup %3712  ;;  %2935 = vadd.xlane.f32.xlu1 %v2934_v13 }
 0xa10   :  { %v2931_v40 = vsel %vm2905_vm10, %v3713_v1, 0.0 }
 0xa11   :  { %2932 = vadd.xlane.f32.xlu0 %v2931_v40 }
 0xa8a   :  { %v2966_v28 = vpop.xlane.xlu1 %2965 }
 0xa8b   :  { %v2977_v30 = vadd.f32 %v3218_v42, %v2966_v28 }
 0xa8c   :  { %v2969_v11 = vpop.xlane.xlu0 %2968 }
 0xa8d   :  { %v2978_v31 = vadd.f32 %v3218_v42, %v2969_v11  ;;  %2981 = vrot.lane.b32.xlu0 %v2977_v30, %s3799_s3 }
 0xa8e   :  { %v2924_v32 = vpop.xlane.xlu1 %2923 }
 0xa8f   :  { %2983 = vrot.lane.b32.xlu1 %v2978_v31, %s3799_s3 }
 0xa92   :  { %v2921_v33 = vpop.xlane.xlu1 %2920 }
 0xa98   :  { %v2936_v35 = vpop.xlane.xlu1 %2935 }
 0xa9a   :  { %v2933_v34 = vpop.xlane.xlu0 %2932 }
 0xa9b   :  { %3714 = vlog2.f32 %v2933_v34 }
 0xa9c   :  { %3716 = vlog2.f32 %v2936_v35 }
 0xaa8   :  { %v3715_v36 = vpop.eup %3714 }
 0xaa9   :  { %v3717_v41 = vpop.eup %3716  ;;  %v2938_v39 = vmul.f32 0.6931472, %v3715_v36 }
 0xaaa   :  { %v2940_v46 = vmul.f32 0.6931472, %v3717_v41 }
 0xaab   :  { %v2941_v47 = vadd.f32 %v2938_v39, %v2908_v19 }
 0xaac   :  { %v2942_v48 = vadd.f32 %v2940_v46, %v4556_v3 }
 0xaad   :  { %v2943_v49 = vsub.f32 %v2908_v19, %v2941_v47 }
 0xaae   :  { %v2944_v22 = vsub.f32 %v4556_v3, %v2942_v48 }
 0xaff   :  { %v2982_v17 = vpop.permute.xlu0 %2981 }
 0xb00   :  { %v2987_v21 = vsel %vm2905_vm10, %v4549_v6, %v2982_v17 }
 0xb01   :  { %v2990_v50 = vsel %vm2989_vm13, %v2987_v21, %v2943_v49  ;;  %v2984_v51 = vpop.permute.xlu1 %2983 }
 0xb02   :  { %v2993_v52 = vsel %vm2992_vm14, %v2990_v50, %v2921_v33  ;;  %v2988_v53 = vsel %vm2905_vm10, %v4547_v4, %v2984_v51 }
 0xb03   :  { %v2996_v54 = vsel %vm2995_vm15, %v2993_v52, 0.0  ;;  %v2991_v24 = vsel %vm2989_vm13, %v2988_v53, %v2944_v22 }
 0xb04   :  { %2998 = vst [vmem:[#allocation3] sm:$0xff] %v2996_v54  ;;  %v2994_v55 = vsel %vm2992_vm14, %v2991_v24, %v2924_v32 }
 0xb05   :  { %v2997_v29 = vsel %vm2995_vm15, %v2994_v55, 0.0 }
 0xb06   :  { %2999 = vst [vmem:[#allocation3 + $0x8] sm:$0xff] %v2997_v29 }
 0xb07   :  { %3731 = shalt.err (!%p3728_p4)
}
 0xb08   :  { %s3801_s5 = smov 128  }
 0xb09   :  { %3011 = dma.vmem_to_hbm [thread:$0]  %s3006_s14, 256, %s3998_s20, [#allocation4], %s3801_s5, %s3801_s5, %s3792_s12  }
 0xb0a   :  { %3740 = dma.done.wait [#allocation4], 256  }
 0xb0b   :  { %3741 = vsyncadd [#allocation4], 4294967040 }
 0xb0c   :  { %3015 = vsyncpa [#allocation4], 1 }

</bundles_post_ra>
